<compile_context>
chip_gen: v7x
topology: tpu7x:2x2x1
jax: 0.10.0
libtpu: 0.0.40
codegen_flags: <defaults>
</compile_context>

<pallas_src>
import math

import jax
import jax.numpy as jnp
from jax.experimental import pallas as pl
from jax.experimental.pallas import tpu as pltpu

BN_EPS = 1e-5
BN_SCALE = 1.0 / math.sqrt(1.0 + BN_EPS)  # eval-mode BatchNorm1d (default stats)


# ---------------------------------------------------------------------------
# Kernel A: fused TemporalConvNet (subject + batched neighbors) + last-step
#           gather + NetVLAD core.  grid=(2,) over the acc/mic modality axis.
# ---------------------------------------------------------------------------
def build_tcn_vlad(B, T, Cin, H, Kc, ksize, level_cfg, n_subj, n_neigh):
    """level_cfg: tuple of (dilation, has_downsample) per TCN level."""
    D = H
    maxpad = (ksize - 1) * max(d for d, _ in level_cfg)
    Cmax = max(Cin, H)
    NbN = 4 * B                      # neighbor slab rows
    n_params = n_subj + n_neigh

    def mm_td(x, w):
        # (Nb, T, Ci) @ (Ci, Co) -> (Nb, T, Co)  via a 2D matmul
        nb, tt, ci = x.shape
        y = jnp.dot(x.reshape(nb * tt, ci), w,
                    preferred_element_type=jnp.float32)
        return y.reshape(nb, tt, w.shape[-1])

    def causal_conv(x, wflat, b, dil, pad_ref, relu):
        """Causal dilated conv == Conv1d(pad=(K-1)*dil) + Chomp1d.

        The K taps are staged side-by-side along channels in the zero-padded
        VMEM scratch, so the conv is a single (Nb*T, K*Ci) @ (K*Ci, Co) matmul
        (tap-concatenated contraction, no HBM pad).
        """
        nb, tt, ci = x.shape
        kk = ksize
        assert wflat.shape[0] == kk * ci
        co = wflat.shape[1]
        # zero the causal-pad rows for the channel range used by this conv
        pad_ref[0:nb, 0:maxpad, 0:kk * ci] = jnp.zeros(
            (nb, maxpad, kk * ci), jnp.float32)
        # tap k (time shift s=(K-1-k)*dil) goes to channel block [k*Ci,(k+1)*Ci)
        for k in range(kk):
            s = (kk - 1 - k) * dil
            pad_ref[0:nb, s:s + tt, k * ci:(k + 1) * ci] = x
        slab = pad_ref[0:nb, 0:tt, 0:kk * ci]            # (Nb, T, K*Ci)
        y = jnp.dot(slab.reshape(nb * tt, kk * ci), wflat,
                    preferred_element_type=jnp.float32).reshape(nb, tt, co)
        y = y + b
        return jnp.maximum(y, 0.0) if relu else y

    def tcn_last(x, lens3, prefs, pad_ref):
        """Full TCN stack + fused last-valid-timestep gather -> (Nb, H)."""
        nb = x.shape[0]
        y = x
        it = 0
        for (dil, has_down) in level_cfg:
            w1 = prefs[it][...]
            b1 = prefs[it + 1][...]
            w2 = prefs[it + 2][...]
            b2 = prefs[it + 3][...]
            it += 4
            if has_down:
                wd = prefs[it][...]
                bd = prefs[it + 1][...]
                it += 2
            else:
                wd = bd = None
            out = causal_conv(y, w1, b1, dil, pad_ref, True)
            out = causal_conv(out, w2, b2, dil, pad_ref, True)
            # dropout: eval mode -> identity
            res = y if wd is None else mm_td(y, wd) + bd
            y = jnp.maximum(out + res, 0.0)
        # last valid timestep (rows with len==0 stay zero, as in the reference)
        ti = jax.lax.broadcasted_iota(jnp.int32, (nb, T, 1), 1)
        sel = jnp.logical_and(ti == (lens3 - 1), lens3 > 0).astype(jnp.float32)
        return jnp.sum(y * sel, axis=1)                  # (Nb, H)

    def kernel(xs_ref, ls_ref, xn_ref, ln_ref, *rest):
        prefs = rest[:n_params]
        c_ref, c2_ref, o_ref, pad_ref, stack_ref = rest[n_params:]

        # ---- two TCN chains, intermediates fully VMEM-resident --------------
        last_s = tcn_last(xs_ref[...], ls_ref[...], prefs[:n_subj], pad_ref)
        last_n = tcn_last(xn_ref[...], ln_ref[...], prefs[n_subj:], pad_ref)

        # ---- interleave subject + 4 neighbors per sample: (5B, H) stack -----
        for b in range(B):
            stack_ref[5 * b:5 * b + 1, :] = last_s[b:b + 1, :]
            stack_ref[5 * b + 1:5 * b + 5, :] = last_n[4 * b:4 * b + 4, :]

        # ---- NetVLAD core (eval-mode BN on assignments) ----------------------
        clusters = c_ref[...]                             # (D, Kc)
        clusters2 = c2_ref[...]                           # (D, Kc)
        vlads = []
        for b in range(B):
            xb = stack_ref[5 * b:5 * b + 5, :]            # (5, H)
            act = jnp.dot(xb, clusters,
                          preferred_element_type=jnp.float32) * BN_SCALE
            act = jnp.exp(act - jnp.max(act, axis=-1, keepdims=True))
            act = act * pl.reciprocal(
                jnp.sum(act, axis=-1, keepdims=True), approx=True)
            a_sum = jnp.sum(act, axis=0, keepdims=True)   # (1, Kc)
            # vlad[d, k] = sum_n x[n, d] * act[n, k]
            vlad = jax.lax.dot_general(
                xb, act, (((0,), (0,)), ((), ())),
                preferred_element_type=jnp.float32)       # (D, Kc)
            vlad = vlad - clusters2 * a_sum
            # intra-cluster L2 norm (F.normalize dim=1), then global L2 norm
            inv_in = jax.lax.rsqrt(jnp.maximum(
                jnp.sum(vlad * vlad, axis=0, keepdims=True), 1e-24))
            vlad = vlad * inv_in
            inv_gl = jax.lax.rsqrt(jnp.maximum(
                jnp.sum(vlad * vlad, axis=(0, 1), keepdims=True), 1e-24))
            vlads.append(vlad * inv_gl)
        o_ref[...] = jnp.stack(vlads, axis=0).astype(o_ref.dtype)  # (B, D, Kc)

    def mspec(arr):
        rest_shape = tuple(int(s) for s in arr.shape[1:])
        nz = (0,) * len(rest_shape)
        return pl.BlockSpec((None,) + rest_shape, lambda m, _z=nz: (m,) + _z)

    def call(x_sub, l_sub, x_nei, l_nei, subj_flat, neigh_flat,
             clusters, clusters2):
        args = [x_sub, l_sub, x_nei, l_nei,
                *subj_flat, *neigh_flat, clusters, clusters2]
        return pl.pallas_call(
            kernel,
            out_shape=jax.ShapeDtypeStruct((2, B, D, Kc), jnp.float32),
            grid=(2,),                                    # acc / mic modality
            in_specs=[mspec(a) for a in args],
            out_specs=pl.BlockSpec((None, B, D, Kc), lambda m: (m, 0, 0, 0)),
            scratch_shapes=[
                pltpu.VMEM((NbN, T + maxpad, ksize * Cmax), jnp.float32),
                pltpu.VMEM((5 * B, H), jnp.float32),
            ],
            compiler_params=pltpu.CompilerParams(
                dimension_semantics=("parallel",)),
        )(*args)

    return call


# ---------------------------------------------------------------------------
# Kernel B: head (hidden1 proj + context gating + fc1/leaky_relu + fcout)
# ---------------------------------------------------------------------------
def build_head(B, cod, odim):
    def kernel(va_ref, vm_ref, h1a_ref, h1m_ref, gwa_ref, gwm_ref,
               w1a_ref, w1b_ref, b1_ref, wo_ref, bo_ref, o_ref):
        za = jnp.dot(va_ref[...], h1a_ref[...],
                     preferred_element_type=jnp.float32)
        zm = jnp.dot(vm_ref[...], h1m_ref[...],
                     preferred_element_type=jnp.float32)
        # context gating (GatingContext, eval-mode batch norm)
        ga = jax.nn.sigmoid(
            jnp.dot(za, gwa_ref[...], preferred_element_type=jnp.float32)
            * BN_SCALE)
        gm = jax.nn.sigmoid(
            jnp.dot(zm, gwm_ref[...], preferred_element_type=jnp.float32)
            * BN_SCALE)
        za = za * ga
        zm = zm * gm
        # fc1 on cat([za, zm], 1)  ==  za @ W1a + zm @ W1b + b1
        h = (jnp.dot(za, w1a_ref[...], preferred_element_type=jnp.float32)
             + jnp.dot(zm, w1b_ref[...], preferred_element_type=jnp.float32)
             + b1_ref[...])
        h = jnp.where(h >= 0.0, h, 0.01 * h)              # F.leaky_relu
        # dropout: eval mode -> identity
        out = (jnp.dot(h, wo_ref[...], preferred_element_type=jnp.float32)
               + bo_ref[...])
        o_ref[...] = out.astype(o_ref.dtype)

    def call(va, vm, p):
        return pl.pallas_call(
            kernel, out_shape=jax.ShapeDtypeStruct((B, odim), jnp.float32),
        )(va, vm, p["h1_acc"], p["h1_mic"], p["gw_acc"], p["gw_mic"],
          p["w1a"], p["w1b"], p["b1"], p["wo"], p["bo"])

    return call


# ---------------------------------------------------------------------------
# Parameter packing: stack acc/mic weights along a leading modality axis and
# flatten conv weights to (K*Cin, Cout) for the tap-concatenated matmul.
# ---------------------------------------------------------------------------
def pack_params(params, levels, ksize):
    def flat_conv(w):                    # (K, Ci, Co) -> (K*Ci, Co)
        K, ci, co = w.shape
        return w.reshape(K * ci, co)

    def stack_tcn(blocks_acc, blocks_mic):
        flat, cfg = [], []
        for lvl in range(levels):
            pa, pm = blocks_acc[lvl], blocks_mic[lvl]
            has_down = "wd" in pa
            cfg.append((2 ** lvl, has_down))
            flat.append(jnp.stack([flat_conv(pa["w1"]), flat_conv(pm["w1"])], 0))
            flat.append(jnp.stack([pa["b1"].reshape(1, -1),
                                   pm["b1"].reshape(1, -1)], 0))
            flat.append(jnp.stack([flat_conv(pa["w2"]), flat_conv(pm["w2"])], 0))
            flat.append(jnp.stack([pa["b2"].reshape(1, -1),
                                   pm["b2"].reshape(1, -1)], 0))
            if has_down:
                flat.append(jnp.stack([pa["wd"][0], pm["wd"][0]], 0))
                flat.append(jnp.stack([pa["bd"].reshape(1, -1),
                                       pm["bd"].reshape(1, -1)], 0))
        return flat, tuple(cfg)

    subj_flat, cfg = stack_tcn(params["tcn_subject_acc"],
                               params["tcn_subject_mic"])
    neigh_flat, cfg2 = stack_tcn(params["tcn_neighbors_acc"],
                                 params["tcn_neighbors_mic"])
    assert cfg == cfg2
    clusters = jnp.stack([params["vlad_acc"]["clusters"],
                          params["vlad_mic"]["clusters"]], 0)
    clusters2 = jnp.stack([params["vlad_acc"]["clusters2"],
                           params["vlad_mic"]["clusters2"]], 0)
    packed = {"subj": subj_flat, "neigh": neigh_flat,
              "clusters": clusters, "clusters2": clusters2,
              "head": params["head"]}
    return packed, cfg


# ---------------------------------------------------------------------------
# Forward pass builder
# ---------------------------------------------------------------------------
def make_forward(params, *, input_dim, hidden_dim, levels, ksize,
                 cluster_size, cluster_output_dim, output_dim, B, T):
    packed, level_cfg = pack_params(params, levels, ksize)
    tcn_vlad = build_tcn_vlad(B, T, input_dim, hidden_dim, cluster_size, ksize,
                              level_cfg, len(packed["subj"]),
                              len(packed["neigh"]))
    head = build_head(B, cluster_output_dim, output_dim)
    D, Kc = hidden_dim, cluster_size

    @jax.jit
    def forward(x_acc, x_mic, acc_lens, mic_lens):
        def split(x, lens):
            x5 = x.reshape(B, 5, T, input_dim)
            l5 = lens.reshape(B, 5).astype(jnp.int32)
            x_sub = x5[:, 0]                                # (B, T, Cin)
            x_nei = x5[:, 1:].reshape(4 * B, T, input_dim)  # row b*4+(i-1)
            l_sub = l5[:, 0].reshape(B, 1, 1)
            l_nei = l5[:, 1:].reshape(4 * B, 1, 1)
            return x_sub, x_nei, l_sub, l_nei

        xa_s, xa_n, la_s, la_n = split(x_acc, acc_lens)
        xm_s, xm_n, lm_s, lm_n = split(x_mic, mic_lens)

        x_sub = jnp.stack([xa_s, xm_s], 0)       # (2, B, T, Cin)
        x_nei = jnp.stack([xa_n, xm_n], 0)       # (2, 4B, T, Cin)
        l_sub = jnp.stack([la_s, lm_s], 0)       # (2, B, 1, 1)
        l_nei = jnp.stack([la_n, lm_n], 0)       # (2, 4B, 1, 1)

        vlad = tcn_vlad(x_sub, l_sub, x_nei, l_nei,
                        packed["subj"], packed["neigh"],
                        packed["clusters"], packed["clusters2"])  # (2,B,D,Kc)
        va = vlad[0].reshape(B, D * Kc)
        vm = vlad[1].reshape(B, D * Kc)
        return head(va, vm, packed["head"])

    return forward


# ---------------------------------------------------------------------------
# Deterministic parameter initialization (synthetic; no checkpoint load)
# ---------------------------------------------------------------------------
def init_tcn_params(key, input_dim, hidden_dim, levels, ksize):
    blocks = []
    for lvl in range(levels):
        cin = input_dim if lvl == 0 else hidden_dim
        key, k1, k2, k3, k4, k5, k6 = jax.random.split(key, 7)
        p = {
            "w1": 0.1 * jax.random.normal(k1, (ksize, cin, hidden_dim), jnp.float32),
            "b1": 0.1 * jax.random.normal(k2, (hidden_dim,), jnp.float32),
            "w2": 0.1 * jax.random.normal(k3, (ksize, hidden_dim, hidden_dim), jnp.float32),
            "b2": 0.1 * jax.random.normal(k4, (hidden_dim,), jnp.float32),
        }
        if cin != hidden_dim:
            p["wd"] = 0.1 * jax.random.normal(k5, (1, cin, hidden_dim), jnp.float32)
            p["bd"] = 0.1 * jax.random.normal(k6, (hidden_dim,), jnp.float32)
        blocks.append(p)
    return blocks, key


def init_params(key, input_dim, hidden_dim, levels, ksize,
                cluster_size, cluster_output_dim, output_dim):
    params = {}
    for name in ["tcn_subject_acc", "tcn_neighbors_acc",
                 "tcn_subject_mic", "tcn_neighbors_mic"]:
        params[name], key = init_tcn_params(key, input_dim, hidden_dim,
                                            levels, ksize)

    D, K, cod = hidden_dim, cluster_size, cluster_output_dim
    head_p = {}
    for tag in ["acc", "mic"]:
        key, k1, k2, k3, k4 = jax.random.split(key, 5)
        params[f"vlad_{tag}"] = {
            "clusters": (1.0 / math.sqrt(D)) * jax.random.normal(k1, (D, K), jnp.float32),
            "clusters2": (1.0 / math.sqrt(D)) * jax.random.normal(k2, (D, K), jnp.float32),
        }
        head_p[f"h1_{tag}"] = (1.0 / math.sqrt(K)) * jax.random.normal(
            k3, (D * K, cod), jnp.float32)
        head_p[f"gw_{tag}"] = (1.0 / math.sqrt(cod)) * jax.random.normal(
            k4, (cod, cod), jnp.float32)

    key, k1, k2, k3, k4, k5 = jax.random.split(key, 6)
    # fc1: Linear(2*cod, cod) -> W^T split into acc / mic halves
    head_p["w1a"] = 0.1 * jax.random.normal(k1, (cod, cod), jnp.float32)
    head_p["w1b"] = 0.1 * jax.random.normal(k2, (cod, cod), jnp.float32)
    head_p["b1"] = 0.1 * jax.random.normal(k3, (1, cod), jnp.float32)
    # fcout: Linear(cod, output_dim) -> W^T
    head_p["wo"] = 0.1 * jax.random.normal(k4, (cod, output_dim), jnp.float32)
    head_p["bo"] = 0.1 * jax.random.normal(k5, (1, output_dim), jnp.float32)
    params["head"] = head_p
    return params


if __name__ == "__main__":
    # Small config consistent with the module's forward.
    input_dim, hidden_dim, levels = 4, 16, 2
    kernel_size = 2
    cluster_size, cluster_output_dim, output_dim = 8, 32, 4
    B, T = 2, 16           # B "subject groups" -> total batch = 5*B

    root = jax.random.PRNGKey(0)
    kx, km, kl, kl2, kp = jax.random.split(root, 5)
    x_acc = jax.random.normal(kx, (5 * B, T, input_dim), jnp.float32)
    x_mic = jax.random.normal(km, (5 * B, T, input_dim), jnp.float32)
    acc_lens = jax.random.randint(kl, (5 * B,), 1, T + 1).astype(jnp.int32)
    mic_lens = jax.random.randint(kl2, (5 * B,), 1, T + 1).astype(jnp.int32)

    params = init_params(kp, input_dim, hidden_dim, levels, kernel_size,
                         cluster_size, cluster_output_dim, output_dim)
    forward = make_forward(params, input_dim=input_dim, hidden_dim=hidden_dim,
                           levels=levels, ksize=kernel_size,
                           cluster_size=cluster_size,
                           cluster_output_dim=cluster_output_dim,
                           output_dim=output_dim, B=B, T=T)

    out = forward(x_acc, x_mic, acc_lens, mic_lens)
    out = jax.block_until_ready(out)
    assert out.shape == (B, output_dim)
    print("KERNEL_OK")
</pallas_src>

<mosaic_0001>
module attributes {stable_mosaic.version = 11 : i64} {
  func.func @kernel(%arg0: memref<2x128xf32, #tpu.memory_space<vmem>>, %arg1: memref<2x128xf32, #tpu.memory_space<vmem>>, %arg2: memref<128x32xf32, #tpu.memory_space<vmem>>, %arg3: memref<128x32xf32, #tpu.memory_space<vmem>>, %arg4: memref<32x32xf32, #tpu.memory_space<vmem>>, %arg5: memref<32x32xf32, #tpu.memory_space<vmem>>, %arg6: memref<32x32xf32, #tpu.memory_space<vmem>>, %arg7: memref<32x32xf32, #tpu.memory_space<vmem>>, %arg8: memref<1x32xf32, #tpu.memory_space<vmem>>, %arg9: memref<32x4xf32, #tpu.memory_space<vmem>>, %arg10: memref<1x4xf32, #tpu.memory_space<vmem>>, %arg11: memref<2x4xf32, #tpu.memory_space<vmem>>) attributes {dimension_semantics = [], scalar_prefetch = 0 : i64, scratch_operands = 0 : i64, tpu.core_type = #tpu.core_type<tc>} {
    %c0 = arith.constant 0 : index
    %c0_0 = arith.constant 0 : index
    %0 = vector.load %arg0[%c0, %c0_0] : memref<2x128xf32, #tpu.memory_space<vmem>>, vector<2x128xf32>
    %c0_1 = arith.constant 0 : index
    %c0_2 = arith.constant 0 : index
    %1 = vector.load %arg2[%c0_1, %c0_2] : memref<128x32xf32, #tpu.memory_space<vmem>>, vector<128x32xf32>
    %cst = arith.constant dense<0.000000e+00> : vector<2x32xf32>
    %2 = tpu.matmul %0, %1, %cst {dimension_numbers = #tpu.dot_dimension_numbers<[1], [0], [0], [1], [0, 0, 1, 1], [], []>} : vector<2x128xf32>, vector<128x32xf32>, vector<2x32xf32> -> vector<2x32xf32>
    %c0_3 = arith.constant 0 : index
    %c0_4 = arith.constant 0 : index
    %3 = vector.load %arg1[%c0_3, %c0_4] : memref<2x128xf32, #tpu.memory_space<vmem>>, vector<2x128xf32>
    %c0_5 = arith.constant 0 : index
    %c0_6 = arith.constant 0 : index
    %4 = vector.load %arg3[%c0_5, %c0_6] : memref<128x32xf32, #tpu.memory_space<vmem>>, vector<128x32xf32>
    %cst_7 = arith.constant dense<0.000000e+00> : vector<2x32xf32>
    %5 = tpu.matmul %3, %4, %cst_7 {dimension_numbers = #tpu.dot_dimension_numbers<[1], [0], [0], [1], [0, 0, 1, 1], [], []>} : vector<2x128xf32>, vector<128x32xf32>, vector<2x32xf32> -> vector<2x32xf32>
    %c0_8 = arith.constant 0 : index
    %c0_9 = arith.constant 0 : index
    %6 = vector.load %arg4[%c0_8, %c0_9] : memref<32x32xf32, #tpu.memory_space<vmem>>, vector<32x32xf32>
    %cst_10 = arith.constant dense<0.000000e+00> : vector<2x32xf32>
    %7 = tpu.matmul %2, %6, %cst_10 {dimension_numbers = #tpu.dot_dimension_numbers<[1], [0], [0], [1], [0, 0, 1, 1], [], []>} : vector<2x32xf32>, vector<32x32xf32>, vector<2x32xf32> -> vector<2x32xf32>
    %cst_11 = arith.constant 0.999994993 : f32
    %8 = vector.broadcast %cst_11 : f32 to vector<2x32xf32>
    %9 = arith.mulf %7, %8 : vector<2x32xf32>
    %10 = arith.negf %9 : vector<2x32xf32>
    %11 = math.exp %10 : vector<2x32xf32>
    %cst_12 = arith.constant 1.000000e+00 : f32
    %12 = vector.broadcast %cst_12 : f32 to vector<2x32xf32>
    %13 = arith.addf %12, %11 : vector<2x32xf32>
    %14 = arith.divf %12, %13 : vector<2x32xf32>
    %c0_13 = arith.constant 0 : index
    %c0_14 = arith.constant 0 : index
    %15 = vector.load %arg5[%c0_13, %c0_14] : memref<32x32xf32, #tpu.memory_space<vmem>>, vector<32x32xf32>
    %cst_15 = arith.constant dense<0.000000e+00> : vector<2x32xf32>
    %16 = tpu.matmul %5, %15, %cst_15 {dimension_numbers = #tpu.dot_dimension_numbers<[1], [0], [0], [1], [0, 0, 1, 1], [], []>} : vector<2x32xf32>, vector<32x32xf32>, vector<2x32xf32> -> vector<2x32xf32>
    %cst_16 = arith.constant 0.999994993 : f32
    %17 = vector.broadcast %cst_16 : f32 to vector<2x32xf32>
    %18 = arith.mulf %16, %17 : vector<2x32xf32>
    %19 = arith.negf %18 : vector<2x32xf32>
    %20 = math.exp %19 : vector<2x32xf32>
    %cst_17 = arith.constant 1.000000e+00 : f32
    %21 = vector.broadcast %cst_17 : f32 to vector<2x32xf32>
    %22 = arith.addf %21, %20 : vector<2x32xf32>
    %23 = arith.divf %21, %22 : vector<2x32xf32>
    %24 = arith.mulf %2, %14 : vector<2x32xf32>
    %25 = arith.mulf %5, %23 : vector<2x32xf32>
    %c0_18 = arith.constant 0 : index
    %c0_19 = arith.constant 0 : index
    %26 = vector.load %arg6[%c0_18, %c0_19] : memref<32x32xf32, #tpu.memory_space<vmem>>, vector<32x32xf32>
    %cst_20 = arith.constant dense<0.000000e+00> : vector<2x32xf32>
    %27 = tpu.matmul %24, %26, %cst_20 {dimension_numbers = #tpu.dot_dimension_numbers<[1], [0], [0], [1], [0, 0, 1, 1], [], []>} : vector<2x32xf32>, vector<32x32xf32>, vector<2x32xf32> -> vector<2x32xf32>
    %c0_21 = arith.constant 0 : index
    %c0_22 = arith.constant 0 : index
    %28 = vector.load %arg7[%c0_21, %c0_22] : memref<32x32xf32, #tpu.memory_space<vmem>>, vector<32x32xf32>
    %cst_23 = arith.constant dense<0.000000e+00> : vector<2x32xf32>
    %29 = tpu.matmul %25, %28, %cst_23 {dimension_numbers = #tpu.dot_dimension_numbers<[1], [0], [0], [1], [0, 0, 1, 1], [], []>} : vector<2x32xf32>, vector<32x32xf32>, vector<2x32xf32> -> vector<2x32xf32>
    %30 = arith.addf %27, %29 : vector<2x32xf32>
    %c0_24 = arith.constant 0 : index
    %c0_25 = arith.constant 0 : index
    %31 = vector.load %arg8[%c0_24, %c0_25] : memref<1x32xf32, #tpu.memory_space<vmem>>, vector<1x32xf32>
    %32 = vector.broadcast %31 : vector<1x32xf32> to vector<2x32xf32>
    %33 = arith.addf %30, %32 : vector<2x32xf32>
    %cst_26 = arith.constant 0.000000e+00 : f32
    %34 = vector.broadcast %cst_26 : f32 to vector<2x32xf32>
    %35 = arith.cmpf oge, %33, %34 : vector<2x32xf32>
    %cst_27 = arith.constant 0.00999999977 : f32
    %36 = vector.broadcast %cst_27 : f32 to vector<2x32xf32>
    %37 = arith.mulf %36, %33 : vector<2x32xf32>
    %38 = arith.select %35, %33, %37 : vector<2x32xi1>, vector<2x32xf32>
    %c0_28 = arith.constant 0 : index
    %c0_29 = arith.constant 0 : index
    %39 = vector.load %arg9[%c0_28, %c0_29] : memref<32x4xf32, #tpu.memory_space<vmem>>, vector<32x4xf32>
    %cst_30 = arith.constant dense<0.000000e+00> : vector<2x4xf32>
    %40 = tpu.matmul %38, %39, %cst_30 {dimension_numbers = #tpu.dot_dimension_numbers<[1], [0], [0], [1], [0, 0, 1, 1], [], []>} : vector<2x32xf32>, vector<32x4xf32>, vector<2x4xf32> -> vector<2x4xf32>
    %c0_31 = arith.constant 0 : index
    %c0_32 = arith.constant 0 : index
    %41 = vector.load %arg10[%c0_31, %c0_32] : memref<1x4xf32, #tpu.memory_space<vmem>>, vector<1x4xf32>
    %42 = vector.broadcast %41 : vector<1x4xf32> to vector<2x4xf32>
    %43 = arith.addf %40, %42 : vector<2x4xf32>
    %c0_33 = arith.constant 0 : index
    %c0_34 = arith.constant 0 : index
    %44 = vector.load %arg11[%c0_33, %c0_34] : memref<2x4xf32, #tpu.memory_space<vmem>>, vector<2x4xf32>
    tpu.vector_store %arg11[%c0_33, %c0_34], %43 {strides = array<i32>} : memref<2x4xf32, #tpu.memory_space<vmem>>, vector<2x4xf32>,
    return
  }
}

module attributes {stable_mosaic.version = 11 : i64} {
  func.func @kernel(%arg0: i32, %arg1: memref<1x2x16x4xf32, #tpu.memory_space<vmem>>, %arg2: memref<1x2x1x1xi32, #tpu.memory_space<vmem>>, %arg3: memref<1x8x16x4xf32, #tpu.memory_space<vmem>>, %arg4: memref<1x8x1x1xi32, #tpu.memory_space<vmem>>, %arg5: memref<1x8x16xf32, #tpu.memory_space<vmem>>, %arg6: memref<1x1x16xf32, #tpu.memory_space<vmem>>, %arg7: memref<1x32x16xf32, #tpu.memory_space<vmem>>, %arg8: memref<1x1x16xf32, #tpu.memory_space<vmem>>, %arg9: memref<1x4x16xf32, #tpu.memory_space<vmem>>, %arg10: memref<1x1x16xf32, #tpu.memory_space<vmem>>, %arg11: memref<1x32x16xf32, #tpu.memory_space<vmem>>, %arg12: memref<1x1x16xf32, #tpu.memory_space<vmem>>, %arg13: memref<1x32x16xf32, #tpu.memory_space<vmem>>, %arg14: memref<1x1x16xf32, #tpu.memory_space<vmem>>, %arg15: memref<1x8x16xf32, #tpu.memory_space<vmem>>, %arg16: memref<1x1x16xf32, #tpu.memory_space<vmem>>, %arg17: memref<1x32x16xf32, #tpu.memory_space<vmem>>, %arg18: memref<1x1x16xf32, #tpu.memory_space<vmem>>, %arg19: memref<1x4x16xf32, #tpu.memory_space<vmem>>, %arg20: memref<1x1x16xf32, #tpu.memory_space<vmem>>, %arg21: memref<1x32x16xf32, #tpu.memory_space<vmem>>, %arg22: memref<1x1x16xf32, #tpu.memory_space<vmem>>, %arg23: memref<1x32x16xf32, #tpu.memory_space<vmem>>, %arg24: memref<1x1x16xf32, #tpu.memory_space<vmem>>, %arg25: memref<1x16x8xf32, #tpu.memory_space<vmem>>, %arg26: memref<1x16x8xf32, #tpu.memory_space<vmem>>, %arg27: memref<1x2x16x8xf32, #tpu.memory_space<vmem>>, %arg28: memref<8x18x32xf32, #tpu.memory_space<vmem>>, %arg29: memref<10x16xf32, #tpu.memory_space<vmem>>) attributes {dimension_semantics = [#tpu.dimension_semantics<parallel>], iteration_bounds = array<i64: 2>, scalar_prefetch = 0 : i64, scratch_operands = 2 : i64, tpu.core_type = #tpu.core_type<tc>, window_params = [{transform_indices = @transform_0, window_bounds = array<i64: 1, 2, 16, 4>}, {transform_indices = @transform_1, window_bounds = array<i64: 1, 2, 1, 1>}, {transform_indices = @transform_2, window_bounds = array<i64: 1, 8, 16, 4>}, {transform_indices = @transform_3, window_bounds = array<i64: 1, 8, 1, 1>}, {transform_indices = @transform_4, window_bounds = array<i64: 1, 8, 16>}, {transform_indices = @transform_5, window_bounds = array<i64: 1, 1, 16>}, {transform_indices = @transform_6, window_bounds = array<i64: 1, 32, 16>}, {transform_indices = @transform_7, window_bounds = array<i64: 1, 1, 16>}, {transform_indices = @transform_8, window_bounds = array<i64: 1, 4, 16>}, {transform_indices = @transform_9, window_bounds = array<i64: 1, 1, 16>}, {transform_indices = @transform_10, window_bounds = array<i64: 1, 32, 16>}, {transform_indices = @transform_11, window_bounds = array<i64: 1, 1, 16>}, {transform_indices = @transform_12, window_bounds = array<i64: 1, 32, 16>}, {transform_indices = @transform_13, window_bounds = array<i64: 1, 1, 16>}, {transform_indices = @transform_14, window_bounds = array<i64: 1, 8, 16>}, {transform_indices = @transform_15, window_bounds = array<i64: 1, 1, 16>}, {transform_indices = @transform_16, window_bounds = array<i64: 1, 32, 16>}, {transform_indices = @transform_17, window_bounds = array<i64: 1, 1, 16>}, {transform_indices = @transform_18, window_bounds = array<i64: 1, 4, 16>}, {transform_indices = @transform_19, window_bounds = array<i64: 1, 1, 16>}, {transform_indices = @transform_20, window_bounds = array<i64: 1, 32, 16>}, {transform_indices = @transform_21, window_bounds = array<i64: 1, 1, 16>}, {transform_indices = @transform_22, window_bounds = array<i64: 1, 32, 16>}, {transform_indices = @transform_23, window_bounds = array<i64: 1, 1, 16>}, {transform_indices = @transform_24, window_bounds = array<i64: 1, 16, 8>}, {transform_indices = @transform_25, window_bounds = array<i64: 1, 16, 8>}, {transform_indices = @transform_26, window_bounds = array<i64: 1, 2, 16, 8>}]} {
    %c0 = arith.constant 0 : index
    %c0_0 = arith.constant 0 : index
    %c0_1 = arith.constant 0 : index
    %c0_2 = arith.constant 0 : index
    %0 = vector.load %arg1[%c0, %c0_0, %c0_1, %c0_2] : memref<1x2x16x4xf32, #tpu.memory_space<vmem>>, vector<1x2x16x4xf32>
    %1 = vector.shape_cast %0 : vector<1x2x16x4xf32> to vector<2x16x4xf32>
    %c0_3 = arith.constant 0 : index
    %c0_4 = arith.constant 0 : index
    %c0_5 = arith.constant 0 : index
    %c0_6 = arith.constant 0 : index
    %2 = vector.load %arg2[%c0_3, %c0_4, %c0_5, %c0_6] : memref<1x2x1x1xi32, #tpu.memory_space<vmem>>, vector<1x2x1x1xi32>
    %3 = vector.shape_cast %2 : vector<1x2x1x1xi32> to vector<2x1x1xi32>
    %c0_7 = arith.constant 0 : index
    %c0_8 = arith.constant 0 : index
    %c0_9 = arith.constant 0 : index
    %4 = vector.load %arg5[%c0_7, %c0_8, %c0_9] : memref<1x8x16xf32, #tpu.memory_space<vmem>>, vector<1x8x16xf32>
    %5 = vector.shape_cast %4 : vector<1x8x16xf32> to vector<8x16xf32>
    %c0_10 = arith.constant 0 : index
    %c0_11 = arith.constant 0 : index
    %c0_12 = arith.constant 0 : index
    %6 = vector.load %arg6[%c0_10, %c0_11, %c0_12] : memref<1x1x16xf32, #tpu.memory_space<vmem>>, vector<1x1x16xf32>
    %7 = vector.shape_cast %6 : vector<1x1x16xf32> to vector<1x16xf32>
    %c0_13 = arith.constant 0 : index
    %c0_14 = arith.constant 0 : index
    %c0_15 = arith.constant 0 : index
    %8 = vector.load %arg7[%c0_13, %c0_14, %c0_15] : memref<1x32x16xf32, #tpu.memory_space<vmem>>, vector<1x32x16xf32>
    %9 = vector.shape_cast %8 : vector<1x32x16xf32> to vector<32x16xf32>
    %c0_16 = arith.constant 0 : index
    %c0_17 = arith.constant 0 : index
    %c0_18 = arith.constant 0 : index
    %10 = vector.load %arg8[%c0_16, %c0_17, %c0_18] : memref<1x1x16xf32, #tpu.memory_space<vmem>>, vector<1x1x16xf32>
    %11 = vector.shape_cast %10 : vector<1x1x16xf32> to vector<1x16xf32>
    %c0_19 = arith.constant 0 : index
    %c0_20 = arith.constant 0 : index
    %c0_21 = arith.constant 0 : index
    %12 = vector.load %arg9[%c0_19, %c0_20, %c0_21] : memref<1x4x16xf32, #tpu.memory_space<vmem>>, vector<1x4x16xf32>
    %13 = vector.shape_cast %12 : vector<1x4x16xf32> to vector<4x16xf32>
    %c0_22 = arith.constant 0 : index
    %c0_23 = arith.constant 0 : index
    %c0_24 = arith.constant 0 : index
    %14 = vector.load %arg10[%c0_22, %c0_23, %c0_24] : memref<1x1x16xf32, #tpu.memory_space<vmem>>, vector<1x1x16xf32>
    %15 = vector.shape_cast %14 : vector<1x1x16xf32> to vector<1x16xf32>
    %cst = arith.constant 0.000000e+00 : f32
    %16 = vector.broadcast %cst : f32 to vector<2x2x8xf32>
    %c0_25 = arith.constant 0 : index
    %c0_26 = arith.constant 0 : index
    %c0_27 = arith.constant 0 : index
    %17 = vector.load %arg28[%c0_25, %c0_26, %c0_27] : memref<8x18x32xf32, #tpu.memory_space<vmem>>, vector<2x2x8xf32>
    tpu.vector_store %arg28[%c0_25, %c0_26, %c0_27], %16 {strides = array<i32>} : memref<8x18x32xf32, #tpu.memory_space<vmem>>, vector<2x2x8xf32>,
    %c0_28 = arith.constant 0 : index
    %c1 = arith.constant 1 : index
    %c0_29 = arith.constant 0 : index
    %18 = vector.load %arg28[%c0_28, %c1, %c0_29] : memref<8x18x32xf32, #tpu.memory_space<vmem>>, vector<2x16x4xf32>
    tpu.vector_store %arg28[%c0_28, %c1, %c0_29], %1 {strides = array<i32>} : memref<8x18x32xf32, #tpu.memory_space<vmem>>, vector<2x16x4xf32>,
    %c0_30 = arith.constant 0 : index
    %c0_31 = arith.constant 0 : index
    %c4 = arith.constant 4 : index
    %19 = vector.load %arg28[%c0_30, %c0_31, %c4] : memref<8x18x32xf32, #tpu.memory_space<vmem>>, vector<2x16x4xf32>
    tpu.vector_store %arg28[%c0_30, %c0_31, %c4], %1 {strides = array<i32>} : memref<8x18x32xf32, #tpu.memory_space<vmem>>, vector<2x16x4xf32>,
    %c0_32 = arith.constant 0 : index
    %c0_33 = arith.constant 0 : index
    %c0_34 = arith.constant 0 : index
    %20 = vector.load %arg28[%c0_32, %c0_33, %c0_34] : memref<8x18x32xf32, #tpu.memory_space<vmem>>, vector<2x16x8xf32>
    %21 = vector.shape_cast %20 : vector<2x16x8xf32> to vector<32x8xf32>
    %cst_35 = arith.constant dense<0.000000e+00> : vector<32x16xf32>
    %22 = tpu.matmul %21, %5, %cst_35 {dimension_numbers = #tpu.dot_dimension_numbers<[1], [0], [0], [1], [0, 0, 1, 1], [], []>} : vector<32x8xf32>, vector<8x16xf32>, vector<32x16xf32> -> vector<32x16xf32>
    %23 = vector.shape_cast %22 : vector<32x16xf32> to vector<2x16x16xf32>
    %24 = vector.shape_cast %7 : vector<1x16xf32> to vector<1x1x16xf32>
    %25 = vector.broadcast %24 : vector<1x1x16xf32> to vector<2x16x16xf32>
    %26 = arith.addf %23, %25 : vector<2x16x16xf32>
    %cst_36 = arith.constant 0.000000e+00 : f32
    %27 = vector.broadcast %cst_36 : f32 to vector<2x16x16xf32>
    %28 = arith.maximumf %26, %27 : vector<2x16x16xf32>
    %cst_37 = arith.constant 0.000000e+00 : f32
    %29 = vector.broadcast %cst_37 : f32 to vector<2x2x32xf32>
    %c0_38 = arith.constant 0 : index
    %c0_39 = arith.constant 0 : index
    %c0_40 = arith.constant 0 : index
    %30 = vector.load %arg28[%c0_38, %c0_39, %c0_40] : memref<8x18x32xf32, #tpu.memory_space<vmem>>, vector<2x2x32xf32>
    tpu.vector_store %arg28[%c0_38, %c0_39, %c0_40], %29 {strides = array<i32>} : memref<8x18x32xf32, #tpu.memory_space<vmem>>, vector<2x2x32xf32>,
    %c0_41 = arith.constant 0 : index
    %c1_42 = arith.constant 1 : index
    %c0_43 = arith.constant 0 : index
    %31 = vector.load %arg28[%c0_41, %c1_42, %c0_43] : memref<8x18x32xf32, #tpu.memory_space<vmem>>, vector<2x16x16xf32>
    tpu.vector_store %arg28[%c0_41, %c1_42, %c0_43], %28 {strides = array<i32>} : memref<8x18x32xf32, #tpu.memory_space<vmem>>, vector<2x16x16xf32>,
    %c0_44 = arith.constant 0 : index
    %c0_45 = arith.constant 0 : index
    %c16 = arith.constant 16 : index
    %32 = vector.load %arg28[%c0_44, %c0_45, %c16] : memref<8x18x32xf32, #tpu.memory_space<vmem>>, vector<2x16x16xf32>
    tpu.vector_store %arg28[%c0_44, %c0_45, %c16], %28 {strides = array<i32>} : memref<8x18x32xf32, #tpu.memory_space<vmem>>, vector<2x16x16xf32>,
    %c0_46 = arith.constant 0 : index
    %c0_47 = arith.constant 0 : index
    %c0_48 = arith.constant 0 : index
    %33 = vector.load %arg28[%c0_46, %c0_47, %c0_48] : memref<8x18x32xf32, #tpu.memory_space<vmem>>, vector<2x16x32xf32>
    %34 = vector.shape_cast %33 : vector<2x16x32xf32> to vector<32x32xf32>
    %cst_49 = arith.constant dense<0.000000e+00> : vector<32x16xf32>
    %35 = tpu.matmul %34, %9, %cst_49 {dimension_numbers = #tpu.dot_dimension_numbers<[1], [0], [0], [1], [0, 0, 1, 1], [], []>} : vector<32x32xf32>, vector<32x16xf32>, vector<32x16xf32> -> vector<32x16xf32>
    %36 = vector.shape_cast %35 : vector<32x16xf32> to vector<2x16x16xf32>
    %37 = vector.shape_cast %11 : vector<1x16xf32> to vector<1x1x16xf32>
    %38 = vector.broadcast %37 : vector<1x1x16xf32> to vector<2x16x16xf32>
    %39 = arith.addf %36, %38 : vector<2x16x16xf32>
    %cst_50 = arith.constant 0.000000e+00 : f32
    %40 = vector.broadcast %cst_50 : f32 to vector<2x16x16xf32>
    %41 = arith.maximumf %39, %40 : vector<2x16x16xf32>
    %42 = vector.shape_cast %1 : vector<2x16x4xf32> to vector<32x4xf32>
    %cst_51 = arith.constant dense<0.000000e+00> : vector<32x16xf32>
    %43 = tpu.matmul %42, %13, %cst_51 {dimension_numbers = #tpu.dot_dimension_numbers<[1], [0], [0], [1], [0, 0, 1, 1], [], []>} : vector<32x4xf32>, vector<4x16xf32>, vector<32x16xf32> -> vector<32x16xf32>
    %44 = vector.shape_cast %43 : vector<32x16xf32> to vector<2x16x16xf32>
    %45 = vector.shape_cast %15 : vector<1x16xf32> to vector<1x1x16xf32>
    %46 = vector.broadcast %45 : vector<1x1x16xf32> to vector<2x16x16xf32>
    %47 = arith.addf %44, %46 : vector<2x16x16xf32>
    %48 = arith.addf %41, %47 : vector<2x16x16xf32>
    %cst_52 = arith.constant 0.000000e+00 : f32
    %49 = vector.broadcast %cst_52 : f32 to vector<2x16x16xf32>
    %50 = arith.maximumf %48, %49 : vector<2x16x16xf32>
    %c0_53 = arith.constant 0 : index
    %c0_54 = arith.constant 0 : index
    %c0_55 = arith.constant 0 : index
    %51 = vector.load %arg11[%c0_53, %c0_54, %c0_55] : memref<1x32x16xf32, #tpu.memory_space<vmem>>, vector<1x32x16xf32>
    %52 = vector.shape_cast %51 : vector<1x32x16xf32> to vector<32x16xf32>
    %c0_56 = arith.constant 0 : index
    %c0_57 = arith.constant 0 : index
    %c0_58 = arith.constant 0 : index
    %53 = vector.load %arg12[%c0_56, %c0_57, %c0_58] : memref<1x1x16xf32, #tpu.memory_space<vmem>>, vector<1x1x16xf32>
    %54 = vector.shape_cast %53 : vector<1x1x16xf32> to vector<1x16xf32>
    %c0_59 = arith.constant 0 : index
    %c0_60 = arith.constant 0 : index
    %c0_61 = arith.constant 0 : index
    %55 = vector.load %arg13[%c0_59, %c0_60, %c0_61] : memref<1x32x16xf32, #tpu.memory_space<vmem>>, vector<1x32x16xf32>
    %56 = vector.shape_cast %55 : vector<1x32x16xf32> to vector<32x16xf32>
    %c0_62 = arith.constant 0 : index
    %c0_63 = arith.constant 0 : index
    %c0_64 = arith.constant 0 : index
    %57 = vector.load %arg14[%c0_62, %c0_63, %c0_64] : memref<1x1x16xf32, #tpu.memory_space<vmem>>, vector<1x1x16xf32>
    %58 = vector.shape_cast %57 : vector<1x1x16xf32> to vector<1x16xf32>
    %cst_65 = arith.constant 0.000000e+00 : f32
    %59 = vector.broadcast %cst_65 : f32 to vector<2x2x32xf32>
    %c0_66 = arith.constant 0 : index
    %c0_67 = arith.constant 0 : index
    %c0_68 = arith.constant 0 : index
    %60 = vector.load %arg28[%c0_66, %c0_67, %c0_68] : memref<8x18x32xf32, #tpu.memory_space<vmem>>, vector<2x2x32xf32>
    tpu.vector_store %arg28[%c0_66, %c0_67, %c0_68], %59 {strides = array<i32>} : memref<8x18x32xf32, #tpu.memory_space<vmem>>, vector<2x2x32xf32>,
    %c0_69 = arith.constant 0 : index
    %c2 = arith.constant 2 : index
    %c0_70 = arith.constant 0 : index
    %61 = vector.load %arg28[%c0_69, %c2, %c0_70] : memref<8x18x32xf32, #tpu.memory_space<vmem>>, vector<2x16x16xf32>
    tpu.vector_store %arg28[%c0_69, %c2, %c0_70], %50 {strides = array<i32>} : memref<8x18x32xf32, #tpu.memory_space<vmem>>, vector<2x16x16xf32>,
    %c0_71 = arith.constant 0 : index
    %c0_72 = arith.constant 0 : index
    %c16_73 = arith.constant 16 : index
    %62 = vector.load %arg28[%c0_71, %c0_72, %c16_73] : memref<8x18x32xf32, #tpu.memory_space<vmem>>, vector<2x16x16xf32>
    tpu.vector_store %arg28[%c0_71, %c0_72, %c16_73], %50 {strides = array<i32>} : memref<8x18x32xf32, #tpu.memory_space<vmem>>, vector<2x16x16xf32>,
    %c0_74 = arith.constant 0 : index
    %c0_75 = arith.constant 0 : index
    %c0_76 = arith.constant 0 : index
    %63 = vector.load %arg28[%c0_74, %c0_75, %c0_76] : memref<8x18x32xf32, #tpu.memory_space<vmem>>, vector<2x16x32xf32>
    %64 = vector.shape_cast %63 : vector<2x16x32xf32> to vector<32x32xf32>
    %cst_77 = arith.constant dense<0.000000e+00> : vector<32x16xf32>
    %65 = tpu.matmul %64, %52, %cst_77 {dimension_numbers = #tpu.dot_dimension_numbers<[1], [0], [0], [1], [0, 0, 1, 1], [], []>} : vector<32x32xf32>, vector<32x16xf32>, vector<32x16xf32> -> vector<32x16xf32>
    %66 = vector.shape_cast %65 : vector<32x16xf32> to vector<2x16x16xf32>
    %67 = vector.shape_cast %54 : vector<1x16xf32> to vector<1x1x16xf32>
    %68 = vector.broadcast %67 : vector<1x1x16xf32> to vector<2x16x16xf32>
    %69 = arith.addf %66, %68 : vector<2x16x16xf32>
    %cst_78 = arith.constant 0.000000e+00 : f32
    %70 = vector.broadcast %cst_78 : f32 to vector<2x16x16xf32>
    %71 = arith.maximumf %69, %70 : vector<2x16x16xf32>
    %cst_79 = arith.constant 0.000000e+00 : f32
    %72 = vector.broadcast %cst_79 : f32 to vector<2x2x32xf32>
    %c0_80 = arith.constant 0 : index
    %c0_81 = arith.constant 0 : index
    %c0_82 = arith.constant 0 : index
    %73 = vector.load %arg28[%c0_80, %c0_81, %c0_82] : memref<8x18x32xf32, #tpu.memory_space<vmem>>, vector<2x2x32xf32>
    tpu.vector_store %arg28[%c0_80, %c0_81, %c0_82], %72 {strides = array<i32>} : memref<8x18x32xf32, #tpu.memory_space<vmem>>, vector<2x2x32xf32>,
    %c0_83 = arith.constant 0 : index
    %c2_84 = arith.constant 2 : index
    %c0_85 = arith.constant 0 : index
    %74 = vector.load %arg28[%c0_83, %c2_84, %c0_85] : memref<8x18x32xf32, #tpu.memory_space<vmem>>, vector<2x16x16xf32>
    tpu.vector_store %arg28[%c0_83, %c2_84, %c0_85], %71 {strides = array<i32>} : memref<8x18x32xf32, #tpu.memory_space<vmem>>, vector<2x16x16xf32>,
    %c0_86 = arith.constant 0 : index
    %c0_87 = arith.constant 0 : index
    %c16_88 = arith.constant 16 : index
    %75 = vector.load %arg28[%c0_86, %c0_87, %c16_88] : memref<8x18x32xf32, #tpu.memory_space<vmem>>, vector<2x16x16xf32>
    tpu.vector_store %arg28[%c0_86, %c0_87, %c16_88], %71 {strides = array<i32>} : memref<8x18x32xf32, #tpu.memory_space<vmem>>, vector<2x16x16xf32>,
    %c0_89 = arith.constant 0 : index
    %c0_90 = arith.constant 0 : index
    %c0_91 = arith.constant 0 : index
    %76 = vector.load %arg28[%c0_89, %c0_90, %c0_91] : memref<8x18x32xf32, #tpu.memory_space<vmem>>, vector<2x16x32xf32>
    %77 = vector.shape_cast %76 : vector<2x16x32xf32> to vector<32x32xf32>
    %cst_92 = arith.constant dense<0.000000e+00> : vector<32x16xf32>
    %78 = tpu.matmul %77, %56, %cst_92 {dimension_numbers = #tpu.dot_dimension_numbers<[1], [0], [0], [1], [0, 0, 1, 1], [], []>} : vector<32x32xf32>, vector<32x16xf32>, vector<32x16xf32> -> vector<32x16xf32>
    %79 = vector.shape_cast %78 : vector<32x16xf32> to vector<2x16x16xf32>
    %80 = vector.shape_cast %58 : vector<1x16xf32> to vector<1x1x16xf32>
    %81 = vector.broadcast %80 : vector<1x1x16xf32> to vector<2x16x16xf32>
    %82 = arith.addf %79, %81 : vector<2x16x16xf32>
    %cst_93 = arith.constant 0.000000e+00 : f32
    %83 = vector.broadcast %cst_93 : f32 to vector<2x16x16xf32>
    %84 = arith.maximumf %82, %83 : vector<2x16x16xf32>
    %85 = arith.addf %84, %50 : vector<2x16x16xf32>
    %cst_94 = arith.constant 0.000000e+00 : f32
    %86 = vector.broadcast %cst_94 : f32 to vector<2x16x16xf32>
    %87 = arith.maximumf %85, %86 : vector<2x16x16xf32>
    %88 = tpu.iota {dimensions = array<i32: 1>} : vector<2x16x1xi32>
    %c1_i32 = arith.constant 1 : i32
    %89 = vector.broadcast %c1_i32 : i32 to vector<2x1x1xi32>
    %90 = arith.subi %3, %89 : vector<2x1x1xi32>
    %91 = vector.broadcast %90 : vector<2x1x1xi32> to vector<2x16x1xi32>
    %92 = arith.cmpi eq, %88, %91 : vector<2x16x1xi32>
    %c0_i32 = arith.constant 0 : i32
    %93 = vector.broadcast %c0_i32 : i32 to vector<2x1x1xi32>
    %94 = arith.cmpi sgt, %3, %93 : vector<2x1x1xi32>
    %95 = vector.broadcast %94 : vector<2x1x1xi1> to vector<2x16x1xi1>
    %96 = arith.andi %92, %95 : vector<2x16x1xi1>
    %97 = arith.extui %96 : vector<2x16x1xi1> to vector<2x16x1xi32>
    %98 = arith.sitofp %97 : vector<2x16x1xi32> to vector<2x16x1xf32>
    %99 = vector.broadcast %98 : vector<2x16x1xf32> to vector<2x16x16xf32>
    %100 = arith.mulf %87, %99 : vector<2x16x16xf32>
    %cst_95 = arith.constant dense<0.000000e+00> : vector<2x16xf32>
    %101 = vector.multi_reduction <add>, %100, %cst_95 [1] : vector<2x16x16xf32> to vector<2x16xf32>
    %c0_96 = arith.constant 0 : index
    %c0_97 = arith.constant 0 : index
    %c0_98 = arith.constant 0 : index
    %c0_99 = arith.constant 0 : index
    %102 = vector.load %arg3[%c0_96, %c0_97, %c0_98, %c0_99] : memref<1x8x16x4xf32, #tpu.memory_space<vmem>>, vector<1x8x16x4xf32>
    %103 = vector.shape_cast %102 : vector<1x8x16x4xf32> to vector<8x16x4xf32>
    %c0_100 = arith.constant 0 : index
    %c0_101 = arith.constant 0 : index
    %c0_102 = arith.constant 0 : index
    %c0_103 = arith.constant 0 : index
    %104 = vector.load %arg4[%c0_100, %c0_101, %c0_102, %c0_103] : memref<1x8x1x1xi32, #tpu.memory_space<vmem>>, vector<1x8x1x1xi32>
    %105 = vector.shape_cast %104 : vector<1x8x1x1xi32> to vector<8x1x1xi32>
    %c0_104 = arith.constant 0 : index
    %c0_105 = arith.constant 0 : index
    %c0_106 = arith.constant 0 : index
    %106 = vector.load %arg15[%c0_104, %c0_105, %c0_106] : memref<1x8x16xf32, #tpu.memory_space<vmem>>, vector<1x8x16xf32>
    %107 = vector.shape_cast %106 : vector<1x8x16xf32> to vector<8x16xf32>
    %c0_107 = arith.constant 0 : index
    %c0_108 = arith.constant 0 : index
    %c0_109 = arith.constant 0 : index
    %108 = vector.load %arg16[%c0_107, %c0_108, %c0_109] : memref<1x1x16xf32, #tpu.memory_space<vmem>>, vector<1x1x16xf32>
    %109 = vector.shape_cast %108 : vector<1x1x16xf32> to vector<1x16xf32>
    %c0_110 = arith.constant 0 : index
    %c0_111 = arith.constant 0 : index
    %c0_112 = arith.constant 0 : index
    %110 = vector.load %arg17[%c0_110, %c0_111, %c0_112] : memref<1x32x16xf32, #tpu.memory_space<vmem>>, vector<1x32x16xf32>
    %111 = vector.shape_cast %110 : vector<1x32x16xf32> to vector<32x16xf32>
    %c0_113 = arith.constant 0 : index
    %c0_114 = arith.constant 0 : index
    %c0_115 = arith.constant 0 : index
    %112 = vector.load %arg18[%c0_113, %c0_114, %c0_115] : memref<1x1x16xf32, #tpu.memory_space<vmem>>, vector<1x1x16xf32>
    %113 = vector.shape_cast %112 : vector<1x1x16xf32> to vector<1x16xf32>
    %c0_116 = arith.constant 0 : index
    %c0_117 = arith.constant 0 : index
    %c0_118 = arith.constant 0 : index
    %114 = vector.load %arg19[%c0_116, %c0_117, %c0_118] : memref<1x4x16xf32, #tpu.memory_space<vmem>>, vector<1x4x16xf32>
    %115 = vector.shape_cast %114 : vector<1x4x16xf32> to vector<4x16xf32>
    %c0_119 = arith.constant 0 : index
    %c0_120 = arith.constant 0 : index
    %c0_121 = arith.constant 0 : index
    %116 = vector.load %arg20[%c0_119, %c0_120, %c0_121] : memref<1x1x16xf32, #tpu.memory_space<vmem>>, vector<1x1x16xf32>
    %117 = vector.shape_cast %116 : vector<1x1x16xf32> to vector<1x16xf32>
    %cst_122 = arith.constant 0.000000e+00 : f32
    %118 = vector.broadcast %cst_122 : f32 to vector<8x2x8xf32>
    %c0_123 = arith.constant 0 : index
    %c0_124 = arith.constant 0 : index
    %c0_125 = arith.constant 0 : index
    %119 = vector.load %arg28[%c0_123, %c0_124, %c0_125] : memref<8x18x32xf32, #tpu.memory_space<vmem>>, vector<8x2x8xf32>
    tpu.vector_store %arg28[%c0_123, %c0_124, %c0_125], %118 {strides = array<i32>} : memref<8x18x32xf32, #tpu.memory_space<vmem>>, vector<8x2x8xf32>,
    %c0_126 = arith.constant 0 : index
    %c1_127 = arith.constant 1 : index
    %c0_128 = arith.constant 0 : index
    %120 = vector.load %arg28[%c0_126, %c1_127, %c0_128] : memref<8x18x32xf32, #tpu.memory_space<vmem>>, vector<8x16x4xf32>
    tpu.vector_store %arg28[%c0_126, %c1_127, %c0_128], %103 {strides = array<i32>} : memref<8x18x32xf32, #tpu.memory_space<vmem>>, vector<8x16x4xf32>,
    %c0_129 = arith.constant 0 : index
    %c0_130 = arith.constant 0 : index
    %c4_131 = arith.constant 4 : index
    %121 = vector.load %arg28[%c0_129, %c0_130, %c4_131] : memref<8x18x32xf32, #tpu.memory_space<vmem>>, vector<8x16x4xf32>
    tpu.vector_store %arg28[%c0_129, %c0_130, %c4_131], %103 {strides = array<i32>} : memref<8x18x32xf32, #tpu.memory_space<vmem>>, vector<8x16x4xf32>,
    %c0_132 = arith.constant 0 : index
    %c0_133 = arith.constant 0 : index
    %c0_134 = arith.constant 0 : index
    %122 = vector.load %arg28[%c0_132, %c0_133, %c0_134] : memref<8x18x32xf32, #tpu.memory_space<vmem>>, vector<8x16x8xf32>
    %123 = vector.shape_cast %122 : vector<8x16x8xf32> to vector<128x8xf32>
    %cst_135 = arith.constant dense<0.000000e+00> : vector<128x16xf32>
    %124 = tpu.matmul %123, %107, %cst_135 {dimension_numbers = #tpu.dot_dimension_numbers<[1], [0], [0], [1], [0, 0, 1, 1], [], []>} : vector<128x8xf32>, vector<8x16xf32>, vector<128x16xf32> -> vector<128x16xf32>
    %125 = vector.shape_cast %124 : vector<128x16xf32> to vector<8x16x16xf32>
    %126 = vector.shape_cast %109 : vector<1x16xf32> to vector<1x1x16xf32>
    %127 = vector.broadcast %126 : vector<1x1x16xf32> to vector<8x16x16xf32>
    %128 = arith.addf %125, %127 : vector<8x16x16xf32>
    %cst_136 = arith.constant 0.000000e+00 : f32
    %129 = vector.broadcast %cst_136 : f32 to vector<8x16x16xf32>
    %130 = arith.maximumf %128, %129 : vector<8x16x16xf32>
    %cst_137 = arith.constant 0.000000e+00 : f32
    %131 = vector.broadcast %cst_137 : f32 to vector<8x2x32xf32>
    %c0_138 = arith.constant 0 : index
    %c0_139 = arith.constant 0 : index
    %c0_140 = arith.constant 0 : index
    %132 = vector.load %arg28[%c0_138, %c0_139, %c0_140] : memref<8x18x32xf32, #tpu.memory_space<vmem>>, vector<8x2x32xf32>
    tpu.vector_store %arg28[%c0_138, %c0_139, %c0_140], %131 {strides = array<i32>} : memref<8x18x32xf32, #tpu.memory_space<vmem>>, vector<8x2x32xf32>,
    %c0_141 = arith.constant 0 : index
    %c1_142 = arith.constant 1 : index
    %c0_143 = arith.constant 0 : index
    %133 = vector.load %arg28[%c0_141, %c1_142, %c0_143] : memref<8x18x32xf32, #tpu.memory_space<vmem>>, vector<8x16x16xf32>
    tpu.vector_store %arg28[%c0_141, %c1_142, %c0_143], %130 {strides = array<i32>} : memref<8x18x32xf32, #tpu.memory_space<vmem>>, vector<8x16x16xf32>,
    %c0_144 = arith.constant 0 : index
    %c0_145 = arith.constant 0 : index
    %c16_146 = arith.constant 16 : index
    %134 = vector.load %arg28[%c0_144, %c0_145, %c16_146] : memref<8x18x32xf32, #tpu.memory_space<vmem>>, vector<8x16x16xf32>
    tpu.vector_store %arg28[%c0_144, %c0_145, %c16_146], %130 {strides = array<i32>} : memref<8x18x32xf32, #tpu.memory_space<vmem>>, vector<8x16x16xf32>,
    %c0_147 = arith.constant 0 : index
    %c0_148 = arith.constant 0 : index
    %c0_149 = arith.constant 0 : index
    %135 = vector.load %arg28[%c0_147, %c0_148, %c0_149] : memref<8x18x32xf32, #tpu.memory_space<vmem>>, vector<8x16x32xf32>
    %136 = vector.shape_cast %135 : vector<8x16x32xf32> to vector<128x32xf32>
    %cst_150 = arith.constant dense<0.000000e+00> : vector<128x16xf32>
    %137 = tpu.matmul %136, %111, %cst_150 {dimension_numbers = #tpu.dot_dimension_numbers<[1], [0], [0], [1], [0, 0, 1, 1], [], []>} : vector<128x32xf32>, vector<32x16xf32>, vector<128x16xf32> -> vector<128x16xf32>
    %138 = vector.shape_cast %137 : vector<128x16xf32> to vector<8x16x16xf32>
    %139 = vector.shape_cast %113 : vector<1x16xf32> to vector<1x1x16xf32>
    %140 = vector.broadcast %139 : vector<1x1x16xf32> to vector<8x16x16xf32>
    %141 = arith.addf %138, %140 : vector<8x16x16xf32>
    %cst_151 = arith.constant 0.000000e+00 : f32
    %142 = vector.broadcast %cst_151 : f32 to vector<8x16x16xf32>
    %143 = arith.maximumf %141, %142 : vector<8x16x16xf32>
    %144 = vector.shape_cast %103 : vector<8x16x4xf32> to vector<128x4xf32>
    %cst_152 = arith.constant dense<0.000000e+00> : vector<128x16xf32>
    %145 = tpu.matmul %144, %115, %cst_152 {dimension_numbers = #tpu.dot_dimension_numbers<[1], [0], [0], [1], [0, 0, 1, 1], [], []>} : vector<128x4xf32>, vector<4x16xf32>, vector<128x16xf32> -> vector<128x16xf32>
    %146 = vector.shape_cast %145 : vector<128x16xf32> to vector<8x16x16xf32>
    %147 = vector.shape_cast %117 : vector<1x16xf32> to vector<1x1x16xf32>
    %148 = vector.broadcast %147 : vector<1x1x16xf32> to vector<8x16x16xf32>
    %149 = arith.addf %146, %148 : vector<8x16x16xf32>
    %150 = arith.addf %143, %149 : vector<8x16x16xf32>
    %cst_153 = arith.constant 0.000000e+00 : f32
    %151 = vector.broadcast %cst_153 : f32 to vector<8x16x16xf32>
    %152 = arith.maximumf %150, %151 : vector<8x16x16xf32>
    %c0_154 = arith.constant 0 : index
    %c0_155 = arith.constant 0 : index
    %c0_156 = arith.constant 0 : index
    %153 = vector.load %arg21[%c0_154, %c0_155, %c0_156] : memref<1x32x16xf32, #tpu.memory_space<vmem>>, vector<1x32x16xf32>
    %154 = vector.shape_cast %153 : vector<1x32x16xf32> to vector<32x16xf32>
    %c0_157 = arith.constant 0 : index
    %c0_158 = arith.constant 0 : index
    %c0_159 = arith.constant 0 : index
    %155 = vector.load %arg22[%c0_157, %c0_158, %c0_159] : memref<1x1x16xf32, #tpu.memory_space<vmem>>, vector<1x1x16xf32>
    %156 = vector.shape_cast %155 : vector<1x1x16xf32> to vector<1x16xf32>
    %c0_160 = arith.constant 0 : index
    %c0_161 = arith.constant 0 : index
    %c0_162 = arith.constant 0 : index
    %157 = vector.load %arg23[%c0_160, %c0_161, %c0_162] : memref<1x32x16xf32, #tpu.memory_space<vmem>>, vector<1x32x16xf32>
    %158 = vector.shape_cast %157 : vector<1x32x16xf32> to vector<32x16xf32>
    %c0_163 = arith.constant 0 : index
    %c0_164 = arith.constant 0 : index
    %c0_165 = arith.constant 0 : index
    %159 = vector.load %arg24[%c0_163, %c0_164, %c0_165] : memref<1x1x16xf32, #tpu.memory_space<vmem>>, vector<1x1x16xf32>
    %160 = vector.shape_cast %159 : vector<1x1x16xf32> to vector<1x16xf32>
    %cst_166 = arith.constant 0.000000e+00 : f32
    %161 = vector.broadcast %cst_166 : f32 to vector<8x2x32xf32>
    %c0_167 = arith.constant 0 : index
    %c0_168 = arith.constant 0 : index
    %c0_169 = arith.constant 0 : index
    %162 = vector.load %arg28[%c0_167, %c0_168, %c0_169] : memref<8x18x32xf32, #tpu.memory_space<vmem>>, vector<8x2x32xf32>
    tpu.vector_store %arg28[%c0_167, %c0_168, %c0_169], %161 {strides = array<i32>} : memref<8x18x32xf32, #tpu.memory_space<vmem>>, vector<8x2x32xf32>,
    %c0_170 = arith.constant 0 : index
    %c2_171 = arith.constant 2 : index
    %c0_172 = arith.constant 0 : index
    %163 = vector.load %arg28[%c0_170, %c2_171, %c0_172] : memref<8x18x32xf32, #tpu.memory_space<vmem>>, vector<8x16x16xf32>
    tpu.vector_store %arg28[%c0_170, %c2_171, %c0_172], %152 {strides = array<i32>} : memref<8x18x32xf32, #tpu.memory_space<vmem>>, vector<8x16x16xf32>,
    %c0_173 = arith.constant 0 : index
    %c0_174 = arith.constant 0 : index
    %c16_175 = arith.constant 16 : index
    %164 = vector.load %arg28[%c0_173, %c0_174, %c16_175] : memref<8x18x32xf32, #tpu.memory_space<vmem>>, vector<8x16x16xf32>
    tpu.vector_store %arg28[%c0_173, %c0_174, %c16_175], %152 {strides = array<i32>} : memref<8x18x32xf32, #tpu.memory_space<vmem>>, vector<8x16x16xf32>,
    %c0_176 = arith.constant 0 : index
    %c0_177 = arith.constant 0 : index
    %c0_178 = arith.constant 0 : index
    %165 = vector.load %arg28[%c0_176, %c0_177, %c0_178] : memref<8x18x32xf32, #tpu.memory_space<vmem>>, vector<8x16x32xf32>
    %166 = vector.shape_cast %165 : vector<8x16x32xf32> to vector<128x32xf32>
    %cst_179 = arith.constant dense<0.000000e+00> : vector<128x16xf32>
    %167 = tpu.matmul %166, %154, %cst_179 {dimension_numbers = #tpu.dot_dimension_numbers<[1], [0], [0], [1], [0, 0, 1, 1], [], []>} : vector<128x32xf32>, vector<32x16xf32>, vector<128x16xf32> -> vector<128x16xf32>
    %168 = vector.shape_cast %167 : vector<128x16xf32> to vector<8x16x16xf32>
    %169 = vector.shape_cast %156 : vector<1x16xf32> to vector<1x1x16xf32>
    %170 = vector.broadcast %169 : vector<1x1x16xf32> to vector<8x16x16xf32>
    %171 = arith.addf %168, %170 : vector<8x16x16xf32>
    %cst_180 = arith.constant 0.000000e+00 : f32
    %172 = vector.broadcast %cst_180 : f32 to vector<8x16x16xf32>
    %173 = arith.maximumf %171, %172 : vector<8x16x16xf32>
    %cst_181 = arith.constant 0.000000e+00 : f32
    %174 = vector.broadcast %cst_181 : f32 to vector<8x2x32xf32>
    %c0_182 = arith.constant 0 : index
    %c0_183 = arith.constant 0 : index
    %c0_184 = arith.constant 0 : index
    %175 = vector.load %arg28[%c0_182, %c0_183, %c0_184] : memref<8x18x32xf32, #tpu.memory_space<vmem>>, vector<8x2x32xf32>
    tpu.vector_store %arg28[%c0_182, %c0_183, %c0_184], %174 {strides = array<i32>} : memref<8x18x32xf32, #tpu.memory_space<vmem>>, vector<8x2x32xf32>,
    %c0_185 = arith.constant 0 : index
    %c2_186 = arith.constant 2 : index
    %c0_187 = arith.constant 0 : index
    %176 = vector.load %arg28[%c0_185, %c2_186, %c0_187] : memref<8x18x32xf32, #tpu.memory_space<vmem>>, vector<8x16x16xf32>
    tpu.vector_store %arg28[%c0_185, %c2_186, %c0_187], %173 {strides = array<i32>} : memref<8x18x32xf32, #tpu.memory_space<vmem>>, vector<8x16x16xf32>,
    %c0_188 = arith.constant 0 : index
    %c0_189 = arith.constant 0 : index
    %c16_190 = arith.constant 16 : index
    %177 = vector.load %arg28[%c0_188, %c0_189, %c16_190] : memref<8x18x32xf32, #tpu.memory_space<vmem>>, vector<8x16x16xf32>
    tpu.vector_store %arg28[%c0_188, %c0_189, %c16_190], %173 {strides = array<i32>} : memref<8x18x32xf32, #tpu.memory_space<vmem>>, vector<8x16x16xf32>,
    %c0_191 = arith.constant 0 : index
    %c0_192 = arith.constant 0 : index
    %c0_193 = arith.constant 0 : index
    %178 = vector.load %arg28[%c0_191, %c0_192, %c0_193] : memref<8x18x32xf32, #tpu.memory_space<vmem>>, vector<8x16x32xf32>
    %179 = vector.shape_cast %178 : vector<8x16x32xf32> to vector<128x32xf32>
    %cst_194 = arith.constant dense<0.000000e+00> : vector<128x16xf32>
    %180 = tpu.matmul %179, %158, %cst_194 {dimension_numbers = #tpu.dot_dimension_numbers<[1], [0], [0], [1], [0, 0, 1, 1], [], []>} : vector<128x32xf32>, vector<32x16xf32>, vector<128x16xf32> -> vector<128x16xf32>
    %181 = vector.shape_cast %180 : vector<128x16xf32> to vector<8x16x16xf32>
    %182 = vector.shape_cast %160 : vector<1x16xf32> to vector<1x1x16xf32>
    %183 = vector.broadcast %182 : vector<1x1x16xf32> to vector<8x16x16xf32>
    %184 = arith.addf %181, %183 : vector<8x16x16xf32>
    %cst_195 = arith.constant 0.000000e+00 : f32
    %185 = vector.broadcast %cst_195 : f32 to vector<8x16x16xf32>
    %186 = arith.maximumf %184, %185 : vector<8x16x16xf32>
    %187 = arith.addf %186, %152 : vector<8x16x16xf32>
    %cst_196 = arith.constant 0.000000e+00 : f32
    %188 = vector.broadcast %cst_196 : f32 to vector<8x16x16xf32>
    %189 = arith.maximumf %187, %188 : vector<8x16x16xf32>
    %190 = tpu.iota {dimensions = array<i32: 1>} : vector<8x16x1xi32>
    %c1_i32_197 = arith.constant 1 : i32
    %191 = vector.broadcast %c1_i32_197 : i32 to vector<8x1x1xi32>
    %192 = arith.subi %105, %191 : vector<8x1x1xi32>
    %193 = vector.broadcast %192 : vector<8x1x1xi32> to vector<8x16x1xi32>
    %194 = arith.cmpi eq, %190, %193 : vector<8x16x1xi32>
    %c0_i32_198 = arith.constant 0 : i32
    %195 = vector.broadcast %c0_i32_198 : i32 to vector<8x1x1xi32>
    %196 = arith.cmpi sgt, %105, %195 : vector<8x1x1xi32>
    %197 = vector.broadcast %196 : vector<8x1x1xi1> to vector<8x16x1xi1>
    %198 = arith.andi %194, %197 : vector<8x16x1xi1>
    %199 = arith.extui %198 : vector<8x16x1xi1> to vector<8x16x1xi32>
    %200 = arith.sitofp %199 : vector<8x16x1xi32> to vector<8x16x1xf32>
    %201 = vector.broadcast %200 : vector<8x16x1xf32> to vector<8x16x16xf32>
    %202 = arith.mulf %189, %201 : vector<8x16x16xf32>
    %cst_199 = arith.constant dense<0.000000e+00> : vector<8x16xf32>
    %203 = vector.multi_reduction <add>, %202, %cst_199 [1] : vector<8x16x16xf32> to vector<8x16xf32>
    %204 = vector.extract_strided_slice %101 {offsets = [0, 0], sizes = [1, 16], strides = [1, 1]} : vector<2x16xf32> to vector<1x16xf32>
    %c0_200 = arith.constant 0 : index
    %c0_201 = arith.constant 0 : index
    %205 = vector.load %arg29[%c0_200, %c0_201] : memref<10x16xf32, #tpu.memory_space<vmem>>, vector<1x16xf32>
    tpu.vector_store %arg29[%c0_200, %c0_201], %204 {strides = array<i32>} : memref<10x16xf32, #tpu.memory_space<vmem>>, vector<1x16xf32>,
    %206 = vector.extract_strided_slice %203 {offsets = [0, 0], sizes = [4, 16], strides = [1, 1]} : vector<8x16xf32> to vector<4x16xf32>
    %c1_202 = arith.constant 1 : index
    %c0_203 = arith.constant 0 : index
    %207 = vector.load %arg29[%c1_202, %c0_203] : memref<10x16xf32, #tpu.memory_space<vmem>>, vector<4x16xf32>
    tpu.vector_store %arg29[%c1_202, %c0_203], %206 {strides = array<i32>} : memref<10x16xf32, #tpu.memory_space<vmem>>, vector<4x16xf32>,
    %208 = vector.extract_strided_slice %101 {offsets = [1, 0], sizes = [1, 16], strides = [1, 1]} : vector<2x16xf32> to vector<1x16xf32>
    %c5 = arith.constant 5 : index
    %c0_204 = arith.constant 0 : index
    %209 = vector.load %arg29[%c5, %c0_204] : memref<10x16xf32, #tpu.memory_space<vmem>>, vector<1x16xf32>
    tpu.vector_store %arg29[%c5, %c0_204], %208 {strides = array<i32>} : memref<10x16xf32, #tpu.memory_space<vmem>>, vector<1x16xf32>,
    %210 = vector.extract_strided_slice %203 {offsets = [4, 0], sizes = [4, 16], strides = [1, 1]} : vector<8x16xf32> to vector<4x16xf32>
    %c6 = arith.constant 6 : index
    %c0_205 = arith.constant 0 : index
    %211 = vector.load %arg29[%c6, %c0_205] : memref<10x16xf32, #tpu.memory_space<vmem>>, vector<4x16xf32>
    tpu.vector_store %arg29[%c6, %c0_205], %210 {strides = array<i32>} : memref<10x16xf32, #tpu.memory_space<vmem>>, vector<4x16xf32>,
    %c0_206 = arith.constant 0 : index
    %c0_207 = arith.constant 0 : index
    %c0_208 = arith.constant 0 : index
    %212 = vector.load %arg25[%c0_206, %c0_207, %c0_208] : memref<1x16x8xf32, #tpu.memory_space<vmem>>, vector<1x16x8xf32>
    %213 = vector.shape_cast %212 : vector<1x16x8xf32> to vector<16x8xf32>
    %c0_209 = arith.constant 0 : index
    %c0_210 = arith.constant 0 : index
    %c0_211 = arith.constant 0 : index
    %214 = vector.load %arg26[%c0_209, %c0_210, %c0_211] : memref<1x16x8xf32, #tpu.memory_space<vmem>>, vector<1x16x8xf32>
    %215 = vector.shape_cast %214 : vector<1x16x8xf32> to vector<16x8xf32>
    %c0_212 = arith.constant 0 : index
    %c0_213 = arith.constant 0 : index
    %216 = vector.load %arg29[%c0_212, %c0_213] : memref<10x16xf32, #tpu.memory_space<vmem>>, vector<5x16xf32>
    %cst_214 = arith.constant dense<0.000000e+00> : vector<5x8xf32>
    %217 = tpu.matmul %216, %213, %cst_214 {dimension_numbers = #tpu.dot_dimension_numbers<[1], [0], [0], [1], [0, 0, 1, 1], [], []>} : vector<5x16xf32>, vector<16x8xf32>, vector<5x8xf32> -> vector<5x8xf32>
    %cst_215 = arith.constant 0.999994993 : f32
    %218 = vector.broadcast %cst_215 : f32 to vector<5x8xf32>
    %219 = arith.mulf %217, %218 : vector<5x8xf32>
    %cst_216 = arith.constant dense<0xFF800000> : vector<5xf32>
    %220 = vector.multi_reduction <maximumf>, %219, %cst_216 [1] : vector<5x8xf32> to vector<5xf32>
    %221 = vector.shape_cast %220 : vector<5xf32> to vector<5x1xf32>
    %222 = vector.broadcast %221 : vector<5x1xf32> to vector<5x8xf32>
    %223 = arith.subf %219, %222 : vector<5x8xf32>
    %224 = math.exp %223 : vector<5x8xf32>
    %cst_217 = arith.constant dense<0.000000e+00> : vector<5xf32>
    %225 = vector.multi_reduction <add>, %224, %cst_217 [1] : vector<5x8xf32> to vector<5xf32>
    %226 = vector.shape_cast %225 : vector<5xf32> to vector<5x1xf32>
    %227 = tpu.reciprocal %226 {approx = true} : vector<5x1xf32> -> vector<5x1xf32>
    %228 = vector.broadcast %227 : vector<5x1xf32> to vector<5x8xf32>
    %229 = arith.mulf %224, %228 : vector<5x8xf32>
    %cst_218 = arith.constant dense<0.000000e+00> : vector<8xf32>
    %230 = vector.multi_reduction <add>, %229, %cst_218 [0] : vector<5x8xf32> to vector<8xf32>
    %231 = vector.shape_cast %230 : vector<8xf32> to vector<1x8xf32>
    %cst_219 = arith.constant dense<0.000000e+00> : vector<16x8xf32>
    %232 = tpu.matmul %216, %229, %cst_219 {dimension_numbers = #tpu.dot_dimension_numbers<[0], [0], [1], [1], [0, 1, 1, 1], [], []>} : vector<5x16xf32>, vector<5x8xf32>, vector<16x8xf32> -> vector<16x8xf32>
    %233 = vector.broadcast %231 : vector<1x8xf32> to vector<16x8xf32>
    %234 = arith.mulf %215, %233 : vector<16x8xf32>
    %235 = arith.subf %232, %234 : vector<16x8xf32>
    %236 = arith.mulf %235, %235 : vector<16x8xf32>
    %cst_220 = arith.constant dense<0.000000e+00> : vector<8xf32>
    %237 = vector.multi_reduction <add>, %236, %cst_220 [0] : vector<16x8xf32> to vector<8xf32>
    %238 = vector.shape_cast %237 : vector<8xf32> to vector<1x8xf32>
    %cst_221 = arith.constant 1.000000e-24 : f32
    %239 = vector.broadcast %cst_221 : f32 to vector<1x8xf32>
    %240 = arith.maximumf %238, %239 : vector<1x8xf32>
    %241 = math.rsqrt %240 : vector<1x8xf32>
    %242 = vector.broadcast %241 : vector<1x8xf32> to vector<16x8xf32>
    %243 = arith.mulf %235, %242 : vector<16x8xf32>
    %244 = arith.mulf %243, %243 : vector<16x8xf32>
    %245 = vector.shape_cast %244 : vector<16x8xf32> to vector<1x16x8xf32>
    %cst_222 = arith.constant dense<0.000000e+00> : vector<1xf32>
    %246 = vector.multi_reduction <add>, %245, %cst_222 [1, 2] : vector<1x16x8xf32> to vector<1xf32>
    %247 = vector.shape_cast %246 : vector<1xf32> to vector<1x1x1xf32>
    %248 = vector.extract %247[0, 0, 0] : f32 from vector<1x1x1xf32>
    %249 = vector.broadcast %248 : f32 to vector<1x1xf32>
    %cst_223 = arith.constant 1.000000e-24 : f32
    %250 = vector.broadcast %cst_223 : f32 to vector<1x1xf32>
    %251 = arith.maximumf %249, %250 : vector<1x1xf32>
    %252 = math.rsqrt %251 : vector<1x1xf32>
    %253 = vector.broadcast %252 : vector<1x1xf32> to vector<16x8xf32>
    %254 = arith.mulf %243, %253 : vector<16x8xf32>
    %c5_224 = arith.constant 5 : index
    %c0_225 = arith.constant 0 : index
    %255 = vector.load %arg29[%c5_224, %c0_225] : memref<10x16xf32, #tpu.memory_space<vmem>>, vector<5x16xf32>
    %cst_226 = arith.constant dense<0.000000e+00> : vector<5x8xf32>
    %256 = tpu.matmul %255, %213, %cst_226 {dimension_numbers = #tpu.dot_dimension_numbers<[1], [0], [0], [1], [0, 0, 1, 1], [], []>} : vector<5x16xf32>, vector<16x8xf32>, vector<5x8xf32> -> vector<5x8xf32>
    %cst_227 = arith.constant 0.999994993 : f32
    %257 = vector.broadcast %cst_227 : f32 to vector<5x8xf32>
    %258 = arith.mulf %256, %257 : vector<5x8xf32>
    %cst_228 = arith.constant dense<0xFF800000> : vector<5xf32>
    %259 = vector.multi_reduction <maximumf>, %258, %cst_228 [1] : vector<5x8xf32> to vector<5xf32>
    %260 = vector.shape_cast %259 : vector<5xf32> to vector<5x1xf32>
    %261 = vector.broadcast %260 : vector<5x1xf32> to vector<5x8xf32>
    %262 = arith.subf %258, %261 : vector<5x8xf32>
    %263 = math.exp %262 : vector<5x8xf32>
    %cst_229 = arith.constant dense<0.000000e+00> : vector<5xf32>
    %264 = vector.multi_reduction <add>, %263, %cst_229 [1] : vector<5x8xf32> to vector<5xf32>
    %265 = vector.shape_cast %264 : vector<5xf32> to vector<5x1xf32>
    %266 = tpu.reciprocal %265 {approx = true} : vector<5x1xf32> -> vector<5x1xf32>
    %267 = vector.broadcast %266 : vector<5x1xf32> to vector<5x8xf32>
    %268 = arith.mulf %263, %267 : vector<5x8xf32>
    %cst_230 = arith.constant dense<0.000000e+00> : vector<8xf32>
    %269 = vector.multi_reduction <add>, %268, %cst_230 [0] : vector<5x8xf32> to vector<8xf32>
    %270 = vector.shape_cast %269 : vector<8xf32> to vector<1x8xf32>
    %cst_231 = arith.constant dense<0.000000e+00> : vector<16x8xf32>
    %271 = tpu.matmul %255, %268, %cst_231 {dimension_numbers = #tpu.dot_dimension_numbers<[0], [0], [1], [1], [0, 1, 1, 1], [], []>} : vector<5x16xf32>, vector<5x8xf32>, vector<16x8xf32> -> vector<16x8xf32>
    %272 = vector.broadcast %270 : vector<1x8xf32> to vector<16x8xf32>
    %273 = arith.mulf %215, %272 : vector<16x8xf32>
    %274 = arith.subf %271, %273 : vector<16x8xf32>
    %275 = arith.mulf %274, %274 : vector<16x8xf32>
    %cst_232 = arith.constant dense<0.000000e+00> : vector<8xf32>
    %276 = vector.multi_reduction <add>, %275, %cst_232 [0] : vector<16x8xf32> to vector<8xf32>
    %277 = vector.shape_cast %276 : vector<8xf32> to vector<1x8xf32>
    %cst_233 = arith.constant 1.000000e-24 : f32
    %278 = vector.broadcast %cst_233 : f32 to vector<1x8xf32>
    %279 = arith.maximumf %277, %278 : vector<1x8xf32>
    %280 = math.rsqrt %279 : vector<1x8xf32>
    %281 = vector.broadcast %280 : vector<1x8xf32> to vector<16x8xf32>
    %282 = arith.mulf %274, %281 : vector<16x8xf32>
    %283 = arith.mulf %282, %282 : vector<16x8xf32>
    %284 = vector.shape_cast %283 : vector<16x8xf32> to vector<1x16x8xf32>
    %cst_234 = arith.constant dense<0.000000e+00> : vector<1xf32>
    %285 = vector.multi_reduction <add>, %284, %cst_234 [1, 2] : vector<1x16x8xf32> to vector<1xf32>
    %286 = vector.shape_cast %285 : vector<1xf32> to vector<1x1x1xf32>
    %287 = vector.extract %286[0, 0, 0] : f32 from vector<1x1x1xf32>
    %288 = vector.broadcast %287 : f32 to vector<1x1xf32>
    %cst_235 = arith.constant 1.000000e-24 : f32
    %289 = vector.broadcast %cst_235 : f32 to vector<1x1xf32>
    %290 = arith.maximumf %288, %289 : vector<1x1xf32>
    %291 = math.rsqrt %290 : vector<1x1xf32>
    %292 = vector.broadcast %291 : vector<1x1xf32> to vector<16x8xf32>
    %293 = arith.mulf %282, %292 : vector<16x8xf32>
    %294 = vector.shape_cast %254 : vector<16x8xf32> to vector<1x16x8xf32>
    %295 = vector.shape_cast %293 : vector<16x8xf32> to vector<1x16x8xf32>
    %296 = tpu.concatenate %294, %295 in 0 : vector<1x16x8xf32>, vector<1x16x8xf32> -> vector<2x16x8xf32>
    %c0_236 = arith.constant 0 : index
    %c0_237 = arith.constant 0 : index
    %c0_238 = arith.constant 0 : index
    %c0_239 = arith.constant 0 : index
    %297 = vector.load %arg27[%c0_236, %c0_237, %c0_238, %c0_239] : memref<1x2x16x8xf32, #tpu.memory_space<vmem>>, vector<1x2x16x8xf32>
    %298 = vector.shape_cast %297 : vector<1x2x16x8xf32> to vector<2x16x8xf32>
    %299 = vector.shape_cast %296 : vector<2x16x8xf32> to vector<1x2x16x8xf32>
    tpu.vector_store %arg27[%c0_236, %c0_237, %c0_238, %c0_239], %299 {strides = array<i32>} : memref<1x2x16x8xf32, #tpu.memory_space<vmem>>, vector<1x2x16x8xf32>,
    return
  }
  func.func @transform_0(%arg0: i32) -> (i32, i32, i32, i32) {
    %c0_i32 = arith.constant 0 : i32
    %c0_i32_0 = arith.constant 0 : i32
    %c0_i32_1 = arith.constant 0 : i32
    %c0_i32_2 = arith.constant 0 : i32
    return %arg0, %c0_i32, %c0_i32_0, %c0_i32_1 : i32, i32, i32, i32
  }
  func.func @transform_1(%arg0: i32) -> (i32, i32, i32, i32) {
    %c0_i32 = arith.constant 0 : i32
    %c0_i32_0 = arith.constant 0 : i32
    %c0_i32_1 = arith.constant 0 : i32
    %c0_i32_2 = arith.constant 0 : i32
    return %arg0, %c0_i32, %c0_i32_0, %c0_i32_1 : i32, i32, i32, i32
  }
  func.func @transform_2(%arg0: i32) -> (i32, i32, i32, i32) {
    %c0_i32 = arith.constant 0 : i32
    %c0_i32_0 = arith.constant 0 : i32
    %c0_i32_1 = arith.constant 0 : i32
    %c0_i32_2 = arith.constant 0 : i32
    return %arg0, %c0_i32, %c0_i32_0, %c0_i32_1 : i32, i32, i32, i32
  }
  func.func @transform_3(%arg0: i32) -> (i32, i32, i32, i32) {
    %c0_i32 = arith.constant 0 : i32
    %c0_i32_0 = arith.constant 0 : i32
    %c0_i32_1 = arith.constant 0 : i32
    %c0_i32_2 = arith.constant 0 : i32
    return %arg0, %c0_i32, %c0_i32_0, %c0_i32_1 : i32, i32, i32, i32
  }
  func.func @transform_4(%arg0: i32) -> (i32, i32, i32) {
    %c0_i32 = arith.constant 0 : i32
    %c0_i32_0 = arith.constant 0 : i32
    %c0_i32_1 = arith.constant 0 : i32
    return %arg0, %c0_i32, %c0_i32_0 : i32, i32, i32
  }
  func.func @transform_5(%arg0: i32) -> (i32, i32, i32) {
    %c0_i32 = arith.constant 0 : i32
    %c0_i32_0 = arith.constant 0 : i32
    %c0_i32_1 = arith.constant 0 : i32
    return %arg0, %c0_i32, %c0_i32_0 : i32, i32, i32
  }
  func.func @transform_6(%arg0: i32) -> (i32, i32, i32) {
    %c0_i32 = arith.constant 0 : i32
    %c0_i32_0 = arith.constant 0 : i32
    %c0_i32_1 = arith.constant 0 : i32
    return %arg0, %c0_i32, %c0_i32_0 : i32, i32, i32
  }
  func.func @transform_7(%arg0: i32) -> (i32, i32, i32) {
    %c0_i32 = arith.constant 0 : i32
    %c0_i32_0 = arith.constant 0 : i32
    %c0_i32_1 = arith.constant 0 : i32
    return %arg0, %c0_i32, %c0_i32_0 : i32, i32, i32
  }
  func.func @transform_8(%arg0: i32) -> (i32, i32, i32) {
    %c0_i32 = arith.constant 0 : i32
    %c0_i32_0 = arith.constant 0 : i32
    %c0_i32_1 = arith.constant 0 : i32
    return %arg0, %c0_i32, %c0_i32_0 : i32, i32, i32
  }
  func.func @transform_9(%arg0: i32) -> (i32, i32, i32) {
    %c0_i32 = arith.constant 0 : i32
    %c0_i32_0 = arith.constant 0 : i32
    %c0_i32_1 = arith.constant 0 : i32
    return %arg0, %c0_i32, %c0_i32_0 : i32, i32, i32
  }
  func.func @transform_10(%arg0: i32) -> (i32, i32, i32) {
    %c0_i32 = arith.constant 0 : i32
    %c0_i32_0 = arith.constant 0 : i32
    %c0_i32_1 = arith.constant 0 : i32
    return %arg0, %c0_i32, %c0_i32_0 : i32, i32, i32
  }
  func.func @transform_11(%arg0: i32) -> (i32, i32, i32) {
    %c0_i32 = arith.constant 0 : i32
    %c0_i32_0 = arith.constant 0 : i32
    %c0_i32_1 = arith.constant 0 : i32
    return %arg0, %c0_i32, %c0_i32_0 : i32, i32, i32
  }
  func.func @transform_12(%arg0: i32) -> (i32, i32, i32) {
    %c0_i32 = arith.constant 0 : i32
    %c0_i32_0 = arith.constant 0 : i32
    %c0_i32_1 = arith.constant 0 : i32
    return %arg0, %c0_i32, %c0_i32_0 : i32, i32, i32
  }
  func.func @transform_13(%arg0: i32) -> (i32, i32, i32) {
    %c0_i32 = arith.constant 0 : i32
    %c0_i32_0 = arith.constant 0 : i32
    %c0_i32_1 = arith.constant 0 : i32
    return %arg0, %c0_i32, %c0_i32_0 : i32, i32, i32
  }
  func.func @transform_14(%arg0: i32) -> (i32, i32, i32) {
    %c0_i32 = arith.constant 0 : i32
    %c0_i32_0 = arith.constant 0 : i32
    %c0_i32_1 = arith.constant 0 : i32
    return %arg0, %c0_i32, %c0_i32_0 : i32, i32, i32
  }
  func.func @transform_15(%arg0: i32) -> (i32, i32, i32) {
    %c0_i32 = arith.constant 0 : i32
    %c0_i32_0 = arith.constant 0 : i32
    %c0_i32_1 = arith.constant 0 : i32
    return %arg0, %c0_i32, %c0_i32_0 : i32, i32, i32
  }
  func.func @transform_16(%arg0: i32) -> (i32, i32, i32) {
    %c0_i32 = arith.constant 0 : i32
    %c0_i32_0 = arith.constant 0 : i32
    %c0_i32_1 = arith.constant 0 : i32
    return %arg0, %c0_i32, %c0_i32_0 : i32, i32, i32
  }
  func.func @transform_17(%arg0: i32) -> (i32, i32, i32) {
    %c0_i32 = arith.constant 0 : i32
    %c0_i32_0 = arith.constant 0 : i32
    %c0_i32_1 = arith.constant 0 : i32
    return %arg0, %c0_i32, %c0_i32_0 : i32, i32, i32
  }
  func.func @transform_18(%arg0: i32) -> (i32, i32, i32) {
    %c0_i32 = arith.constant 0 : i32
    %c0_i32_0 = arith.constant 0 : i32
    %c0_i32_1 = arith.constant 0 : i32
    return %arg0, %c0_i32, %c0_i32_0 : i32, i32, i32
  }
  func.func @transform_19(%arg0: i32) -> (i32, i32, i32) {
    %c0_i32 = arith.constant 0 : i32
    %c0_i32_0 = arith.constant 0 : i32
    %c0_i32_1 = arith.constant 0 : i32
    return %arg0, %c0_i32, %c0_i32_0 : i32, i32, i32
  }
  func.func @transform_20(%arg0: i32) -> (i32, i32, i32) {
    %c0_i32 = arith.constant 0 : i32
    %c0_i32_0 = arith.constant 0 : i32
    %c0_i32_1 = arith.constant 0 : i32
    return %arg0, %c0_i32, %c0_i32_0 : i32, i32, i32
  }
  func.func @transform_21(%arg0: i32) -> (i32, i32, i32) {
    %c0_i32 = arith.constant 0 : i32
    %c0_i32_0 = arith.constant 0 : i32
    %c0_i32_1 = arith.constant 0 : i32
    return %arg0, %c0_i32, %c0_i32_0 : i32, i32, i32
  }
  func.func @transform_22(%arg0: i32) -> (i32, i32, i32) {
    %c0_i32 = arith.constant 0 : i32
    %c0_i32_0 = arith.constant 0 : i32
    %c0_i32_1 = arith.constant 0 : i32
    return %arg0, %c0_i32, %c0_i32_0 : i32, i32, i32
  }
  func.func @transform_23(%arg0: i32) -> (i32, i32, i32) {
    %c0_i32 = arith.constant 0 : i32
    %c0_i32_0 = arith.constant 0 : i32
    %c0_i32_1 = arith.constant 0 : i32
    return %arg0, %c0_i32, %c0_i32_0 : i32, i32, i32
  }
  func.func @transform_24(%arg0: i32) -> (i32, i32, i32) {
    %c0_i32 = arith.constant 0 : i32
    %c0_i32_0 = arith.constant 0 : i32
    %c0_i32_1 = arith.constant 0 : i32
    return %arg0, %c0_i32, %c0_i32_0 : i32, i32, i32
  }
  func.func @transform_25(%arg0: i32) -> (i32, i32, i32) {
    %c0_i32 = arith.constant 0 : i32
    %c0_i32_0 = arith.constant 0 : i32
    %c0_i32_1 = arith.constant 0 : i32
    return %arg0, %c0_i32, %c0_i32_0 : i32, i32, i32
  }
  func.func @transform_26(%arg0: i32) -> (i32, i32, i32, i32) {
    %c0_i32 = arith.constant 0 : i32
    %c0_i32_0 = arith.constant 0 : i32
    %c0_i32_1 = arith.constant 0 : i32
    %c0_i32_2 = arith.constant 0 : i32
    return %arg0, %c0_i32, %c0_i32_0, %c0_i32_1 : i32, i32, i32, i32
  }
}

</mosaic_0001>

<bundles_post_ra>
// kernel: squeeze.11
= control target key start
LH: loop header
LB: loop body
LE: loop exit
PB: predicated region body
PF: predicated region fallthrough
CT: control target
= control target key end

     0   :  { %s7_s6 = smov 3  ;;  %s21_s9 = smov 3  ;;  %vm4_vm0 = vcmask 64512   ;;  %vm11_vm1 = vcmask 1048512   ;;  %vm18_vm2 = vcmask 982912   ;;  %vm25_vm3 = vcmask 917312   ;;  %s223_s0 = inlined_call_operand.vmem [shape: f32[1,2,16,8], index: 0, kind: input, shape index: {}]   ;;  %s224_s1 = inlined_call_operand.vmem [shape: f32[2,128], index: 1, kind: output, shape index: {}]  }
   0x1   :  { %v117_v0 = vld [vmem:[%s223_s0 + $0xf] ss:$16 sm:%s7_s6]   ;;  %s147_s10 = smov 120   ;;  %v119_v1 = vld [vmem:[%s223_s0 + $0xd] ss:$16 sm:%s21_s9]   ;;  %s14_s13 = smov 3 }
   0x2   :  { %9 = vrot.lane.b32.xlu0 %v117_v0, %s147_s10  ;;  %s148_s14 = smov 104   ;;  %v118_v2 = vld [vmem:[%s223_s0 + $0xe] ss:$16 sm:%s14_s13]   ;;  %s28_s17 = smov 3  ;;  %vm32_vm4 = vcmask 851712   ;;  %vm39_vm5 = vcmask 786112  }
   0x3   :  { %23 = vrot.lane.b32.xlu1 %v119_v1, %s148_s14  ;;  %v120_v3 = vld [vmem:[%s223_s0 + $0xc] ss:$16 sm:%s28_s17]   ;;  %s35_s20 = smov 3  ;;  %s42_s21 = smov 3  ;;  %vm46_vm6 = vcmask 720512   ;;  %vm53_vm7 = vcmask 654912  }
   0x4   :  { %s149_s22 = smov 112   ;;  %s150_s23 = smov 96   ;;  %v121_v4 = vld [vmem:[%s223_s0 + $0xb] ss:$16 sm:%s35_s20]   ;;  %v122_v5 = vld [vmem:[%s223_s0 + $0xa] ss:$16 sm:%s42_s21]  }
   0x5   :  { %s49_s28 = smov 3  ;;  %s56_s29 = smov 3  ;;  %vm60_vm8 = vcmask 589312   ;;  %vm67_vm9 = vcmask 523712   ;;  %vm74_vm10 = vcmask 458112   ;;  %vm81_vm11 = vcmask 392512  }
   0x6   :  { %16 = vrot.lane.b32.xlu0 %v118_v2, %s149_s22  ;;  %s151_s30 = smov 88   ;;  %s152_s2 = smov 80   ;;  %v123_v6 = vld [vmem:[%s223_s0 + $0x9] ss:$16 sm:%s49_s28]   ;;  %vm88_vm12 = vcmask 326912   ;;  %vm95_vm13 = vcmask 261312  }
   0x7   :  { %30 = vrot.lane.b32.xlu1 %v120_v3, %s150_s23  ;;  %v124_v7 = vld [vmem:[%s223_s0 + $0x8] ss:$16 sm:%s56_s29]   ;;  %s63_s7 = smov 3  ;;  %s70_s8 = smov 3  ;;  %vm102_vm14 = vcmask 195712   ;;  %vm109_vm15 = vcmask 130112  }
   0x8   :  { %s153_s9 = smov 72   ;;  %s154_s10 = smov 64   ;;  %v125_v8 = vld [vmem:[%s223_s0 + $0x7] ss:$16 sm:%s63_s7]   ;;  %v126_v9 = vld [vmem:[%s223_s0 + $0x6] ss:$16 sm:%s70_s8]  }
   0x9   :  { %s2_s13 = smov 3  ;;  %s77_s16 = smov 3 }
   0xa   :  { %37 = vrot.lane.b32.xlu0 %v121_v4, %s151_s30  ;;  %v3_v10 = vld [vmem:[%s223_s0] ss:$16 sm:%s2_s13]   ;;  %s84_s19 = smov 3  ;;  %s155_s20 = smov 56  }
   0xb   :  { %44 = vrot.lane.b32.xlu1 %v122_v5, %s152_s2  ;;  %5 = vst.msk [vmem:[#allocation0] sm:$0x3] %vm4_vm0, %v3_v10   ;;  %s156_s21 = smov 48   ;;  %v127_v11 = vld [vmem:[%s223_s0 + $0x5] ss:$16 sm:%s77_s16]   ;;  %s91_s26 = smov 3 }
   0xc   :  { %v128_v12 = vld [vmem:[%s223_s0 + $0x4] ss:$16 sm:%s84_s19]   ;;  %s98_s27 = smov 3  ;;  %s157_s28 = smov 40   ;;  %v129_v13 = vld [vmem:[%s223_s0 + $0x3] ss:$16 sm:%s91_s26]  }
   0xd   :  { %s158_s29 = smov 32   ;;  %v130_v14 = vld [vmem:[%s223_s0 + $0x2] ss:$16 sm:%s98_s27]   ;;  %s105_s5 = smov 3 }
   0xe   :  { %51 = vrot.lane.b32.xlu0 %v123_v6, %s153_s9  ;;  %s159_s6 = smov 24   ;;  %s160_s7 = smov 16   ;;  %v131_v15 = vld [vmem:[%s223_s0 + $0x1] ss:$16 sm:%s105_s5]  }
   0xf   :  { %58 = vrot.lane.b32.xlu1 %v124_v7, %s154_s10  ;;  %s161_s0 = smov 8  }
  0x12   :  { %65 = vrot.lane.b32.xlu0 %v125_v8, %s155_s20 }
  0x13   :  { %72 = vrot.lane.b32.xlu1 %v126_v9, %s156_s21 }
  0x16   :  { %79 = vrot.lane.b32.xlu0 %v127_v11, %s157_s28 }
  0x17   :  { %86 = vrot.lane.b32.xlu1 %v128_v12, %s158_s29 }
  0x1a   :  { %93 = vrot.lane.b32.xlu0 %v129_v13, %s159_s6 }
  0x1b   :  { %100 = vrot.lane.b32.xlu1 %v130_v14, %s160_s7 }
  0x1e   :  { %107 = vrot.lane.b32.xlu0 %v131_v15, %s161_s0 }
  0x74   :  { %v10_v16 = vpop.permute.xlu0 %9  }
  0x75   :  { %12 = vst.msk [vmem:[#allocation0] sm:$0x3] %vm11_vm1, %v10_v16   ;;  %v24_v17 = vpop.permute.xlu1 %23  }
  0x78   :  { %v17_v18 = vpop.permute.xlu0 %16  }
  0x79   :  { %19 = vst.msk [vmem:[#allocation0] sm:$0x3] %vm18_vm2, %v17_v18   ;;  %v31_v19 = vpop.permute.xlu1 %30  }
  0x7a   :  { %26 = vst.msk [vmem:[#allocation0] sm:$0x3] %vm25_vm3, %v24_v17  }
  0x7b   :  { %33 = vst.msk [vmem:[#allocation0] sm:$0x3] %vm32_vm4, %v31_v19  }
  0x7c   :  { %v38_v20 = vpop.permute.xlu0 %37  }
  0x7d   :  { %40 = vst.msk [vmem:[#allocation0] sm:$0x3] %vm39_vm5, %v38_v20   ;;  %v45_v21 = vpop.permute.xlu1 %44  }
  0x7e   :  { %47 = vst.msk [vmem:[#allocation0] sm:$0x3] %vm46_vm6, %v45_v21  }
  0x80   :  { %v52_v22 = vpop.permute.xlu0 %51  }
  0x81   :  { %54 = vst.msk [vmem:[#allocation0] sm:$0x3] %vm53_vm7, %v52_v22   ;;  %v59_v23 = vpop.permute.xlu1 %58  }
  0x82   :  { %61 = vst.msk [vmem:[#allocation0] sm:$0x3] %vm60_vm8, %v59_v23  }
  0x84   :  { %v66_v24 = vpop.permute.xlu0 %65  }
  0x85   :  { %68 = vst.msk [vmem:[#allocation0] sm:$0x3] %vm67_vm9, %v66_v24   ;;  %v73_v25 = vpop.permute.xlu1 %72  }
  0x86   :  { %75 = vst.msk [vmem:[#allocation0] sm:$0x3] %vm74_vm10, %v73_v25  }
  0x88   :  { %v80_v26 = vpop.permute.xlu0 %79  }
  0x89   :  { %82 = vst.msk [vmem:[#allocation0] sm:$0x3] %vm81_vm11, %v80_v26   ;;  %v87_v27 = vpop.permute.xlu1 %86  }
  0x8a   :  { %89 = vst.msk [vmem:[#allocation0] sm:$0x3] %vm88_vm12, %v87_v27  }
  0x8c   :  { %v94_v28 = vpop.permute.xlu0 %93  }
  0x8d   :  { %96 = vst.msk [vmem:[#allocation0] sm:$0x3] %vm95_vm13, %v94_v28   ;;  %v101_v29 = vpop.permute.xlu1 %100  }
  0x8e   :  { %103 = vst.msk [vmem:[#allocation0] sm:$0x3] %vm102_vm14, %v101_v29  }
  0x90   :  { %v108_v30 = vpop.permute.xlu0 %107  }
  0x91   :  { %110 = vst.msk [vmem:[#allocation0] sm:$0x3] %vm109_vm15, %v108_v30  }
  0x98   :  { %v114_v31 = vld [vmem:[#allocation0] sm:$0x3] }
  0x99   :  { %116 = vst [vmem:[%s224_s1] sm:$0x3] %v114_v31 }

// kernel: forward.3
= control target key start
LH: loop header
LB: loop body
LE: loop exit
PB: predicated region body
PF: predicated region fallthrough
CT: control target
= control target key end

     0   :  { %v956_v3 = vmov 0.0|0.0   ;;  %vm957_vm0 = vmmov 0   ;;  %v958_v11 = vmov 0.0   ;;  %s1245_s0 = inlined_call_operand.vmem [shape: f32[2,128], index: 0, kind: input, shape index: {}]   ;;  %s1246_s1 = inlined_call_operand.vmem [shape: f32[2,128], index: 1, kind: input, shape index: {}]   ;;  %s1247_s2 = inlined_call_operand.vmem [shape: f32[128,32], index: 2, kind: input, shape index: {}]   ;;  %s1248_s3 = inlined_call_operand.vmem [shape: f32[128,32], index: 3, kind: input, shape index: {}]   ;;  %s1249_s4 = inlined_call_operand.vmem [shape: f32[32,32], index: 4, kind: input, shape index: {}]   ;;  %s1250_s5 = inlined_call_operand.vmem [shape: f32[32,32], index: 5, kind: input, shape index: {}]   ;;  %s1251_s6 = inlined_call_operand.vmem [shape: f32[32,32], index: 6, kind: input, shape index: {}]   ;;  %s1252_s7 = inlined_call_operand.vmem [shape: f32[32,32], index: 7, kind: input, shape index: {}]   ;;  %s1253_s8 = inlined_call_operand.vmem [shape: f32[1,32], index: 8, kind: input, shape index: {}]   ;;  %s1254_s9 = inlined_call_operand.vmem [shape: f32[32,4], index: 9, kind: input, shape index: {}]   ;;  %s1255_s10 = inlined_call_operand.vmem [shape: f32[1,4], index: 10, kind: input, shape index: {}]   ;;  %s1256_s11 = inlined_call_operand.hbm [shape: f32[2,4], index: 11, kind: output, shape index: {}]  }
   0x1   :  { %v40_v0 = vld [vmem:[%s1247_s2] sm:$0xff]  ;;  %v41_v1 = vld [vmem:[%s1247_s2 + $0x8] sm:$0xff]  ;;  %842 = vmatprep.subr.bf16.mxu0 %v956_v3  ;;  %866 = vmatprep.subr.bf16.mxu1 %v956_v3  ;;  %v42_v6 = vld [vmem:[%s1247_s2 + $0x10] sm:$0xff] }
   0x2   :  { %v127_v2 = vld [vmem:[%s1248_s3] sm:$0xff]  ;;  %v843_v4 = vpack.c.bf16 %v41_v1, %v40_v0  ;;  %v128_v5 = vld [vmem:[%s1248_s3 + $0x8] sm:$0xff]  ;;  %v43_v7 = vld [vmem:[%s1247_s2 + $0x18] sm:$0xff]  ;;  %749 = vmatprep.mubr.msk.f32.mxu0 %vm957_vm0, %v958_v11  ;;  %784 = vmatprep.mubr.msk.f32.mxu1 %vm957_vm0, %v958_v11 }
   0x3   :  { %v867_v8 = vpack.c.bf16 %v128_v5, %v127_v2  ;;  %v129_v9 = vld [vmem:[%s1248_s3 + $0x10] sm:$0xff]  ;;  %v130_v10 = vld [vmem:[%s1248_s3 + $0x18] sm:$0xff]  ;;  %v846_v12 = vpack.c.bf16 %v43_v7, %v42_v6  ;;  %v44_v14 = vld [vmem:[%s1247_s2 + $0x20] sm:$0xff] }
   0x4   :  { %844 = vmatpush3.bf16.msra.mxu0 %v843_v4  ;;  %v870_v13 = vpack.c.bf16 %v130_v10, %v129_v9  ;;  %v45_v15 = vld [vmem:[%s1247_s2 + $0x28] sm:$0xff]  ;;  %v131_v16 = vld [vmem:[%s1248_s3 + $0x20] sm:$0xff]  ;;  %v46_v20 = vld [vmem:[%s1247_s2 + $0x30] sm:$0xff] }
   0x5   :  { %868 = vmatpush3.bf16.msra.mxu1 %v867_v8  ;;  %845 = vmatprep.subr.bf16.mxu0 %v956_v3  ;;  %v132_v17 = vld [vmem:[%s1248_s3 + $0x28] sm:$0xff]  ;;  %v849_v18 = vpack.c.bf16 %v45_v15, %v44_v14  ;;  %v47_v21 = vld [vmem:[%s1247_s2 + $0x38] sm:$0xff]  ;;  %v133_v22 = vld [vmem:[%s1248_s3 + $0x30] sm:$0xff] }
   0x6   :  { %869 = vmatprep.subr.bf16.mxu1 %v956_v3  ;;  %v873_v19 = vpack.c.bf16 %v132_v17, %v131_v16  ;;  %v134_v23 = vld [vmem:[%s1248_s3 + $0x38] sm:$0xff]  ;;  %v852_v24 = vpack.c.bf16 %v47_v21, %v46_v20  ;;  %v48_v26 = vld [vmem:[%s1247_s2 + $0x40] sm:$0xff]  ;;  %v49_v27 = vld [vmem:[%s1247_s2 + $0x48] sm:$0xff] }
   0x7   :  { %v876_v25 = vpack.c.bf16 %v134_v23, %v133_v22  ;;  %v135_v28 = vld [vmem:[%s1248_s3 + $0x40] sm:$0xff]  ;;  %v136_v29 = vld [vmem:[%s1248_s3 + $0x48] sm:$0xff] }
   0x8   :  { %847 = vmatpush3.bf16.msra.mxu0 %v846_v12 }
   0x9   :  { %871 = vmatpush3.bf16.msra.mxu1 %v870_v13  ;;  %848 = vmatprep.subr.bf16.mxu0 %v956_v3 }
   0xa   :  { %872 = vmatprep.subr.bf16.mxu1 %v956_v3 }
   0xc   :  { %850 = vmatpush3.bf16.msra.mxu0 %v849_v18 }
   0xd   :  { %874 = vmatpush3.bf16.msra.mxu1 %v873_v19  ;;  %851 = vmatprep.subr.bf16.mxu0 %v956_v3 }
   0xe   :  { %875 = vmatprep.subr.bf16.mxu1 %v956_v3 }
   0xf   :  { %16 = vsyncpa [#allocation3], 0  ;;  %v855_v30 = vpack.c.bf16 %v49_v27, %v48_v26  ;;  %v879_v31 = vpack.c.bf16 %v136_v29, %v135_v28  ;;  %v50_v32 = vld [vmem:[%s1247_s2 + $0x50] sm:$0xff]  ;;  %v51_v33 = vld [vmem:[%s1247_s2 + $0x58] sm:$0xff]  ;;  %vm217_vm1 = vcmask 261120   ;;  %vm633_vm3 = vcmask 25600  }
  0x10   :  { %853 = vmatpush3.bf16.msra.mxu0 %v852_v24  ;;  %v137_v34 = vld [vmem:[%s1248_s3 + $0x50] sm:$0xff]  ;;  %v138_v35 = vld [vmem:[%s1248_s3 + $0x58] sm:$0xff]  ;;  %v858_v36 = vpack.c.bf16 %v51_v33, %v50_v32  ;;  %v52_v38 = vld [vmem:[%s1247_s2 + $0x60] sm:$0xff] }
  0x11   :  { %877 = vmatpush3.bf16.msra.mxu1 %v876_v25  ;;  %854 = vmatprep.subr.bf16.mxu0 %v956_v3  ;;  %v882_v37 = vpack.c.bf16 %v138_v35, %v137_v34  ;;  %v53_v39 = vld [vmem:[%s1247_s2 + $0x68] sm:$0xff]  ;;  %v139_v40 = vld [vmem:[%s1248_s3 + $0x60] sm:$0xff]  ;;  %v54_v44 = vld [vmem:[%s1247_s2 + $0x70] sm:$0xff] }
  0x12   :  { %878 = vmatprep.subr.bf16.mxu1 %v956_v3  ;;  %v140_v41 = vld [vmem:[%s1248_s3 + $0x68] sm:$0xff]  ;;  %v861_v42 = vpack.c.bf16 %v53_v39, %v52_v38  ;;  %v55_v45 = vld [vmem:[%s1247_s2 + $0x78] sm:$0xff]  ;;  %v141_v46 = vld [vmem:[%s1248_s3 + $0x70] sm:$0xff] }
  0x13   :  { %v885_v43 = vpack.c.bf16 %v140_v41, %v139_v40  ;;  %v142_v47 = vld [vmem:[%s1248_s3 + $0x78] sm:$0xff]  ;;  %v864_v48 = vpack.c.bf16 %v55_v45, %v54_v44  ;;  %v213_v50 = vld [vmem:[%s1249_s4] sm:$0xff]  ;;  %v214_v51 = vld [vmem:[%s1249_s4 + $0x8] sm:$0xff] }
  0x14   :  { %856 = vmatpush3.bf16.msra.mxu0 %v855_v30  ;;  %v888_v49 = vpack.c.bf16 %v142_v47, %v141_v46  ;;  %v298_v52 = vld [vmem:[%s1250_s5] sm:$0xff]  ;;  %v299_v53 = vld [vmem:[%s1250_s5 + $0x8] sm:$0xff]  ;;  %v891_v55 = vpack.c.bf16 %v214_v51, %v213_v50  ;;  %v215_v58 = vld [vmem:[%s1249_s4 + $0x10] sm:$0xff] }
  0x15   :  { %880 = vmatpush3.bf16.msra.mxu1 %v879_v31  ;;  %857 = vmatprep.subr.bf16.mxu0 %v956_v3  ;;  %v39_v54 = vld [vmem:[%s1245_s0] sm:$0x3]  ;;  %v897_v57 = vpack.c.bf16 %v299_v53, %v298_v52  ;;  %v216_v59 = vld [vmem:[%s1249_s4 + $0x18] sm:$0xff]  ;;  %v300_v60 = vld [vmem:[%s1250_s5 + $0x10] sm:$0xff] }
  0x16   :  { %881 = vmatprep.subr.bf16.mxu1 %v956_v3  ;;  %v126_v56 = vld [vmem:[%s1246_s1] sm:$0x3]  ;;  %v301_v61 = vld [vmem:[%s1250_s5 + $0x18] sm:$0xff]  ;;  %v894_v62 = vpack.c.bf16 %v216_v59, %v215_v58  ;;  %v389_v6 = vld [vmem:[%s1252_s7 + $0x8] sm:$0xff] }
  0x17   :  { %v900_v63 = vpack.c.bf16 %v301_v61, %v300_v60  ;;  %v388_v5 = vld [vmem:[%s1252_s7] sm:$0xff]  ;;  %v385_v9 = vld [vmem:[%s1251_s6 + $0x8] sm:$0xff]  ;;  %v390_v10 = vld [vmem:[%s1252_s7 + $0x10] sm:$0xff] }
  0x18   :  { %859 = vmatpush3.bf16.msra.mxu0 %v858_v36  ;;  %v384_v7 = vld [vmem:[%s1251_s6] sm:$0xff]  ;;  %v903_v8 = vpack.c.bf16 %v389_v6, %v388_v5  ;;  %v391_v12 = vld [vmem:[%s1252_s7 + $0x18] sm:$0xff]  ;;  %v386_v14 = vld [vmem:[%s1251_s6 + $0x10] sm:$0xff] }
  0x19   :  { %883 = vmatpush3.bf16.msra.mxu1 %v882_v37  ;;  %860 = vmatprep.subr.bf16.mxu0 %v956_v3  ;;  %v909_v13 = vpack.c.bf16 %v385_v9, %v384_v7  ;;  %v387_v15 = vld [vmem:[%s1251_s6 + $0x18] sm:$0xff]  ;;  %v906_v16 = vpack.c.bf16 %v391_v12, %v390_v10  ;;  %v549_v34 = vld [vmem:[%s1254_s9] sm:$0xff]  ;;  %v550_v35 = vld [vmem:[%s1254_s9 + $0x8] sm:$0xff] }
  0x1a   :  { %884 = vmatprep.subr.bf16.mxu1 %v956_v3  ;;  %v912_v17 = vpack.c.bf16 %v387_v15, %v386_v14  ;;  %v915_v36 = vpack.c.bf16 %v550_v35, %v549_v34  ;;  %v551_v37 = vld [vmem:[%s1254_s9 + $0x10] sm:$0xff]  ;;  %v655_v41 = vld [vmem:[%s1253_s8] ss:$0 sm:$0xff] }
  0x1b   :  { %v656_v47 = vld [vmem:[%s1255_s10] ss:$0 sm:$0xff] }
  0x1c   :  { %862 = vmatpush3.bf16.msra.mxu0 %v861_v42 }
  0x1d   :  { %886 = vmatpush3.bf16.msra.mxu1 %v885_v43  ;;  %863 = vmatprep.subr.bf16.mxu0 %v956_v3 }
  0x1e   :  { %887 = vmatprep.subr.bf16.mxu1 %v956_v3 }
  0x20   :  { %865 = vmatpush3.bf16.msra.mxu0 %v864_v48 }
  0x21   :  { %889 = vmatpush3.bf16.msra.mxu1 %v888_v49  ;;  %890 = vmatprep.subr.bf16.mxu0 %v956_v3 }
  0x22   :  { %896 = vmatprep.subr.bf16.mxu1 %v956_v3 }
  0x23   :  { %750 = vmatmul.mubr.f32.vlgmr.msra.gmra.mrb[0].mxu0 %v39_v54 }
  0x24   :  { %785 = vmatmul.mubr.f32.vlgmr.msra.gmra.mrb[0].mxu1 %v126_v56  ;;  %892 = vmatpush3.bf16.msra.mxu0 %v891_v55 }
  0x25   :  { %898 = vmatpush3.bf16.msra.mxu1 %v897_v57  ;;  %893 = vmatprep.subr.bf16.mxu0 %v956_v3 }
  0x26   :  { %899 = vmatprep.subr.bf16.mxu1 %v956_v3  ;;  %795 = vmatprep.mubr.msk.f32.mxu0 %vm957_vm0, %v958_v11 }
  0x27   :  { %806 = vmatprep.mubr.msk.f32.mxu1 %vm957_vm0, %v958_v11 }
  0x28   :  { %895 = vmatpush3.bf16.msra.mxu0 %v894_v62 }
  0x29   :  { %901 = vmatpush3.bf16.msra.mxu1 %v900_v63  ;;  %902 = vmatprep.subr.bf16.mxu0 %v956_v3 }
  0x2a   :  { %908 = vmatprep.subr.bf16.mxu1 %v956_v3 }
  0xf6   :  { %v122_v0 = vpop.f32.mrb[0].mxu0 }
  0xf7   :  { %v209_v1 = vpop.f32.mrb[0].mxu1  ;;  %v751_v2 = vpop.f32.mrb[1].mxu0  ;;  %796 = vmatmul.mubr.msk.f32.vlgmr.msra.gmra.mrb[2].mxu0 %vm217_vm1, %v122_v0 }
  0xf8   :  { %v786_v4 = vpop.f32.mrb[1].mxu1  ;;  %807 = vmatmul.mubr.msk.f32.vlgmr.msra.gmra.mrb[2].mxu1 %vm217_vm1, %v209_v1  ;;  %817 = vmatprep.mubr.msk.f32.mxu0 %vm957_vm0, %v958_v11 }
  0xf9   :  { %828 = vmatprep.mubr.msk.f32.mxu1 %vm957_vm0, %v958_v11  ;;  %904 = vmatpush3.bf16.msra.mxu0 %v903_v8 }
  0xfa   :  { %910 = vmatpush3.bf16.msra.mxu1 %v909_v13  ;;  %905 = vmatprep.subr.bf16.mxu0 %v956_v3 }
  0xfb   :  { %911 = vmatprep.subr.bf16.mxu1 %v956_v3 }
  0xfd   :  { %907 = vmatpush3.bf16.msra.mxu0 %v906_v16 }
  0xfe   :  { %913 = vmatpush3.bf16.msra.mxu1 %v912_v17  ;;  %914 = vmatprep.subr.bf16.mxu0 %v956_v3 }
 0x1ca   :  { %v287_v18 = vpop.f32.mrb[2].mxu0 }
 0x1cb   :  { %v650_v19 = vmul.f32 -0.999995, %v287_v18  ;;  %v371_v20 = vpop.f32.mrb[2].mxu1  ;;  %v797_v21 = vpop.f32.mrb[3].mxu0 }
 0x1cc   :  { %v652_v22 = vmul.f32 -0.999995, %v371_v20  ;;  %v808_v23 = vpop.f32.mrb[3].mxu1 }
 0x1cd   :  { %v293_v24 = vmul.f32 1.442695, %v650_v19 }
 0x1ce   :  { %v377_v25 = vmul.f32 1.442695, %v652_v22 }
 0x1cf   :  { %924 = vpow2.f32 %v293_v24 }
 0x1d0   :  { %926 = vpow2.f32 %v377_v25 }
 0x1d9   :  { %v925_v26 = vpop.eup %924 }
 0x1da   :  { %v927_v27 = vpop.eup %926  ;;  %v295_v28 = vadd.f32 1.0, %v925_v26 }
 0x1db   :  { %v379_v29 = vadd.f32 1.0, %v927_v27 }
 0x1dc   :  { %928 = vrcp.f32 %v295_v28 }
 0x1dd   :  { %930 = vrcp.f32 %v379_v29 }
 0x1e6   :  { %v929_v30 = vpop.eup %928 }
 0x1e7   :  { %v931_v31 = vpop.eup %930  ;;  %v382_v32 = vmul.f32 %v929_v30, %v122_v0 }
 0x1e8   :  { %v383_v33 = vmul.f32 %v931_v31, %v209_v1 }
 0x1e9   :  { %829 = vmatmul.mubr.msk.f32.vlgmr.msra.gmra.mrb[4].mxu1 %vm217_vm1, %v382_v32 }
 0x1ea   :  { %818 = vmatmul.mubr.msk.f32.vlgmr.msra.gmra.mrb[4].mxu0 %vm217_vm1, %v383_v33 }
 0x1eb   :  { %839 = vmatprep.mubr.msk.f32.mxu0 %vm957_vm0, %v958_v11  ;;  %916 = vmatpush3.bf16.msra.mxu0 %v915_v36  ;;  %v552_v11 = vld [vmem:[%s1254_s9 + $0x18] sm:$0xff]  ;;  %s959_s9 = smov [#allocation2]  }
 0x1ec   :  { %917 = vmatprep.subr.bf16.mxu0 %v956_v3  ;;  %v918_v38 = vpack.c.bf16 %v552_v11, %v551_v37  ;;  %s641_s4 = sshll.u32 %s959_s9, 4  ;;  %s642_s4 = int_to_ptr.vmem [resolvable:$true] %s641_s4 }
 0x1ed   :  { %s932_s8 = scalar_lea.vmem %s642_s4, 32  ;;  %p937_p1 = scmp.lt.s32.totalorder %s642_s4, %s642_s4 }
 0x1ee   :  { %p933_p0 = scmp.ne.s32.totalorder %s642_s4, %s932_s8  ;;  %p938_p2 = scmp.lt.s32.totalorder %s932_s8, %s932_s8 }
 0x1ef   :  { %919 = vmatpush3.bf16.msra.mxu0 %v918_v38 }
 0x1f0   :  { %p939_p3 = por %p938_p2, %p937_p1 }
 0x1f2   :  { %p940_p4 = pnand %p939_p3, %p933_p0 }
 0x2bc   :  { %v534_v39 = vpop.f32.mrb[4].mxu1 }
 0x2bd   :  { %v461_v40 = vpop.f32.mrb[4].mxu0  ;;  %v830_v42 = vpop.f32.mrb[5].mxu1 }
 0x2be   :  { %v535_v43 = vadd.f32 %v534_v39, %v461_v40  ;;  %v819_v44 = vpop.f32.mrb[5].mxu0 }
 0x2c0   :  { %v545_v3 = vadd.f32 %v655_v41, %v535_v43 }
 0x2c2   :  { %vm546_vm2 = vcmp.ge.f32.partialorder %v545_v3, 0.0  ;;  %v547_v45 = vmul.f32 0.01, %v545_v3 }
 0x2c4   :  { %v548_v46 = vsel %vm546_vm2, %v545_v3, %v547_v45 }
 0x2c5   :  { %840 = vmatmul.mubr.msk.f32.vlgmr.msra.gmra.mrb[6].mxu0 %vm217_vm1, %v548_v46 }
 0x398   :  { %v629_v48 = vpop.f32.mrb[6].mxu0 }
 0x399   :  { %v630_v49 = vadd.f32 %v656_v47, %v629_v48  ;;  %v841_v50 = vpop.f32.mrb[7].mxu0 }
 0x39b   :  { %634 = vst.msk [vmem:[#allocation2] sm:$0x3] %vm633_vm3, %v630_v49 }
 0x39c   :  { %943 = shalt.err (!%p940_p4)
}
 0x39d   :  { %s944_s23 = scalar_lea.hbm %s1256_s11, 32 }
 0x39e   :  { %p945_p5 = scmp.ne.s32.totalorder %s1256_s11, %s944_s23  ;;  %p948_p6 = scmp.lt.u32.totalorder %s944_s23, %s1256_s11 }
 0x3a0   :  { %p950_p7 = pnand %p948_p6, %p945_p5 }
 0x3a2   :  { %953 = shalt.err (!%p950_p7)
}
 0x3a3   :  { %644 = dma.vmem_to_hbm [thread:$0]  %s642_s4, 32, %s1256_s11, [#allocation3]  }
 0x3a4   :  { %954 = dma.done.wait [#allocation3], 32  }
 0x3a5   :  { %955 = vsyncadd [#allocation3], 4294967264 }
 0x3a6   :  { %648 = vsyncpa [#allocation3], 1 }

// kernel: forward.2
= control target key start
LH: loop header
LB: loop body
LE: loop exit
PB: predicated region body
PF: predicated region fallthrough
CT: control target
= control target key end

     0   :  { %s5771_s27 = smov 0   ;;  %s6966_s0 = inlined_call_operand.vmem [shape: f32[2,2,16,4], index: 0, kind: input, shape index: {}]   ;;  %s6967_s1 = inlined_call_operand.vmem [shape: s32[2,2,1,1], index: 1, kind: input, shape index: {}]   ;;  %s6968_s2 = inlined_call_operand.vmem [shape: f32[2,8,16,4], index: 2, kind: input, shape index: {}]   ;;  %s6969_s3 = inlined_call_operand.vmem [shape: s32[2,8,1,1], index: 3, kind: input, shape index: {}]   ;;  %s6970_s4 = inlined_call_operand.vmem [shape: f32[2,8,16], index: 4, kind: input, shape index: {}]   ;;  %s6971_s5 = inlined_call_operand.vmem [shape: f32[2,1,16], index: 5, kind: input, shape index: {}]   ;;  %s6972_s6 = inlined_call_operand.vmem [shape: f32[2,32,16], index: 6, kind: input, shape index: {}]   ;;  %s6973_s7 = inlined_call_operand.vmem [shape: f32[2,1,16], index: 7, kind: input, shape index: {}]   ;;  %s6974_s8 = inlined_call_operand.vmem [shape: f32[2,4,16], index: 8, kind: input, shape index: {}]   ;;  %s6975_s9 = inlined_call_operand.vmem [shape: f32[2,1,16], index: 9, kind: input, shape index: {}]   ;;  %s6976_s10 = inlined_call_operand.vmem [shape: f32[2,32,16], index: 10, kind: input, shape index: {}]   ;;  %s6977_s11 = inlined_call_operand.vmem [shape: f32[2,1,16], index: 11, kind: input, shape index: {}]   ;;  %s6978_s12 = inlined_call_operand.vmem [shape: f32[2,32,16], index: 12, kind: input, shape index: {}]   ;;  %s6979_s13 = inlined_call_operand.vmem [shape: f32[2,1,16], index: 13, kind: input, shape index: {}]   ;;  %s6980_s14 = inlined_call_operand.vmem [shape: f32[2,8,16], index: 14, kind: input, shape index: {}]   ;;  %s6981_s15 = inlined_call_operand.vmem [shape: f32[2,1,16], index: 15, kind: input, shape index: {}]   ;;  %s6982_s16 = inlined_call_operand.vmem [shape: f32[2,32,16], index: 16, kind: input, shape index: {}]   ;;  %s6983_s17 = inlined_call_operand.vmem [shape: f32[2,1,16], index: 17, kind: input, shape index: {}]   ;;  %s6984_s18 = inlined_call_operand.vmem [shape: f32[2,4,16], index: 18, kind: input, shape index: {}]   ;;  %s6985_s19 = inlined_call_operand.vmem [shape: f32[2,1,16], index: 19, kind: input, shape index: {}]   ;;  %s6986_s20 = inlined_call_operand.vmem [shape: f32[2,32,16], index: 20, kind: input, shape index: {}]   ;;  %s6987_s21 = inlined_call_operand.vmem [shape: f32[2,1,16], index: 21, kind: input, shape index: {}]   ;;  %s6988_s22 = inlined_call_operand.vmem [shape: f32[2,32,16], index: 22, kind: input, shape index: {}]   ;;  %s6989_s23 = inlined_call_operand.vmem [shape: f32[2,1,16], index: 23, kind: input, shape index: {}]   ;;  %s6990_s24 = inlined_call_operand.vmem [shape: f32[2,16,8], index: 24, kind: input, shape index: {}]   ;;  %s6991_s25 = inlined_call_operand.vmem [shape: f32[2,16,8], index: 25, kind: input, shape index: {}]   ;;  %s6992_s26 = inlined_call_operand.vmem [shape: f32[2,2,16,8], index: 26, kind: output, shape index: {}]  }
   0x1   :  { %7003 = sst [smem:[#allocation5_spill]] %s6966_s0 }
   0x2   :  { %7004 = sst [smem:[#allocation6_spill]] %s6967_s1 }
   0x3   :  { %7005 = sst [smem:[#allocation7_spill]] %s6968_s2 }
   0x4   :  { %7006 = sst [smem:[#allocation8_spill]] %s6969_s3 }
   0x5   :  { %7007 = sst [smem:[#allocation9_spill]] %s6970_s4 }
   0x6   :  { %7008 = sst [smem:[#allocation10_spill]] %s6971_s5 }
   0x7   :  { %7009 = sst [smem:[#allocation11_spill]] %s6972_s6 }
   0x8   :  { %7010 = sst [smem:[#allocation12_spill]] %s6973_s7 }
   0x9   :  { %7011 = sst [smem:[#allocation13_spill]] %s6974_s8 }
   0xa   :  { %7012 = sst [smem:[#allocation14_spill]] %s6975_s9 }
   0xb   :  { %7013 = sst [smem:[#allocation15_spill]] %s6976_s10 }
   0xc LB: > { %7014 = sst [smem:[#allocation4_spill]] %s5628_s27  ;;  %s4915_s3 = sadd.s32 4294967295, %s5628_s27   ;;  %s5628_s27 = sphi %s5771_s27, %s36_s27  }
   0xd   : > { %p4919_p0 = scmp.ge.s32.totalorder %s5628_s27, 1  ;;  %p936_p1 = scmp.lt.s32.totalorder %s5628_s27, 3 }
   0xf   : > { %p937_p2 = pnand %p4919_p0, %p936_p1 }
  0x10   : > { %p1105_p3 = scmp.lt.s32.totalorder (!%p937_p2), %s4915_s3, 1  ;;  %vm1229_vm0 = vcmask (!%p937_p2), 58368   ;;  %v5630_v0 = vmov (!%p937_p2), 0.0   ;;  %vm1232_vm1 = vcmask (!%p937_p2), 31744   ;;  %s7015_s29 = sld [smem:[#allocation5_spill]] (!%p937_p2)  ;;  %vm1253_vm2 = vcmask (!%p937_p2), 64544  }
  0x11   : > { %940 = sbr.rel (%p937_p2) target bundleno = 4070 (0xfe6), region = 124  ;;  %1230 = vst.msk [vmem:[#allocation2] sm:$0x3] (!%p937_p2), %vm1229_vm0, %v5630_v0  ;;  %1231 = vst.msk [vmem:[#allocation2 + $0x18] sm:$0x3] (!%p937_p2), %vm1229_vm0, %v5630_v0  ;;  %s7016_s2 = sld [smem:[#allocation9_spill]] (!%p937_p2) }
  0x12   : > { %2054 = vst.msk [vmem:[#allocation2 + $0x30] sm:$0x3] (!%p937_p2), %vm1229_vm0, %v5630_v0  ;;  %2055 = vst.msk [vmem:[#allocation2 + $0x48] sm:$0x3] (!%p937_p2), %vm1229_vm0, %v5630_v0  ;;  %s6994_s10 = smov (!%p937_p2), 4   ;;  %vm6999_vm3 = vcmask (!%p937_p2), 64512  }
  0x13   : > { %2056 = vst.msk [vmem:[#allocation2 + $0x60] sm:$0x3] (!%p937_p2), %vm1229_vm0, %v5630_v0  ;;  %2057 = vst.msk [vmem:[#allocation2 + $0x78] sm:$0x3] (!%p937_p2), %vm1229_vm0, %v5630_v0  ;;  %vm1374_vm4 = vcmask (!%p937_p2), 254976   ;;  %s7017_s8 = sld [smem:[#allocation11_spill]] (!%p937_p2) }
  0x14   : > { %2058 = vst.msk [vmem:[#allocation2 + $0x90] sm:$0x3] (!%p937_p2), %vm1229_vm0, %v5630_v0  ;;  %2059 = vst.msk [vmem:[#allocation2 + $0xa8] sm:$0x3] (!%p937_p2), %vm1229_vm0, %v5630_v0  ;;  %s7018_s9 = sld [smem:[#allocation10_spill]] (!%p937_p2)  ;;  %vm1527_vm5 = vcmask (!%p937_p2), 1043456  }
  0x15   : > { %vm1377_vm6 = vcmask (!%p937_p2), 130048   ;;  %s7019_s1 = sld [smem:[#allocation13_spill]] (!%p937_p2)  ;;  %vm1398_vm7 = vcmask (!%p937_p2), 261248   ;;  %vm1407_vm8 = vcmask (!%p937_p2), 261120  }
  0x18   : > { %s7058_s3 = smov (!%p1105_p3, %s4915_s3), 1 }
  0x19   : > { %s5798_s7 = sshll.u32 %s7058_s3, 5  ;;  %s5801_s28 = sshll.u32 %s7058_s3, 3 }
  0x1a   : > { %s1109_s0 = scalar_lea.vmem %s7015_s29, %s5798_s7  ;;  %s1126_s5 = scalar_lea.vmem %s7016_s2, %s5801_s28 }
  0x1b   : > { %v5807_v1 = vld [vmem:[%s1109_s0] sm:$0xff]  ;;  %v5809_v2 = vld [vmem:[%s1109_s0 + $0x10] sm:$0xff]  ;;  %v5811_v3 = vld [vmem:[%s1109_s0 + $0x8] sm:$0xff]  ;;  %s1134_s4 = scalar_lea.vmem %s7017_s8, %s5798_s7  ;;  %s1129_s30 = scalar_lea.vmem %s7018_s9, %s7058_s3 }
  0x1c   : > { %1241 = vrot.lane.b32.xlu0 %v5807_v1, %s6994_s10  ;;  %1233 = vst.msk [vmem:[#allocation2 + $0x1] sm:$0xff] %vm1232_vm1, %v5807_v1  ;;  %1245 = vrot.lane.b32.xlu1 %v5809_v2, %s6994_s10  ;;  %1235 = vst.msk [vmem:[#allocation2 + $0x19] sm:$0xff] %vm1232_vm1, %v5809_v2  ;;  %v5827_v4 = vld [vmem:[%s1109_s0 + $0x18] sm:$0xff]  ;;  %v1220_v5 = vld [vmem:[%s1126_s5] sm:$0xff]  ;;  %s6993_s2 = sshll.u32 %s7058_s3, 2  ;;  %s7020_s9 = sld [smem:[#allocation12_spill]] }
  0x1d   : > { %1234 = vst.msk [vmem:[#allocation2 + $0x9] sm:$0xff] %vm1232_vm1, %v5811_v3  ;;  %1236 = vst.msk [vmem:[#allocation2 + $0x21] sm:$0xff] %vm1232_vm1, %v5827_v4  ;;  %5251 = vmatprep.subr.mxu0 %v1220_v5  ;;  %v1222_v14 = vld [vmem:[%s1134_s4] sm:$0xff]  ;;  %v1223_v15 = vld [vmem:[%s1134_s4 + $0x8] sm:$0xff]  ;;  %s1141_s8 = scalar_lea.vmem %s7019_s1, %s6993_s2  ;;  %s7021_s1 = sld [smem:[#allocation15_spill]] }
  0x1e   : > { %5252 = vmatpush3.msra.mxu0 %v1220_v5  ;;  %v5481_v16 = vpack.c.bf16 %v1223_v15, %v1222_v14  ;;  %v1224_v17 = vld [vmem:[%s1134_s4 + $0x10] sm:$0xff]  ;;  %v1225_v18 = vld [vmem:[%s1134_s4 + $0x18] sm:$0xff]  ;;  %v4952_v20 = vld [vmem:[%s1129_s30] ss:$0 sm:$0xff]  ;;  %s6996_s4 = smov 16   ;;  %s7024_s29 = sld [smem:[#allocation7_spill]] }
  0x1f   : > { %v5485_v19 = vpack.c.bf16 %v1225_v18, %v1224_v17  ;;  %v1227_v26 = vld [vmem:[%s1141_s8] sm:$0xf]  ;;  %s1157_s5 = scalar_lea.vmem %s6978_s12, %s5798_s7 }
  0x20   : > { %1243 = vrot.lane.b32.xlu0 %v5811_v3, %s6994_s10  ;;  %1247 = vrot.lane.b32.xlu1 %v5827_v4, %s6994_s10  ;;  %s5101_s10 = sshll.u32 %s7058_s3, 7 }
  0x21   : > { %5482 = vmatprep.subr.bf16.mxu0 %v5481_v16 }
  0x22   : > { %s1137_s30 = scalar_lea.vmem %s7020_s9, %s7058_s3  ;;  %s7026_s9 = sshll.u32 %s7058_s3, 2 }
  0x23   : > { %s1149_s8 = scalar_lea.vmem %s7021_s1, %s5798_s7  ;;  %v4957_v46 = vld [vmem:[%s1137_s30] ss:$0 sm:$0xff]  ;;  %s1179_s6 = scalar_lea.vmem %s6984_s18, %s7026_s9 }
  0x24   : > { %v1634_v44 = vld [vmem:[%s1149_s8] sm:$0xff]  ;;  %v1635_v45 = vld [vmem:[%s1149_s8 + $0x8] sm:$0xff]  ;;  %v1636_v51 = vld [vmem:[%s1149_s8 + $0x10] sm:$0xff]  ;;  %s5943_s0 = scalar_lea.vmem %s7024_s29, %s5101_s10  ;;  %s7025_s29 = smov 4  }
  0x25   : > { %v5489_v47 = vpack.c.bf16 %v1635_v45, %v1634_v44  ;;  %v1637_v52 = vld [vmem:[%s1149_s8 + $0x18] sm:$0xff]  ;;  %s1152_s8 = scalar_lea.vmem %s6977_s11, %s7058_s3  ;;  %s1167_s30 = scalar_lea.vmem %s6981_s15, %s7058_s3 }
  0x26   : > { %v5493_v55 = vpack.c.bf16 %v1637_v52, %v1636_v51  ;;  %v6010_v51 = vld [vmem:[%s5943_s0 + $0x40] sm:$0xff]  ;;  %v6013_v52 = vld [vmem:[%s5943_s0 + $0x48] sm:$0xff]  ;;  %s1175_s10 = scalar_lea.vmem %s6983_s17, %s7058_s3  ;;  %s1182_s9 = scalar_lea.vmem %s6985_s19, %s7058_s3 }
  0x27   : > { %5490 = vmatprep.subr.bf16.mxu1 %v5489_v47  ;;  %2068 = vst.msk [vmem:[#allocation2 + $0x61] sm:$0xff] %vm1232_vm1, %v6010_v51  ;;  %2069 = vst.msk [vmem:[#allocation2 + $0x69] sm:$0xff] %vm1232_vm1, %v6013_v52 }
  0x28   : > { %5492 = vmatpush3.bf16.msra.mxu1 %v5489_v47  ;;  %v5986_v47 = vld [vmem:[%s5943_s0 + $0x8] sm:$0xff] }
  0x29   : > { %5494 = vmatprep.subr.bf16.mxu1 %v5493_v55 }
  0x2c   : > { %5496 = vmatpush3.bf16.msra.mxu1 %v5493_v55 }
  0x8e   : > { %v1242_v6 = vpop.permute.xlu0 %1241  ;;  %v1246_v7 = vpop.permute.xlu1 %1245 }
  0x8f   : > { %1254 = vst.msk [vmem:[#allocation2] sm:$0xff] %vm1253_vm2, %v1242_v6  ;;  %1256 = vst.msk [vmem:[#allocation2 + $0x18] sm:$0xff] %vm1253_vm2, %v1246_v7 }
  0x92   : > { %v1244_v8 = vpop.permute.xlu0 %1243  ;;  %v1248_v9 = vpop.permute.xlu1 %1247 }
  0x93   : > { %1255 = vst.msk [vmem:[#allocation2 + $0x8] sm:$0xff] %vm1253_vm2, %v1244_v8  ;;  %1257 = vst.msk [vmem:[#allocation2 + $0x20] sm:$0xff] %vm1253_vm2, %v1248_v9 }
  0x96   : > { %v1258_v10 = vld [vmem:[#allocation2] sm:$0xff]  ;;  %v1260_v11 = vld [vmem:[#allocation2 + $0x18] sm:$0xff] }
  0x97   : > { %5253 = vmatprep.mubr.msk.f32.mxu0 %vm6999_vm3, %v1258_v10  ;;  %1375 = vst.msk [vmem:[#allocation2] sm:$0x3] %vm1374_vm4, %v5630_v0  ;;  %1376 = vst.msk [vmem:[#allocation2 + $0x18] sm:$0x3] %vm1374_vm4, %v5630_v0 }
  0x9a   : > { %v1259_v12 = vld [vmem:[#allocation2 + $0x8] sm:$0xff]  ;;  %v1261_v13 = vld [vmem:[#allocation2 + $0x20] sm:$0xff] }
  0x9b   : > { %5254 = vmatmul.mubr.msk.f32.vlgmr.msra.gmra.mrb[0].mxu0 %vm6999_vm3, %v1259_v12 }
  0x9c   : > { %5256 = vmatprep.mubr.msk.f32.mxu0 %vm6999_vm3, %v1260_v11  ;;  %5484 = vmatpush3.bf16.msra.mxu0 %v5481_v16 }
  0x9d   : > { %5486 = vmatprep.subr.bf16.mxu0 %v5485_v19 }
  0x9f   : > { %5257 = vmatmul.mubr.msk.f32.gmra.mrb[2].mxu0 %vm6999_vm3, %v1261_v13 }
  0xa0   : > { %5488 = vmatpush3.bf16.msra.mxu0 %v5485_v19 }
  0xa1   : > { %5273 = vmatprep.subr.msk.mxu0 %vm1527_vm5, %v1227_v26 }
 0x16e   : > { %v5255_v21 = vpop.f32.mrb[0].mxu0 }
 0x16f   : > { %v1367_v22 = vadd.f32 %v5255_v21, %v4952_v20  ;;  %v1341_v23 = vpop.f32.mrb[1].mxu0 }
 0x170   : > { %v1366_v24 = vadd.f32 %v4952_v20, %v1341_v23  ;;  %v5946_v23 = vld [vmem:[%s5943_s0 + $0x20] sm:$0xff] }
 0x171   : > { %v1371_v25 = vmax.f32 %v1367_v22, 0.0  ;;  %2064 = vst.msk [vmem:[#allocation2 + $0x31] sm:$0xff] %vm1232_vm1, %v5946_v23 }
 0x172   : > { %v1370_v27 = vmax.f32 %v1366_v24, 0.0  ;;  %v5258_v28 = vpop.f32.mrb[2].mxu0  ;;  %v5951_v24 = vld [vmem:[%s5943_s0 + $0x28] sm:$0xff] }
 0x173   : > { %v1369_v29 = vadd.f32 %v5258_v28, %v4952_v20  ;;  %1388 = vrot.lane.b32.xlu1 %v1371_v25, %s6996_s4  ;;  %v1351_v30 = vpop.f32.mrb[3].mxu0  ;;  %1379 = vst.msk [vmem:[#allocation2 + $0x9] sm:$0xff] %vm1377_vm6, %v1371_v25  ;;  %v5954_v25 = vld [vmem:[%s5943_s0 + $0x30] sm:$0xff]  ;;  %v1640_v28 = vld [vmem:[%s1157_s5 + $0x8] sm:$0xff] }
 0x174   : > { %v1368_v31 = vadd.f32 %v4952_v20, %v1351_v30  ;;  %1386 = vrot.lane.b32.xlu0 %v1370_v27, %s6996_s4  ;;  %1378 = vst.msk [vmem:[#allocation2 + $0x1] sm:$0xff] %vm1377_vm6, %v1370_v27  ;;  %v1639_v27 = vld [vmem:[%s1157_s5] sm:$0xff]  ;;  %v1641_v30 = vld [vmem:[%s1157_s5 + $0x10] sm:$0xff] }
 0x175   : > { %v1373_v32 = vmax.f32 %v1369_v29, 0.0  ;;  %2065 = vst.msk [vmem:[#allocation2 + $0x39] sm:$0xff] %vm1232_vm1, %v5951_v24  ;;  %2066 = vst.msk [vmem:[#allocation2 + $0x49] sm:$0xff] %vm1232_vm1, %v5954_v25  ;;  %v5497_v29 = vpack.c.bf16 %v1640_v28, %v1639_v27  ;;  %v6107_v27 = vld [vmem:[%s5943_s0 + $0x78] sm:$0xff] }
 0x176   : > { %v1372_v33 = vmax.f32 %v1368_v31, 0.0  ;;  %v1642_v31 = vld [vmem:[%s1157_s5 + $0x18] sm:$0xff]  ;;  %2075 = vst.msk [vmem:[#allocation2 + $0xb1] sm:$0xff] %vm1232_vm1, %v6107_v27 }
 0x177   : > { %1392 = vrot.lane.b32.xlu1 %v1373_v32, %s6996_s4  ;;  %1381 = vst.msk [vmem:[#allocation2 + $0x21] sm:$0xff] %vm1377_vm6, %v1373_v32  ;;  %v5501_v32 = vpack.c.bf16 %v1642_v31, %v1641_v30  ;;  %v2050_v30 = vld [vmem:[%s1179_s6] sm:$0xf]  ;;  %s1195_s6 = scalar_lea.vmem %s6988_s22, %s5798_s7 }
 0x178   : > { %1390 = vrot.lane.b32.xlu0 %v1372_v33, %s6996_s4  ;;  %1380 = vst.msk [vmem:[#allocation2 + $0x19] sm:$0xff] %vm1377_vm6, %v1372_v33  ;;  %s7022_s4 = sld [smem:[#allocation14_spill]]  ;;  %v4968_v33 = vld [vmem:[%s1152_s8] ss:$0 sm:$0xff]  ;;  %s1172_s8 = scalar_lea.vmem %s6982_s16, %s5798_s7 }
 0x17e   : > { %s1144_s27 = scalar_lea.vmem %s7022_s4, %s7058_s3  ;;  %s1164_s4 = scalar_lea.vmem %s6980_s14, %s5801_s28 }
 0x17f   : > { %v4963_v54 = vld [vmem:[%s1144_s27] ss:$0 sm:$0xff]  ;;  %s7023_s27 = smov 16  }
 0x1e5   : > { %v1389_v34 = vpop.permute.xlu1 %1388 }
 0x1e6   : > { %1400 = vst.msk [vmem:[#allocation2 + $0x8] sm:$0xff] %vm1398_vm7, %v1389_v34  ;;  %v1387_v35 = vpop.permute.xlu0 %1386 }
 0x1e7   : > { %1399 = vst.msk [vmem:[#allocation2] sm:$0xff] %vm1398_vm7, %v1387_v35 }
 0x1e9   : > { %v1393_v36 = vpop.permute.xlu1 %1392 }
 0x1ea   : > { %1402 = vst.msk [vmem:[#allocation2 + $0x20] sm:$0xff] %vm1398_vm7, %v1393_v36  ;;  %v1391_v37 = vpop.permute.xlu0 %1390 }
 0x1eb   : > { %1401 = vst.msk [vmem:[#allocation2 + $0x18] sm:$0xff] %vm1398_vm7, %v1391_v37 }
 0x1ed   : > { %v1404_v39 = vld [vmem:[#allocation2 + $0x8] sm:$0xff] }
 0x1ee   : > { %v1403_v38 = vld [vmem:[#allocation2] sm:$0xff] }
 0x1ef   : > { %5267 = vmatprep.mubr.msk.f32.mxu0 %vm1407_vm8, %v1403_v38  ;;  %1644 = vst.msk [vmem:[#allocation2] sm:$0x3] %vm1374_vm4, %v5630_v0 }
 0x1f0   : > { %5268 = vmatmul.mubr.msk.f32.vlgmr.msra.gmra.mrb[4].mxu0 %vm1407_vm8, %v1404_v39 }
 0x1f1   : > { %5274 = vmatpush3.msk.msra.mxu0 %vm1527_vm5, %v1227_v26  ;;  %v1406_v41 = vld [vmem:[#allocation2 + $0x20] sm:$0xff]  ;;  %v5961_v26 = vld [vmem:[%s5943_s0 + $0x38] sm:$0xff] }
 0x1f2   : > { %v1405_v40 = vld [vmem:[#allocation2 + $0x18] sm:$0xff]  ;;  %2067 = vst.msk [vmem:[#allocation2 + $0x51] sm:$0xff] %vm1232_vm1, %v5961_v26  ;;  %5498 = vmatprep.subr.bf16.mxu0 %v5497_v29 }
 0x1f3   : > { %5270 = vmatprep.mubr.msk.f32.mxu0 %vm1407_vm8, %v1405_v40  ;;  %1645 = vst.msk [vmem:[#allocation2 + $0x18] sm:$0x3] %vm1374_vm4, %v5630_v0 }
 0x1f4   : > { %5271 = vmatmul.mubr.msk.f32.gmra.mrb[6].mxu0 %vm1407_vm8, %v1406_v41  ;;  %v2043_v41 = vld [vmem:[%s1164_s4] sm:$0xff]  ;;  %s6149_s4 = scalar_lea.vmem %s6979_s13, %s7058_s3 }
 0x1f5   : > { %5275 = vmatprep.mubr.msk.f32.mxu0 %vm1232_vm1, %v5807_v1  ;;  %5309 = vmatprep.subr.mxu1 %v2043_v41 }
 0x1f8   : > { %5276 = vmatmul.mubr.msk.f32.vlgmr.msra.gmra.mrb[8].mxu0 %vm1232_vm1, %v5811_v3 }
 0x1f9   : > { %5278 = vmatprep.mubr.msk.f32.mxu0 %vm1232_vm1, %v5809_v2  ;;  %5500 = vmatpush3.bf16.msra.mxu0 %v5497_v29 }
 0x1fa   : > { %5502 = vmatprep.subr.bf16.mxu0 %v5501_v32 }
 0x1fc   : > { %5279 = vmatmul.mubr.msk.f32.gmra.mrb[10].mxu0 %vm1232_vm1, %v5827_v4 }
 0x1fd   : > { %5504 = vmatpush3.bf16.msra.mxu0 %v5501_v32 }
 0x2c3   : > { %v5269_v42 = vpop.f32.mrb[4].mxu0 }
 0x2c4   : > { %v1486_v43 = vpop.f32.mrb[5].mxu0  ;;  %v1512_v49 = vadd.f32 %v5269_v42, %v4957_v46 }
 0x2c5   : > { %v1511_v53 = vadd.f32 %v4957_v46, %v1486_v43 }
 0x2c6   : > { %v1516_v57 = vmax.f32 %v1512_v49, 0.0  ;;  %v5996_v49 = vld [vmem:[%s5943_s0 + $0x18] sm:$0xff] }
 0x2c7   : > { %v5272_v48 = vpop.f32.mrb[6].mxu0  ;;  %v1515_v61 = vmax.f32 %v1511_v53, 0.0 }
 0x2c8   : > { %v1496_v50 = vpop.f32.mrb[7].mxu0  ;;  %v1514_v58 = vadd.f32 %v5272_v48, %v4957_v46  ;;  %v5989_v48 = vld [vmem:[%s5943_s0] sm:$0xff] }
 0x2c9   : > { %v1513_v62 = vadd.f32 %v4957_v46, %v1496_v50  ;;  %v5999_v50 = vld [vmem:[%s5943_s0 + $0x10] sm:$0xff] }
 0x2ca   : > { %v1518_v4 = vmax.f32 %v1514_v58, 0.0 }
 0x2cb   : > { %v5277_v56 = vpop.f32.mrb[8].mxu0  ;;  %v1517_v8 = vmax.f32 %v1513_v62, 0.0 }
 0x2cc   : > { %v1623_v59 = vadd.f32 %v5277_v56, %v4963_v54  ;;  %v1597_v60 = vpop.f32.mrb[9].mxu0 }
 0x2cd   : > { %v1622_v63 = vadd.f32 %v4963_v54, %v1597_v60 }
 0x2ce   : > { %v1627_v1 = vadd.f32 %v1623_v59, %v1516_v57 }
 0x2cf   : > { %v1626_v2 = vadd.f32 %v1622_v63, %v1515_v61  ;;  %v5280_v3 = vpop.f32.mrb[10].mxu0 }
 0x2d0   : > { %v5903_v5 = vmax.f32 %v1627_v1, 0.0  ;;  %v1625_v6 = vadd.f32 %v5280_v3, %v4963_v54  ;;  %v1607_v7 = vpop.f32.mrb[11].mxu0 }
 0x2d1   : > { %v5905_v9 = vmax.f32 %v1626_v2, 0.0  ;;  %v1624_v10 = vadd.f32 %v4963_v54, %v1607_v7 }
 0x2d2   : > { %1647 = vst.msk [vmem:[#allocation2 + $0xa] sm:$0xff] %vm1377_vm6, %v5903_v5  ;;  %v1629_v11 = vadd.f32 %v1625_v6, %v1518_v4  ;;  %1656 = vrot.lane.b32.xlu1 %v5903_v5, %s7023_s27 }
 0x2d3   : > { %1646 = vst.msk [vmem:[#allocation2 + $0x2] sm:$0xff] %vm1377_vm6, %v5905_v9  ;;  %v1628_v12 = vadd.f32 %v1624_v10, %v1517_v8  ;;  %1654 = vrot.lane.b32.xlu0 %v5905_v9, %s7023_s27 }
 0x2d4   : > { %v5915_v13 = vmax.f32 %v1629_v11, 0.0 }
 0x2d5   : > { %v5917_v14 = vmax.f32 %v1628_v12, 0.0 }
 0x2d6   : > { %1649 = vst.msk [vmem:[#allocation2 + $0x22] sm:$0xff] %vm1377_vm6, %v5915_v13  ;;  %1660 = vrot.lane.b32.xlu1 %v5915_v13, %s7023_s27 }
 0x2d7   : > { %1648 = vst.msk [vmem:[#allocation2 + $0x1a] sm:$0xff] %vm1377_vm6, %v5917_v14  ;;  %1658 = vrot.lane.b32.xlu0 %v5917_v14, %s7023_s27 }
 0x344   : > { %v1657_v15 = vpop.permute.xlu1 %1656 }
 0x345   : > { %1667 = vst.msk [vmem:[#allocation2 + $0x8] sm:$0xff] %vm1398_vm7, %v1657_v15  ;;  %v1655_v16 = vpop.permute.xlu0 %1654 }
 0x346   : > { %1666 = vst.msk [vmem:[#allocation2] sm:$0xff] %vm1398_vm7, %v1655_v16 }
 0x348   : > { %v1661_v17 = vpop.permute.xlu1 %1660 }
 0x349   : > { %1669 = vst.msk [vmem:[#allocation2 + $0x20] sm:$0xff] %vm1398_vm7, %v1661_v17  ;;  %v1659_v18 = vpop.permute.xlu0 %1658 }
 0x34a   : > { %1668 = vst.msk [vmem:[#allocation2 + $0x18] sm:$0xff] %vm1398_vm7, %v1659_v18  ;;  %v6072_v18 = vld [vmem:[%s5943_s0 + $0x50] sm:$0xff] }
 0x34b   : > { %2070 = vst.msk [vmem:[#allocation2 + $0x79] sm:$0xff] %vm1232_vm1, %v6072_v18 }
 0x34c   : > { %v1671_v20 = vld [vmem:[#allocation2 + $0x8] sm:$0xff] }
 0x34d   : > { %v1670_v19 = vld [vmem:[#allocation2] sm:$0xff] }
 0x34e   : > { %5289 = vmatprep.mubr.msk.f32.mxu1 %vm1407_vm8, %v1670_v19  ;;  %1785 = vst.msk [vmem:[#allocation2] sm:$0x3] %vm1374_vm4, %v5630_v0  ;;  %v6079_v19 = vld [vmem:[%s5943_s0 + $0x58] sm:$0xff] }
 0x34f   : > { %5290 = vmatmul.mubr.msk.f32.vlgmr.msra.gmra.mrb[0].mxu1 %vm1407_vm8, %v1671_v20  ;;  %2071 = vst.msk [vmem:[#allocation2 + $0x81] sm:$0xff] %vm1232_vm1, %v6079_v19  ;;  %v6086_v20 = vld [vmem:[%s5943_s0 + $0x60] sm:$0xff] }
 0x350   : > { %v1673_v22 = vld [vmem:[#allocation2 + $0x20] sm:$0xff]  ;;  %5310 = vmatpush3.msra.mxu1 %v2043_v41  ;;  %2072 = vst.msk [vmem:[#allocation2 + $0x91] sm:$0xff] %vm1232_vm1, %v6086_v20 }
 0x351   : > { %v1672_v21 = vld [vmem:[#allocation2 + $0x18] sm:$0xff]  ;;  %5367 = vmatprep.subr.msk.mxu1 %vm1527_vm5, %v2050_v30 }
 0x352   : > { %5292 = vmatprep.mubr.msk.f32.mxu1 %vm1407_vm8, %v1672_v21  ;;  %1786 = vst.msk [vmem:[#allocation2 + $0x18] sm:$0x3] %vm1374_vm4, %v5630_v0  ;;  %v6093_v21 = vld [vmem:[%s5943_s0 + $0x68] sm:$0xff] }
 0x353   : > { %5293 = vmatmul.mubr.msk.f32.gmra.mrb[2].mxu1 %vm1407_vm8, %v1673_v22  ;;  %2073 = vst.msk [vmem:[#allocation2 + $0x99] sm:$0xff] %vm1232_vm1, %v6093_v21  ;;  %v6100_v22 = vld [vmem:[%s5943_s0 + $0x70] sm:$0xff]  ;;  %s1187_s0 = scalar_lea.vmem %s6986_s20, %s5798_s7 }
 0x354   : > { %2074 = vst.msk [vmem:[#allocation2 + $0xa9] sm:$0xff] %vm1232_vm1, %v6100_v22 }
 0x422   : > { %v5291_v34 = vpop.f32.mrb[0].mxu1 }
 0x423   : > { %v1778_v35 = vadd.f32 %v5291_v34, %v4968_v33  ;;  %v1752_v36 = vpop.f32.mrb[1].mxu1 }
 0x424   : > { %v1777_v37 = vadd.f32 %v4968_v33, %v1752_v36 }
 0x425   : > { %v1782_v38 = vmax.f32 %v1778_v35, 0.0 }
 0x426   : > { %v1781_v39 = vmax.f32 %v1777_v37, 0.0  ;;  %v5294_v40 = vpop.f32.mrb[2].mxu1 }
 0x427   : > { %1788 = vst.msk [vmem:[#allocation2 + $0xa] sm:$0xff] %vm1377_vm6, %v1782_v38  ;;  %v1780_v42 = vadd.f32 %v5294_v40, %v4968_v33  ;;  %1797 = vrot.lane.b32.xlu1 %v1782_v38, %s7023_s27  ;;  %v1762_v43 = vpop.f32.mrb[3].mxu1 }
 0x428   : > { %1787 = vst.msk [vmem:[#allocation2 + $0x2] sm:$0xff] %vm1377_vm6, %v1781_v39  ;;  %v1779_v44 = vadd.f32 %v4968_v33, %v1762_v43  ;;  %1795 = vrot.lane.b32.xlu0 %v1781_v39, %s7023_s27 }
 0x429   : > { %v1784_v45 = vmax.f32 %v1780_v42, 0.0 }
 0x42a   : > { %v1783_v46 = vmax.f32 %v1779_v44, 0.0 }
 0x42b   : > { %1790 = vst.msk [vmem:[#allocation2 + $0x22] sm:$0xff] %vm1377_vm6, %v1784_v45  ;;  %1801 = vrot.lane.b32.xlu1 %v1784_v45, %s7023_s27  ;;  %v2045_v45 = vld [vmem:[%s1172_s8] sm:$0xff] }
 0x42c   : > { %1789 = vst.msk [vmem:[#allocation2 + $0x1a] sm:$0xff] %vm1377_vm6, %v1783_v46  ;;  %1799 = vrot.lane.b32.xlu0 %v1783_v46, %s7023_s27  ;;  %v2046_v46 = vld [vmem:[%s1172_s8 + $0x8] sm:$0xff] }
 0x42f   : > { %2094 = vrot.lane.b32.xlu1 %v5986_v47, %s7025_s29 }
 0x430   : > { %2092 = vrot.lane.b32.xlu0 %v5989_v48, %s7025_s29 }
 0x433   : > { %2098 = vrot.lane.b32.xlu1 %v5996_v49, %s7025_s29 }
 0x434   : > { %2096 = vrot.lane.b32.xlu0 %v5999_v50, %s7025_s29 }
 0x437   : > { %2102 = vrot.lane.b32.xlu1 %v5951_v24, %s7025_s29 }
 0x438   : > { %2100 = vrot.lane.b32.xlu0 %v5946_v23, %s7025_s29 }
 0x43b   : > { %2106 = vrot.lane.b32.xlu1 %v5961_v26, %s7025_s29 }
 0x43c   : > { %2104 = vrot.lane.b32.xlu0 %v5954_v25, %s7025_s29 }
 0x43f   : > { %2110 = vrot.lane.b32.xlu1 %v6013_v52, %s7025_s29 }
 0x440   : > { %2108 = vrot.lane.b32.xlu0 %v6010_v51, %s7025_s29 }
 0x443   : > { %2114 = vrot.lane.b32.xlu1 %v6079_v19, %s7025_s29 }
 0x444   : > { %2112 = vrot.lane.b32.xlu0 %v6072_v18, %s7025_s29 }
 0x447   : > { %2118 = vrot.lane.b32.xlu1 %v6093_v21, %s7025_s29 }
 0x448   : > { %2116 = vrot.lane.b32.xlu0 %v6086_v20, %s7025_s29 }
 0x44b   : > { %2122 = vrot.lane.b32.xlu1 %v6107_v27, %s7025_s29 }
 0x44c   : > { %2120 = vrot.lane.b32.xlu0 %v6100_v22, %s7025_s29  ;;  %s7027_s29 = sld [smem:[#allocation8_spill]] }
 0x499   : > { %v1798_v53 = vpop.permute.xlu1 %1797 }
 0x49a   : > { %1808 = vst.msk [vmem:[#allocation2 + $0x8] sm:$0xff] %vm1398_vm7, %v1798_v53  ;;  %v1796_v54 = vpop.permute.xlu0 %1795  ;;  %v5505_v53 = vpack.c.bf16 %v2046_v46, %v2045_v45 }
 0x49b   : > { %1807 = vst.msk [vmem:[#allocation2] sm:$0xff] %vm1398_vm7, %v1796_v54 }
 0x49c   : > { %5506 = vmatprep.subr.bf16.mxu0 %v5505_v53 }
 0x49d   : > { %v1802_v55 = vpop.permute.xlu1 %1801 }
 0x49e   : > { %1810 = vst.msk [vmem:[#allocation2 + $0x20] sm:$0xff] %vm1398_vm7, %v1802_v55  ;;  %v1800_v56 = vpop.permute.xlu0 %1799  ;;  %v4973_v55 = vld [vmem:[%s6149_s4] ss:$0 sm:$0xff] }
 0x49f   : > { %1809 = vst.msk [vmem:[#allocation2 + $0x18] sm:$0xff] %vm1398_vm7, %v1800_v56 }
 0x4a1   : > { %v1812_v57 = vld [vmem:[#allocation2 + $0x8] sm:$0xff]  ;;  %v2095_v58 = vpop.permute.xlu1 %2094 }
 0x4a2   : > { %v1811_v59 = vld [vmem:[#allocation2] sm:$0xff]  ;;  %2061 = vst.msk [vmem:[#allocation2 + $0x9] sm:$0xff] %vm1232_vm1, %v5986_v47  ;;  %v2093_v60 = vpop.permute.xlu0 %2092 }
 0x4a3   : > { %5303 = vmatprep.mubr.msk.f32.mxu0 %vm1407_vm8, %v1811_v59  ;;  %2052 = vst.msk [vmem:[#allocation2] sm:$0x3] %vm1229_vm0, %v5630_v0 }
 0x4a4   : > { %5304 = vmatmul.mubr.msk.f32.vlgmr.msra.gmra.mrb[12].mxu0 %vm1407_vm8, %v1812_v57  ;;  %2060 = vst.msk [vmem:[#allocation2 + $0x1] sm:$0xff] %vm1232_vm1, %v5989_v48 }
 0x4a5   : > { %2140 = vst.msk [vmem:[#allocation2] sm:$0xff] %vm1253_vm2, %v2093_v60  ;;  %2141 = vst.msk [vmem:[#allocation2 + $0x8] sm:$0xff] %vm1253_vm2, %v2095_v58  ;;  %v1814_v61 = vld [vmem:[#allocation2 + $0x20] sm:$0xff]  ;;  %v2099_v62 = vpop.permute.xlu1 %2098  ;;  %5508 = vmatpush3.bf16.msra.mxu0 %v5505_v53  ;;  %v2047_v60 = vld [vmem:[%s1172_s8 + $0x10] sm:$0xff] }
 0x4a6   : > { %v1813_v63 = vld [vmem:[#allocation2 + $0x18] sm:$0xff]  ;;  %v2097_v1 = vpop.permute.xlu0 %2096  ;;  %2063 = vst.msk [vmem:[#allocation2 + $0x21] sm:$0xff] %vm1232_vm1, %v5996_v49 }
 0x4a7   : > { %5306 = vmatprep.mubr.msk.f32.mxu0 %vm1407_vm8, %v1813_v63  ;;  %2053 = vst.msk [vmem:[#allocation2 + $0x18] sm:$0x3] %vm1229_vm0, %v5630_v0 }
 0x4a8   : > { %5307 = vmatmul.mubr.msk.f32.gmra.mrb[14].mxu0 %vm1407_vm8, %v1814_v61  ;;  %2062 = vst.msk [vmem:[#allocation2 + $0x19] sm:$0xff] %vm1232_vm1, %v5999_v50  ;;  %v2048_v61 = vld [vmem:[%s1172_s8 + $0x18] sm:$0xff]  ;;  %s1190_s8 = scalar_lea.vmem %s6987_s21, %s7058_s3 }
 0x4a9   : > { %2142 = vst.msk [vmem:[#allocation2 + $0x18] sm:$0xff] %vm1253_vm2, %v2097_v1  ;;  %2143 = vst.msk [vmem:[#allocation2 + $0x20] sm:$0xff] %vm1253_vm2, %v2099_v62  ;;  %v2103_v2 = vpop.permute.xlu1 %2102  ;;  %v5509_v63 = vpack.c.bf16 %v2048_v61, %v2047_v60  ;;  %v6169_v1 = vld [vmem:[%s1167_s30] ss:$0 sm:$0xff] }
 0x4aa   : > { %v2101_v3 = vpop.permute.xlu0 %2100  ;;  %2145 = vst.msk [vmem:[#allocation2 + $0x38] sm:$0xff] %vm1253_vm2, %v2103_v2 }
 0x4ab   : > { %2144 = vst.msk [vmem:[#allocation2 + $0x30] sm:$0xff] %vm1253_vm2, %v2101_v3  ;;  %5510 = vmatprep.subr.bf16.mxu0 %v5509_v63 }
 0x4ac   : > { %v2156_v4 = vld [vmem:[#allocation2] sm:$0xff]  ;;  %v2157_v6 = vld [vmem:[#allocation2 + $0x8] sm:$0xff]  ;;  %5512 = vmatpush3.bf16.msra.mxu0 %v5509_v63 }
 0x4ad   : > { %5311 = vmatprep.mubr.msk.f32.mxu1 %vm6999_vm3, %v2156_v4  ;;  %2403 = vst.msk [vmem:[#allocation2] sm:$0x3] %vm1374_vm4, %v5630_v0  ;;  %v2107_v7 = vpop.permute.xlu1 %2106 }
 0x4ae   : > { %5312 = vmatmul.mubr.msk.f32.vlgmr.msra.gmra.mrb[4].mxu1 %vm6999_vm3, %v2157_v6  ;;  %v2105_v8 = vpop.permute.xlu0 %2104  ;;  %2147 = vst.msk [vmem:[#allocation2 + $0x50] sm:$0xff] %vm1253_vm2, %v2107_v7 }
 0x4af   : > { %2146 = vst.msk [vmem:[#allocation2 + $0x48] sm:$0xff] %vm1253_vm2, %v2105_v8  ;;  %5368 = vmatpush3.msk.msra.mxu1 %vm1527_vm5, %v2050_v30 }
 0x4b0   : > { %v2158_v10 = vld [vmem:[#allocation2 + $0x18] sm:$0xff]  ;;  %v2159_v11 = vld [vmem:[#allocation2 + $0x20] sm:$0xff] }
 0x4b1   : > { %5314 = vmatprep.mubr.msk.f32.mxu1 %vm6999_vm3, %v2158_v10  ;;  %2404 = vst.msk [vmem:[#allocation2 + $0x18] sm:$0x3] %vm1374_vm4, %v5630_v0  ;;  %v2161_v15 = vld [vmem:[#allocation2 + $0x38] sm:$0xff]  ;;  %v2111_v29 = vpop.permute.xlu1 %2110 }
 0x4b2   : > { %5315 = vmatmul.mubr.msk.f32.gmra.mrb[6].mxu1 %vm6999_vm3, %v2159_v11  ;;  %v2160_v12 = vld [vmem:[#allocation2 + $0x30] sm:$0xff]  ;;  %v2109_v28 = vpop.permute.xlu0 %2108  ;;  %2149 = vst.msk [vmem:[#allocation2 + $0x68] sm:$0xff] %vm1253_vm2, %v2111_v29 }
 0x4b3   : > { %5317 = vmatprep.mubr.msk.f32.mxu1 %vm6999_vm3, %v2160_v12  ;;  %2405 = vst.msk [vmem:[#allocation2 + $0x30] sm:$0x3] %vm1374_vm4, %v5630_v0 }
 0x4b4   : > { %2148 = vst.msk [vmem:[#allocation2 + $0x60] sm:$0xff] %vm1253_vm2, %v2109_v28 }
 0x4b5   : > { %v2163_v17 = vld [vmem:[#allocation2 + $0x50] sm:$0xff]  ;;  %v2115_v34 = vpop.permute.xlu1 %2114 }
 0x4b6   : > { %5318 = vmatmul.mubr.msk.f32.gmra.mrb[8].mxu1 %vm6999_vm3, %v2161_v15  ;;  %v2162_v16 = vld [vmem:[#allocation2 + $0x48] sm:$0xff]  ;;  %v2113_v33 = vpop.permute.xlu0 %2112  ;;  %2151 = vst.msk [vmem:[#allocation2 + $0x80] sm:$0xff] %vm1253_vm2, %v2115_v34 }
 0x4b7   : > { %5320 = vmatprep.mubr.msk.f32.mxu1 %vm6999_vm3, %v2162_v16  ;;  %2406 = vst.msk [vmem:[#allocation2 + $0x48] sm:$0x3] %vm1374_vm4, %v5630_v0 }
 0x4b8   : > { %2150 = vst.msk [vmem:[#allocation2 + $0x78] sm:$0xff] %vm1253_vm2, %v2113_v33 }
 0x4b9   : > { %v2165_v32 = vld [vmem:[#allocation2 + $0x68] sm:$0xff]  ;;  %v2119_v36 = vpop.permute.xlu1 %2118 }
 0x4ba   : > { %5321 = vmatmul.mubr.msk.f32.gmra.mrb[10].mxu1 %vm6999_vm3, %v2163_v17  ;;  %v2117_v35 = vpop.permute.xlu0 %2116  ;;  %2153 = vst.msk [vmem:[#allocation2 + $0x98] sm:$0xff] %vm1253_vm2, %v2119_v36 }
 0x4bb   : > { %v2164_v31 = vld [vmem:[#allocation2 + $0x60] sm:$0xff]  ;;  %2152 = vst.msk [vmem:[#allocation2 + $0x90] sm:$0xff] %vm1253_vm2, %v2117_v35 }
 0x4bc   : > { %5323 = vmatprep.mubr.msk.f32.mxu1 %vm6999_vm3, %v2164_v31  ;;  %2407 = vst.msk [vmem:[#allocation2 + $0x60] sm:$0x3] %vm1374_vm4, %v5630_v0 }
 0x4bd   : > { %v2123_v39 = vpop.permute.xlu1 %2122  ;;  %v2167_v40 = vld [vmem:[#allocation2 + $0x80] sm:$0xff] }
 0x4be   : > { %5324 = vmatmul.mubr.msk.f32.gmra.mrb[12].mxu1 %vm6999_vm3, %v2165_v32  ;;  %v2121_v37 = vpop.permute.xlu0 %2120  ;;  %2155 = vst.msk [vmem:[#allocation2 + $0xb0] sm:$0xff] %vm1253_vm2, %v2123_v39 }
 0x4bf   : > { %v2166_v38 = vld [vmem:[#allocation2 + $0x78] sm:$0xff]  ;;  %2154 = vst.msk [vmem:[#allocation2 + $0xa8] sm:$0xff] %vm1253_vm2, %v2121_v37 }
 0x4c0   : > { %5326 = vmatprep.mubr.msk.f32.mxu1 %vm6999_vm3, %v2166_v38  ;;  %2408 = vst.msk [vmem:[#allocation2 + $0x78] sm:$0x3] %vm1374_vm4, %v5630_v0 }
 0x4c1   : > { %v2169_v43 = vld [vmem:[#allocation2 + $0x98] sm:$0xff] }
 0x4c2   : > { %5327 = vmatmul.mubr.msk.f32.gmra.mrb[14].mxu1 %vm6999_vm3, %v2167_v40  ;;  %v2168_v41 = vld [vmem:[#allocation2 + $0x90] sm:$0xff] }
 0x4c3   : > { %5329 = vmatprep.mubr.msk.f32.mxu1 %vm6999_vm3, %v2168_v41  ;;  %2409 = vst.msk [vmem:[#allocation2 + $0x90] sm:$0x3] %vm1374_vm4, %v5630_v0 }
 0x4c5   : > { %v2171_v57 = vld [vmem:[#allocation2 + $0xb0] sm:$0xff] }
 0x4c6   : > { %5330 = vmatmul.mubr.msk.f32.gmra.mrb[16].mxu1 %vm6999_vm3, %v2169_v43  ;;  %v2170_v54 = vld [vmem:[#allocation2 + $0xa8] sm:$0xff] }
 0x4c7   : > { %5332 = vmatprep.mubr.msk.f32.mxu1 %vm6999_vm3, %v2170_v54  ;;  %2410 = vst.msk [vmem:[#allocation2 + $0xa8] sm:$0x3] %vm1374_vm4, %v5630_v0 }
 0x4ca   : > { %5333 = vmatmul.mubr.msk.f32.gmra.mrb[18].mxu1 %vm6999_vm3, %v2171_v57 }
 0x4cb   : > { %5369 = vmatprep.mubr.msk.f32.mxu1 %vm1232_vm1, %v5989_v48 }
 0x4ce   : > { %5370 = vmatmul.mubr.msk.f32.vlgmr.msra.gmra.mrb[20].mxu1 %vm1232_vm1, %v5986_v47 }
 0x4cf   : > { %5372 = vmatprep.mubr.msk.f32.mxu1 %vm1232_vm1, %v5999_v50 }
 0x4d2   : > { %5373 = vmatmul.mubr.msk.f32.gmra.mrb[22].mxu1 %vm1232_vm1, %v5996_v49 }
 0x4d3   : > { %5375 = vmatprep.mubr.msk.f32.mxu1 %vm1232_vm1, %v5946_v23 }
 0x4d6   : > { %5376 = vmatmul.mubr.msk.f32.gmra.mrb[24].mxu1 %vm1232_vm1, %v5951_v24 }
 0x4d7   : > { %5378 = vmatprep.mubr.msk.f32.mxu1 %vm1232_vm1, %v5954_v25 }
 0x4da   : > { %5379 = vmatmul.mubr.msk.f32.gmra.mrb[26].mxu1 %vm1232_vm1, %v5961_v26 }
 0x4db   : > { %5381 = vmatprep.mubr.msk.f32.mxu1 %vm1232_vm1, %v6010_v51 }
 0x4de   : > { %5382 = vmatmul.mubr.msk.f32.gmra.mrb[28].mxu1 %vm1232_vm1, %v6013_v52 }
 0x4df   : > { %5384 = vmatprep.mubr.msk.f32.mxu1 %vm1232_vm1, %v6072_v18 }
 0x4e2   : > { %5385 = vmatmul.mubr.msk.f32.gmra.mrb[30].mxu1 %vm1232_vm1, %v6079_v19 }
 0x4e3   : > { %5387 = vmatprep.mubr.msk.f32.mxu1 %vm1232_vm1, %v6086_v20 }
 0x4e6   : > { %5388 = vmatmul.mubr.msk.f32.gmra.mrb[32].mxu1 %vm1232_vm1, %v6093_v21 }
 0x4e7   : > { %5390 = vmatprep.mubr.msk.f32.mxu1 %vm1232_vm1, %v6100_v22 }
 0x4ea   : > { %5391 = vmatmul.mubr.msk.f32.gmra.mrb[34].mxu1 %vm1232_vm1, %v6107_v27 }
 0x577   : > { %v6136_v42 = vpop.f32.mrb[12].mxu0 }
 0x578   : > { %v6151_v44 = vpop.f32.mrb[13].mxu0 }
 0x57b   : > { %v5308_v56 = vpop.f32.mrb[14].mxu0 }
 0x57c   : > { %v6158_v58 = vadd.f32 %v5308_v56, %v4973_v55  ;;  %v1903_v59 = vpop.f32.mrb[15].mxu0 }
 0x57d   : > { %v6165_v62 = vadd.f32 %v4973_v55, %v1903_v59 }
 0x581   : > { %v5313_v2 = vpop.f32.mrb[4].mxu1 }
 0x582   : > { %v2372_v3 = vadd.f32 %v5313_v2, %v6169_v1  ;;  %v2286_v4 = vpop.f32.mrb[5].mxu1 }
 0x583   : > { %v2371_v6 = vadd.f32 %v6169_v1, %v2286_v4 }
 0x584   : > { %v2388_v7 = vmax.f32 %v2372_v3, 0.0 }
 0x585   : > { %v2387_v48 = vmax.f32 %v2371_v6, 0.0  ;;  %v5316_v8 = vpop.f32.mrb[6].mxu1 }
 0x586   : > { %2412 = vst.msk [vmem:[#allocation2 + $0x9] sm:$0xff] %vm1377_vm6, %v2388_v7  ;;  %v2374_v47 = vadd.f32 %v5316_v8, %v6169_v1  ;;  %2445 = vrot.lane.b32.xlu1 %v2388_v7, %s7023_s27  ;;  %v2296_v50 = vpop.f32.mrb[7].mxu1 }
 0x587   : > { %2411 = vst.msk [vmem:[#allocation2 + $0x1] sm:$0xff] %vm1377_vm6, %v2387_v48  ;;  %v2373_v10 = vadd.f32 %v6169_v1, %v2296_v50  ;;  %2443 = vrot.lane.b32.xlu0 %v2387_v48, %s7023_s27 }
 0x588   : > { %v2390_v11 = vmax.f32 %v2374_v47, 0.0 }
 0x589   : > { %v2389_v49 = vmax.f32 %v2373_v10, 0.0  ;;  %v5319_v12 = vpop.f32.mrb[8].mxu1 }
 0x58a   : > { %2414 = vst.msk [vmem:[#allocation2 + $0x21] sm:$0xff] %vm1377_vm6, %v2390_v11  ;;  %v2376_v23 = vadd.f32 %v5319_v12, %v6169_v1  ;;  %2449 = vrot.lane.b32.xlu1 %v2390_v11, %s7023_s27  ;;  %v2306_v15 = vpop.f32.mrb[9].mxu1 }
 0x58b   : > { %2413 = vst.msk [vmem:[#allocation2 + $0x19] sm:$0xff] %vm1377_vm6, %v2389_v49  ;;  %v2375_v16 = vadd.f32 %v6169_v1, %v2306_v15  ;;  %2447 = vrot.lane.b32.xlu0 %v2389_v49, %s7023_s27 }
 0x58c   : > { %v2392_v17 = vmax.f32 %v2376_v23, 0.0 }
 0x58d   : > { %v2391_v24 = vmax.f32 %v2375_v16, 0.0  ;;  %v5322_v28 = vpop.f32.mrb[10].mxu1 }
 0x58e   : > { %2416 = vst.msk [vmem:[#allocation2 + $0x39] sm:$0xff] %vm1377_vm6, %v2392_v17  ;;  %v2378_v25 = vadd.f32 %v5322_v28, %v6169_v1  ;;  %2453 = vrot.lane.b32.xlu1 %v2392_v17, %s7023_s27  ;;  %v2316_v29 = vpop.f32.mrb[11].mxu1 }
 0x58f   : > { %2415 = vst.msk [vmem:[#allocation2 + $0x31] sm:$0xff] %vm1377_vm6, %v2391_v24  ;;  %v2377_v30 = vadd.f32 %v6169_v1, %v2316_v29  ;;  %2451 = vrot.lane.b32.xlu0 %v2391_v24, %s7023_s27  ;;  %v2989_v29 = vld [vmem:[%s1187_s0 + $0x8] sm:$0xff] }
 0x590   : > { %v2394_v31 = vmax.f32 %v2378_v25, 0.0  ;;  %v2988_v25 = vld [vmem:[%s1187_s0] sm:$0xff] }
 0x591   : > { %v2393_v26 = vmax.f32 %v2377_v30, 0.0  ;;  %v5325_v51 = vpop.f32.mrb[12].mxu1  ;;  %v2990_v30 = vld [vmem:[%s1187_s0 + $0x10] sm:$0xff] }
 0x592   : > { %2418 = vst.msk [vmem:[#allocation2 + $0x51] sm:$0xff] %vm1377_vm6, %v2394_v31  ;;  %2457 = vrot.lane.b32.xlu1 %v2394_v31, %s7023_s27  ;;  %v2380_v52 = vadd.f32 %v5325_v51, %v6169_v1  ;;  %v2326_v18 = vpop.f32.mrb[13].mxu1  ;;  %v5513_v31 = vpack.c.bf16 %v2989_v29, %v2988_v25 }
 0x593   : > { %2417 = vst.msk [vmem:[#allocation2 + $0x49] sm:$0xff] %vm1377_vm6, %v2393_v26  ;;  %2455 = vrot.lane.b32.xlu0 %v2393_v26, %s7023_s27  ;;  %v2379_v32 = vadd.f32 %v6169_v1, %v2326_v18  ;;  %v2991_v26 = vld [vmem:[%s1187_s0 + $0x18] sm:$0xff] }
 0x594   : > { %v2396_v33 = vmax.f32 %v2380_v52, 0.0  ;;  %v5517_v51 = vpack.c.bf16 %v2991_v26, %v2990_v30  ;;  %5514 = vmatprep.subr.bf16.mxu0 %v5513_v31 }
 0x595   : > { %v2395_v19 = vmax.f32 %v2379_v32, 0.0  ;;  %v5328_v54 = vpop.f32.mrb[14].mxu1 }
 0x596   : > { %2420 = vst.msk [vmem:[#allocation2 + $0x69] sm:$0xff] %vm1377_vm6, %v2396_v33  ;;  %2461 = vrot.lane.b32.xlu1 %v2396_v33, %s7023_s27  ;;  %v2382_v55 = vadd.f32 %v5328_v54, %v6169_v1  ;;  %v2336_v56 = vpop.f32.mrb[15].mxu1 }
 0x597   : > { %2419 = vst.msk [vmem:[#allocation2 + $0x61] sm:$0xff] %vm1377_vm6, %v2395_v19  ;;  %2459 = vrot.lane.b32.xlu0 %v2395_v19, %s7023_s27  ;;  %v2381_v57 = vadd.f32 %v6169_v1, %v2336_v56 }
 0x598   : > { %v2398_v59 = vmax.f32 %v2382_v55, 0.0 }
 0x599   : > { %v2397_v60 = vmax.f32 %v2381_v57, 0.0  ;;  %v5331_v61 = vpop.f32.mrb[16].mxu1 }
 0x59a   : > { %2422 = vst.msk [vmem:[#allocation2 + $0x81] sm:$0xff] %vm1377_vm6, %v2398_v59  ;;  %v2384_v63 = vadd.f32 %v5331_v61, %v6169_v1  ;;  %v2346_v2 = vpop.f32.mrb[17].mxu1  ;;  %2465 = vrot.lane.b32.xlu1 %v2398_v59, %s7023_s27 }
 0x59b   : > { %2421 = vst.msk [vmem:[#allocation2 + $0x79] sm:$0xff] %vm1377_vm6, %v2397_v60  ;;  %v2383_v3 = vadd.f32 %v6169_v1, %v2346_v2  ;;  %2463 = vrot.lane.b32.xlu0 %v2397_v60, %s7023_s27 }
 0x59c   : > { %v2400_v4 = vmax.f32 %v2384_v63, 0.0 }
 0x59d   : > { %v2399_v6 = vmax.f32 %v2383_v3, 0.0  ;;  %v5334_v7 = vpop.f32.mrb[18].mxu1 }
 0x59e   : > { %2424 = vst.msk [vmem:[#allocation2 + $0x99] sm:$0xff] %vm1377_vm6, %v2400_v4  ;;  %v2386_v48 = vadd.f32 %v5334_v7, %v6169_v1  ;;  %v2356_v8 = vpop.f32.mrb[19].mxu1  ;;  %2469 = vrot.lane.b32.xlu1 %v2400_v4, %s7023_s27 }
 0x59f   : > { %2423 = vst.msk [vmem:[#allocation2 + $0x91] sm:$0xff] %vm1377_vm6, %v2399_v6  ;;  %v2385_v47 = vadd.f32 %v6169_v1, %v2356_v8  ;;  %2467 = vrot.lane.b32.xlu0 %v2399_v6, %s7023_s27 }
 0x5a0   : > { %v2402_v50 = vmax.f32 %v2386_v48, 0.0 }
 0x5a1   : > { %v2401_v10 = vmax.f32 %v2385_v47, 0.0  ;;  %v5371_v11 = vpop.f32.mrb[20].mxu1 }
 0x5a2   : > { %2426 = vst.msk [vmem:[#allocation2 + $0xb1] sm:$0xff] %vm1377_vm6, %v2402_v50  ;;  %2473 = vrot.lane.b32.xlu1 %v2402_v50, %s7023_s27  ;;  %v6273_v49 = vpop.f32.mrb[21].mxu1 }
 0x5a3   : > { %2425 = vst.msk [vmem:[#allocation2 + $0xa9] sm:$0xff] %vm1377_vm6, %v2401_v10  ;;  %2471 = vrot.lane.b32.xlu0 %v2401_v10, %s7023_s27 }
 0x5a5   : > { %v6275_v12 = vpop.f32.mrb[22].mxu1 }
 0x5a6   : > { %v6277_v23 = vpop.f32.mrb[23].mxu1 }
 0x5a9   : > { %v6279_v1 = vpop.f32.mrb[24].mxu1 }
 0x5aa   : > { %v6281_v15 = vpop.f32.mrb[25].mxu1 }
 0x5ad   : > { %v6283_v16 = vpop.f32.mrb[26].mxu1 }
 0x5ae   : > { %v6285_v17 = vpop.f32.mrb[27].mxu1 }
 0x5f8   : > { %v2446_v20 = vpop.permute.xlu1 %2445 }
 0x5f9   : > { %2492 = vst.msk [vmem:[#allocation2 + $0x8] sm:$0xff] %vm1398_vm7, %v2446_v20  ;;  %v2444_v21 = vpop.permute.xlu0 %2443 }
 0x5fa   : > { %2491 = vst.msk [vmem:[#allocation2] sm:$0xff] %vm1398_vm7, %v2444_v21 }
 0x5fc   : > { %v2450_v22 = vpop.permute.xlu1 %2449 }
 0x5fd   : > { %2494 = vst.msk [vmem:[#allocation2 + $0x20] sm:$0xff] %vm1398_vm7, %v2450_v22  ;;  %v2448_v27 = vpop.permute.xlu0 %2447 }
 0x5fe   : > { %2493 = vst.msk [vmem:[#allocation2 + $0x18] sm:$0xff] %vm1398_vm7, %v2448_v27 }
 0x600   : > { %v2454_v34 = vpop.permute.xlu1 %2453  ;;  %v2508_v37 = vld [vmem:[#allocation2 + $0x8] sm:$0xff] }
 0x601   : > { %2496 = vst.msk [vmem:[#allocation2 + $0x38] sm:$0xff] %vm1398_vm7, %v2454_v34  ;;  %v2452_v35 = vpop.permute.xlu0 %2451  ;;  %v2507_v36 = vld [vmem:[#allocation2] sm:$0xff] }
 0x602   : > { %2495 = vst.msk [vmem:[#allocation2 + $0x30] sm:$0xff] %vm1398_vm7, %v2452_v35  ;;  %5343 = vmatprep.mubr.msk.f32.mxu0 %vm1407_vm8, %v2507_v36 }
 0x603   : > { %2998 = vst.msk [vmem:[#allocation2] sm:$0x3] %vm1374_vm4, %v5630_v0  ;;  %5344 = vmatmul.mubr.msk.f32.vlgmr.msra.gmra.mrb[16].mxu0 %vm1407_vm8, %v2508_v37 }
 0x604   : > { %v2458_v38 = vpop.permute.xlu1 %2457  ;;  %v2510_v41 = vld [vmem:[#allocation2 + $0x20] sm:$0xff]  ;;  %5516 = vmatpush3.bf16.msra.mxu0 %v5513_v31 }
 0x605   : > { %2498 = vst.msk [vmem:[#allocation2 + $0x50] sm:$0xff] %vm1398_vm7, %v2458_v38  ;;  %v2456_v39 = vpop.permute.xlu0 %2455  ;;  %v2509_v40 = vld [vmem:[#allocation2 + $0x18] sm:$0xff]  ;;  %5518 = vmatprep.subr.bf16.mxu0 %v5517_v51 }
 0x606   : > { %2497 = vst.msk [vmem:[#allocation2 + $0x48] sm:$0xff] %vm1398_vm7, %v2456_v39  ;;  %5346 = vmatprep.mubr.msk.f32.mxu0 %vm1407_vm8, %v2509_v40  ;;  %v6323_v39 = vld [vmem:[%s1175_s10] ss:$0 sm:$0xff] }
 0x607   : > { %2999 = vst.msk [vmem:[#allocation2 + $0x18] sm:$0x3] %vm1374_vm4, %v5630_v0  ;;  %5347 = vmatmul.mubr.msk.f32.gmra.mrb[18].mxu0 %vm1407_vm8, %v2510_v41  ;;  %v6325_v40 = vld [vmem:[%s1182_s9] ss:$0 sm:$0xff]  ;;  %s6506_s9 = scalar_lea.vmem %s7027_s29, %s5801_s28  ;;  %s4922_s28 = sshll.u32 %s7058_s3, 1 }
 0x608   : > { %v2512_v45 = vld [vmem:[#allocation2 + $0x38] sm:$0xff]  ;;  %v2462_v28 = vpop.permute.xlu1 %2461  ;;  %5520 = vmatpush3.bf16.msra.mxu0 %v5517_v51  ;;  %v2940_v54 = vadd.f32 %v6325_v40, %v6273_v49  ;;  %v2943_v63 = vadd.f32 %v6275_v12, %v6325_v40  ;;  %v2942_v4 = vadd.f32 %v6325_v40, %v6277_v23  ;;  %v2947_v51 = vadd.f32 %v6283_v16, %v6325_v40 }
 0x609   : > { %v2511_v43 = vld [vmem:[#allocation2 + $0x30] sm:$0xff]  ;;  %v2460_v24 = vpop.permute.xlu0 %2459  ;;  %2500 = vst.msk [vmem:[#allocation2 + $0x68] sm:$0xff] %vm1398_vm7, %v2462_v28 }
 0x60a   : > { %5349 = vmatprep.mubr.msk.f32.mxu0 %vm1407_vm8, %v2511_v43  ;;  %3000 = vst.msk [vmem:[#allocation2 + $0x30] sm:$0x3] %vm1374_vm4, %v5630_v0 }
 0x60b   : > { %5350 = vmatmul.mubr.msk.f32.gmra.mrb[20].mxu0 %vm1407_vm8, %v2512_v45  ;;  %2499 = vst.msk [vmem:[#allocation2 + $0x60] sm:$0xff] %vm1398_vm7, %v2460_v24  ;;  %v2944_v24 = vadd.f32 %v6325_v40, %v6281_v15 }
 0x60c   : > { %v2514_v53 = vld [vmem:[#allocation2 + $0x50] sm:$0xff]  ;;  %v2466_v32 = vpop.permute.xlu1 %2465 }
 0x60d   : > { %v2513_v46 = vld [vmem:[#allocation2 + $0x48] sm:$0xff]  ;;  %v2464_v33 = vpop.permute.xlu0 %2463  ;;  %2502 = vst.msk [vmem:[#allocation2 + $0x80] sm:$0xff] %vm1398_vm7, %v2466_v32  ;;  %v2946_v32 = vadd.f32 %v6325_v40, %v6285_v17 }
 0x60e   : > { %5352 = vmatprep.mubr.msk.f32.mxu0 %vm1407_vm8, %v2513_v46  ;;  %3001 = vst.msk [vmem:[#allocation2 + $0x48] sm:$0x3] %vm1374_vm4, %v5630_v0  ;;  %v2941_v46 = vadd.f32 %v5371_v11, %v6325_v40  ;;  %v2945_v11 = vadd.f32 %v6279_v1, %v6325_v40 }
 0x60f   : > { %5353 = vmatmul.mubr.msk.f32.gmra.mrb[22].mxu0 %vm1407_vm8, %v2514_v53  ;;  %2501 = vst.msk [vmem:[#allocation2 + $0x78] sm:$0xff] %vm1398_vm7, %v2464_v33 }
 0x610   : > { %v2516_v18 = vld [vmem:[#allocation2 + $0x68] sm:$0xff]  ;;  %v2470_v19 = vpop.permute.xlu1 %2469 }
 0x611   : > { %v2468_v20 = vpop.permute.xlu0 %2467  ;;  %2504 = vst.msk [vmem:[#allocation2 + $0x98] sm:$0xff] %vm1398_vm7, %v2470_v19 }
 0x612   : > { %v2515_v52 = vld [vmem:[#allocation2 + $0x60] sm:$0xff]  ;;  %2503 = vst.msk [vmem:[#allocation2 + $0x90] sm:$0xff] %vm1398_vm7, %v2468_v20 }
 0x613   : > { %5355 = vmatprep.mubr.msk.f32.mxu0 %vm1407_vm8, %v2515_v52  ;;  %3002 = vst.msk [vmem:[#allocation2 + $0x60] sm:$0x3] %vm1374_vm4, %v5630_v0 }
 0x614   : > { %5356 = vmatmul.mubr.msk.f32.gmra.mrb[24].mxu0 %vm1407_vm8, %v2516_v18  ;;  %v2474_v21 = vpop.permute.xlu1 %2473  ;;  %v2518_v22 = vld [vmem:[#allocation2 + $0x80] sm:$0xff] }
 0x615   : > { %v2472_v27 = vpop.permute.xlu0 %2471  ;;  %2506 = vst.msk [vmem:[#allocation2 + $0xb0] sm:$0xff] %vm1398_vm7, %v2474_v21 }
 0x616   : > { %v2517_v34 = vld [vmem:[#allocation2 + $0x78] sm:$0xff]  ;;  %2505 = vst.msk [vmem:[#allocation2 + $0xa8] sm:$0xff] %vm1398_vm7, %v2472_v27 }
 0x617   : > { %5358 = vmatprep.mubr.msk.f32.mxu0 %vm1407_vm8, %v2517_v34  ;;  %3003 = vst.msk [vmem:[#allocation2 + $0x78] sm:$0x3] %vm1374_vm4, %v5630_v0 }
 0x618   : > { %5359 = vmatmul.mubr.msk.f32.gmra.mrb[26].mxu0 %vm1407_vm8, %v2518_v22  ;;  %v2520_v35 = vld [vmem:[#allocation2 + $0x98] sm:$0xff]  ;;  %v5383_v22 = vpop.f32.mrb[28].mxu1 }
 0x619   : > { %v2519_v36 = vld [vmem:[#allocation2 + $0x90] sm:$0xff]  ;;  %v2895_v34 = vpop.f32.mrb[29].mxu1 }
 0x61a   : > { %5361 = vmatprep.mubr.msk.f32.mxu0 %vm1407_vm8, %v2519_v36  ;;  %3004 = vst.msk [vmem:[#allocation2 + $0x90] sm:$0x3] %vm1374_vm4, %v5630_v0  ;;  %v5386_v36 = vpop.f32.mrb[30].mxu1 }
 0x61c   : > { %5362 = vmatmul.mubr.msk.f32.gmra.mrb[28].mxu0 %vm1407_vm8, %v2520_v35  ;;  %v2522_v37 = vld [vmem:[#allocation2 + $0xb0] sm:$0xff] }
 0x61d   : > { %v2521_v38 = vld [vmem:[#allocation2 + $0xa8] sm:$0xff] }
 0x61e   : > { %5364 = vmatprep.mubr.msk.f32.mxu0 %vm1407_vm8, %v2521_v38  ;;  %3005 = vst.msk [vmem:[#allocation2 + $0xa8] sm:$0x3] %vm1374_vm4, %v5630_v0 }
 0x620   : > { %5365 = vmatmul.mubr.msk.f32.gmra.mrb[30].mxu0 %vm1407_vm8, %v2522_v37  ;;  %v2905_v37 = vpop.f32.mrb[31].mxu1 }
 0x621   : > { %v6398_v38 = vpop.f32.mrb[32].mxu1 }
 0x6d6   : > { %v5345_v41 = vpop.f32.mrb[16].mxu0 }
 0x6d7   : > { %v2723_v43 = vadd.f32 %v5345_v41, %v6323_v39  ;;  %v2637_v45 = vpop.f32.mrb[17].mxu0  ;;  %v6400_v41 = vpop.f32.mrb[33].mxu1 }
 0x6d8   : > { %v2722_v53 = vadd.f32 %v6323_v39, %v2637_v45 }
 0x6d9   : > { %v2739_v55 = vmax.f32 %v2723_v43, 0.0  ;;  %v6402_v43 = vpop.f32.mrb[34].mxu1 }
 0x6da   : > { %v2738_v56 = vmax.f32 %v2722_v53, 0.0  ;;  %v5348_v57 = vpop.f32.mrb[18].mxu0  ;;  %v6404_v45 = vpop.f32.mrb[35].mxu1 }
 0x6db   : > { %v2957_v59 = vadd.f32 %v2941_v46, %v2739_v55  ;;  %v2725_v60 = vadd.f32 %v5348_v57, %v6323_v39  ;;  %v2647_v61 = vpop.f32.mrb[19].mxu0  ;;  %v2949_v55 = vadd.f32 %v5383_v22, %v6325_v40  ;;  %v2948_v57 = vadd.f32 %v6325_v40, %v2895_v34 }
 0x6dc   : > { %v2956_v2 = vadd.f32 %v2940_v54, %v2738_v56  ;;  %v2724_v3 = vadd.f32 %v6323_v39, %v2647_v61 }
 0x6dd   : > { %v6338_v6 = vmax.f32 %v2957_v59, 0.0  ;;  %v2741_v7 = vmax.f32 %v2725_v60, 0.0 }
 0x6de   : > { %v6340_v48 = vmax.f32 %v2956_v2, 0.0  ;;  %v2740_v8 = vmax.f32 %v2724_v3, 0.0  ;;  %v5351_v47 = vpop.f32.mrb[20].mxu0 }
 0x6df   : > { %3007 = vst.msk [vmem:[#allocation2 + $0xa] sm:$0xff] %vm1377_vm6, %v6338_v6  ;;  %v2959_v50 = vadd.f32 %v2943_v63, %v2741_v7  ;;  %v2727_v10 = vadd.f32 %v5351_v47, %v6323_v39  ;;  %3040 = vrot.lane.b32.xlu1 %v6338_v6, %s7023_s27  ;;  %v2657_v49 = vpop.f32.mrb[21].mxu0 }
 0x6e0   : > { %3006 = vst.msk [vmem:[#allocation2 + $0x2] sm:$0xff] %vm1377_vm6, %v6340_v48  ;;  %v2958_v12 = vadd.f32 %v2942_v4, %v2740_v8  ;;  %v2726_v23 = vadd.f32 %v6323_v39, %v2657_v49  ;;  %3038 = vrot.lane.b32.xlu0 %v6340_v48, %s7023_s27 }
 0x6e1   : > { %v6356_v28 = vmax.f32 %v2959_v50, 0.0  ;;  %v2743_v25 = vmax.f32 %v2727_v10, 0.0 }
 0x6e2   : > { %v6358_v1 = vmax.f32 %v2958_v12, 0.0  ;;  %v2742_v29 = vmax.f32 %v2726_v23, 0.0  ;;  %v5354_v30 = vpop.f32.mrb[22].mxu0 }
 0x6e3   : > { %3009 = vst.msk [vmem:[#allocation2 + $0x22] sm:$0xff] %vm1377_vm6, %v6356_v28  ;;  %v2961_v31 = vadd.f32 %v2945_v11, %v2743_v25  ;;  %v2729_v26 = vadd.f32 %v5354_v30, %v6323_v39  ;;  %3044 = vrot.lane.b32.xlu1 %v6356_v28, %s7023_s27  ;;  %v2667_v15 = vpop.f32.mrb[23].mxu0 }
 0x6e4   : > { %3008 = vst.msk [vmem:[#allocation2 + $0x1a] sm:$0xff] %vm1377_vm6, %v6358_v1  ;;  %v2960_v52 = vadd.f32 %v2944_v24, %v2742_v29  ;;  %v2728_v18 = vadd.f32 %v6323_v39, %v2667_v15  ;;  %3042 = vrot.lane.b32.xlu0 %v6358_v1, %s7023_s27 }
 0x6e5   : > { %v6374_v33 = vmax.f32 %v2961_v31, 0.0  ;;  %v2745_v19 = vmax.f32 %v2729_v26, 0.0 }
 0x6e6   : > { %v6376_v16 = vmax.f32 %v2960_v52, 0.0  ;;  %v2744_v20 = vmax.f32 %v2728_v18, 0.0  ;;  %v2951_v18 = vadd.f32 %v5386_v36, %v6325_v40  ;;  %v2952_v36 = vadd.f32 %v6325_v40, %v6400_v41 }
 0x6e7   : > { %3011 = vst.msk [vmem:[#allocation2 + $0x3a] sm:$0xff] %vm1377_vm6, %v6374_v33  ;;  %v2963_v21 = vadd.f32 %v2947_v51, %v2745_v19  ;;  %3048 = vrot.lane.b32.xlu1 %v6374_v33, %s7023_s27  ;;  %v5357_v46 = vpop.f32.mrb[24].mxu0  ;;  %v2950_v19 = vadd.f32 %v6325_v40, %v2905_v37 }
 0x6e8   : > { %3010 = vst.msk [vmem:[#allocation2 + $0x32] sm:$0xff] %vm1377_vm6, %v6376_v16  ;;  %v2962_v17 = vadd.f32 %v2946_v32, %v2744_v20  ;;  %3046 = vrot.lane.b32.xlu0 %v6376_v16, %s7023_s27  ;;  %v2731_v53 = vadd.f32 %v5357_v46, %v6323_v39  ;;  %v2677_v54 = vpop.f32.mrb[25].mxu0 }
 0x6e9   : > { %v6386_v27 = vmax.f32 %v2963_v21, 0.0  ;;  %v2730_v56 = vadd.f32 %v6323_v39, %v2677_v54 }
 0x6ea   : > { %v6388_v35 = vmax.f32 %v2962_v17, 0.0  ;;  %v2747_v59 = vmax.f32 %v2731_v53, 0.0  ;;  %v2953_v53 = vadd.f32 %v6398_v38, %v6325_v40 }
 0x6eb   : > { %3013 = vst.msk [vmem:[#allocation2 + $0x52] sm:$0xff] %vm1377_vm6, %v6386_v27  ;;  %3052 = vrot.lane.b32.xlu1 %v6386_v27, %s7023_s27  ;;  %v2746_v60 = vmax.f32 %v2730_v56, 0.0  ;;  %v5360_v51 = vpop.f32.mrb[26].mxu0 }
 0x6ec   : > { %3012 = vst.msk [vmem:[#allocation2 + $0x4a] sm:$0xff] %vm1377_vm6, %v6388_v35  ;;  %3050 = vrot.lane.b32.xlu0 %v6388_v35, %s7023_s27  ;;  %v2965_v61 = vadd.f32 %v2949_v55, %v2747_v59  ;;  %v2733_v15 = vadd.f32 %v5360_v51, %v6323_v39  ;;  %v2687_v52 = vpop.f32.mrb[27].mxu0 }
 0x6ed   : > { %v2964_v63 = vadd.f32 %v2948_v57, %v2746_v60  ;;  %v2732_v32 = vadd.f32 %v6323_v39, %v2687_v52 }
 0x6ee   : > { %v6410_v2 = vmax.f32 %v2965_v61, 0.0  ;;  %v2749_v20 = vmax.f32 %v2733_v15, 0.0 }
 0x6ef   : > { %v6412_v4 = vmax.f32 %v2964_v63, 0.0  ;;  %v2748_v21 = vmax.f32 %v2732_v32, 0.0  ;;  %v5363_v17 = vpop.f32.mrb[28].mxu0 }
 0x6f0   : > { %3015 = vst.msk [vmem:[#allocation2 + $0x6a] sm:$0xff] %vm1377_vm6, %v6410_v2  ;;  %v2967_v22 = vadd.f32 %v2951_v18, %v2749_v20  ;;  %v2735_v34 = vadd.f32 %v5363_v17, %v6323_v39  ;;  %v2697_v46 = vpop.f32.mrb[29].mxu0 }
 0x6f1   : > { %3014 = vst.msk [vmem:[#allocation2 + $0x62] sm:$0xff] %vm1377_vm6, %v6412_v4  ;;  %v2966_v54 = vadd.f32 %v2950_v19, %v2748_v21  ;;  %v2734_v55 = vadd.f32 %v6323_v39, %v2697_v46 }
 0x6f2   : > { %v6452_v56 = vmax.f32 %v2967_v22, 0.0  ;;  %v2751_v57 = vmax.f32 %v2735_v34, 0.0  ;;  %v1934_v22 = vlaneseq }
 0x6f3   : > { %v6454_v37 = vmax.f32 %v2966_v54, 0.0  ;;  %v2750_v59 = vmax.f32 %v2734_v55, 0.0  ;;  %v5366_v60 = vpop.f32.mrb[30].mxu0 }
 0x6f4   : > { %3017 = vst.msk [vmem:[#allocation2 + $0x82] sm:$0xff] %vm1377_vm6, %v6452_v56  ;;  %v2969_v61 = vadd.f32 %v2953_v53, %v2751_v57  ;;  %v2737_v63 = vadd.f32 %v5366_v60, %v6323_v39  ;;  %v2707_v38 = vpop.f32.mrb[31].mxu0  ;;  %v6514_v57 = vshrl.u32 %v1934_v22, 7 }
 0x6f5   : > { %3016 = vst.msk [vmem:[#allocation2 + $0x7a] sm:$0xff] %vm1377_vm6, %v6454_v37  ;;  %v2968_v41 = vadd.f32 %v2952_v36, %v2750_v59  ;;  %v2036_v59 = vld [vmem:[%s6506_s9 + $0x1] sm:$0x1] }
 0x6f6   : > { %vm3789_vm9 = vcmp.gt.s32.totalorder %v2036_v59, 0 }
 0x751   : > { %v3041_v3 = vpop.permute.xlu1 %3040 }
 0x752   : > { %3087 = vst.msk [vmem:[#allocation2 + $0x8] sm:$0xff] %vm1398_vm7, %v3041_v3  ;;  %v3039_v7 = vpop.permute.xlu0 %3038  ;;  %v2955_v3 = vadd.f32 %v6402_v43, %v6325_v40 }
 0x753   : > { %3086 = vst.msk [vmem:[#allocation2] sm:$0xff] %vm1398_vm7, %v3039_v7  ;;  %v2736_v7 = vadd.f32 %v6323_v39, %v2707_v38 }
 0x755   : > { %v3045_v8 = vpop.permute.xlu1 %3044 }
 0x756   : > { %3089 = vst.msk [vmem:[#allocation2 + $0x20] sm:$0xff] %vm1398_vm7, %v3045_v8  ;;  %v3043_v47 = vpop.permute.xlu0 %3042  ;;  %v2954_v8 = vadd.f32 %v6325_v40, %v6404_v45  ;;  %v5633_v40 = vmov 0   ;;  %v2993_v45 = vld [vmem:[%s1195_s6] sm:$0xff] }
 0x757   : > { %3088 = vst.msk [vmem:[#allocation2 + $0x18] sm:$0xff] %vm1398_vm7, %v3043_v47  ;;  %v6466_v47 = vmax.f32 %v2969_v61, 0.0  ;;  %5559 = vset.pattern.permute.xlu1 %v5633_v40  ;;  %5553 = vset.pattern.permute.xlu0 %v5633_v40 }
 0x759   : > { %v3049_v50 = vpop.permute.xlu1 %3048  ;;  %v3103_v49 = vld [vmem:[#allocation2 + $0x8] sm:$0xff]  ;;  %3019 = vst.msk [vmem:[#allocation2 + $0x9a] sm:$0xff] %vm1377_vm6, %v6466_v47 }
 0x75a   : > { %3091 = vst.msk [vmem:[#allocation2 + $0x38] sm:$0xff] %vm1398_vm7, %v3049_v50  ;;  %v3047_v10 = vpop.permute.xlu0 %3046  ;;  %v3102_v11 = vld [vmem:[#allocation2] sm:$0xff]  ;;  %v2753_v50 = vmax.f32 %v2737_v63, 0.0 }
 0x75b   : > { %3090 = vst.msk [vmem:[#allocation2 + $0x30] sm:$0xff] %vm1398_vm7, %v3047_v10  ;;  %5401 = vmatprep.mubr.msk.f32.mxu0 %vm1407_vm8, %v3102_v11  ;;  %v6468_v10 = vmax.f32 %v2968_v41, 0.0  ;;  %v2752_v11 = vmax.f32 %v2736_v7, 0.0  ;;  %v6525_v7 = vsub.s32 0, %v6514_v57 }
 0x75c   : > { %3349 = vst.msk [vmem:[#allocation2] sm:$0x3] %vm1374_vm4, %v5630_v0  ;;  %5402 = vmatmul.mubr.msk.f32.vlgmr.msra.gmra.mrb[32].mxu0 %vm1407_vm8, %v3103_v49  ;;  %v2971_v43 = vadd.f32 %v2955_v3, %v2753_v50  ;;  %v2037_v50 = vld [vmem:[%s6506_s9 + $0x2] sm:$0x1] }
 0x75d   : > { %v3053_v12 = vpop.permute.xlu1 %3052  ;;  %v3105_v25 = vld [vmem:[#allocation2 + $0x20] sm:$0xff]  ;;  %3018 = vst.msk [vmem:[#allocation2 + $0x92] sm:$0xff] %vm1377_vm6, %v6468_v10  ;;  %v2970_v49 = vadd.f32 %v2954_v8, %v2752_v11  ;;  %v5067_v8 = vadd.s32 4294967295, %v2036_v59  ;;  %vm3790_vm10 = vcmp.gt.s32.totalorder %v2037_v50, 0 }
 0x75e   : > { %3093 = vst.msk [vmem:[#allocation2 + $0x50] sm:$0xff] %vm1398_vm7, %v3053_v12  ;;  %v3051_v23 = vpop.permute.xlu0 %3050  ;;  %v3104_v24 = vld [vmem:[#allocation2 + $0x18] sm:$0xff]  ;;  %v6474_v12 = vmax.f32 %v2971_v43, 0.0 }
 0x75f   : > { %3092 = vst.msk [vmem:[#allocation2 + $0x48] sm:$0xff] %vm1398_vm7, %v3051_v23  ;;  %5404 = vmatprep.mubr.msk.f32.mxu0 %vm1407_vm8, %v3104_v24  ;;  %v6476_v39 = vmax.f32 %v2970_v49, 0.0  ;;  %v2994_v23 = vld [vmem:[%s1195_s6 + $0x8] sm:$0xff]  ;;  %v2995_v24 = vld [vmem:[%s1195_s6 + $0x10] sm:$0xff]  ;;  %v3797_v49 = vsel %vm3789_vm9, 1, %v5633_v40 }
 0x760   : > { %3350 = vst.msk [vmem:[#allocation2 + $0x18] sm:$0x3] %vm1374_vm4, %v5630_v0  ;;  %5405 = vmatmul.mubr.msk.f32.gmra.mrb[34].mxu0 %vm1407_vm8, %v3105_v25  ;;  %v5521_v25 = vpack.c.bf16 %v2994_v23, %v2993_v45  ;;  %v3747_v45 = vrot.slane %v5067_v8, %v6525_v7 }
 0x761   : > { %v3107_v30 = vld [vmem:[#allocation2 + $0x38] sm:$0xff]  ;;  %3021 = vst.msk [vmem:[#allocation2 + $0xb2] sm:$0xff] %vm1377_vm6, %v6474_v12  ;;  %3020 = vst.msk [vmem:[#allocation2 + $0xaa] sm:$0xff] %vm1377_vm6, %v6476_v39 }
 0x762   : > { %v3106_v29 = vld [vmem:[#allocation2 + $0x30] sm:$0xff]  ;;  %5522 = vmatprep.subr.bf16.mxu1 %v5521_v25  ;;  %vm3774_vm12 = vcmp.eq.s32.totalorder %v6514_v57, %v3747_v45 }
 0x763   : > { %5407 = vmatprep.mubr.msk.f32.mxu0 %vm1407_vm8, %v3106_v29  ;;  %3351 = vst.msk [vmem:[#allocation2 + $0x30] sm:$0x3] %vm1374_vm4, %v5630_v0  ;;  %v2996_v29 = vld [vmem:[%s1195_s6 + $0x18] sm:$0xff]  ;;  %5524 = vmatpush3.bf16.msra.mxu1 %v5521_v25  ;;  %s7028_s6 = sld [smem:[#allocation6_spill]]  ;;  %v5068_v25 = vadd.s32 4294967295, %v2037_v50 }
 0x764   : > { %5408 = vmatmul.mubr.msk.f32.gmra.mrb[36].mxu0 %vm1407_vm8, %v3107_v30  ;;  %v5525_v30 = vpack.c.bf16 %v2996_v29, %v2995_v24  ;;  %v3811_v24 = vrot.slane %v3797_v49, %v6525_v7  ;;  %v6542_v29 = vadd.s32 8, %v6514_v57 }
 0x765   : > { %v3109_v26 = vld [vmem:[#allocation2 + $0x50] sm:$0xff] }
 0x766   : > { %v3108_v31 = vld [vmem:[#allocation2 + $0x48] sm:$0xff]  ;;  %5526 = vmatprep.subr.bf16.mxu1 %v5525_v30  ;;  %vm3837_vm13 = vcmp.eq.s32.totalorder %v3811_v24, 1  ;;  %vm3775_vm14 = vcmp.eq.s32.totalorder %v6542_v29, %v3747_v45 }
 0x767   : > { %5410 = vmatprep.mubr.msk.f32.mxu0 %vm1407_vm8, %v3108_v31  ;;  %3352 = vst.msk [vmem:[#allocation2 + $0x48] sm:$0x3] %vm1374_vm4, %v5630_v0  ;;  %5528 = vmatpush3.bf16.msra.mxu1 %v5525_v30  ;;  %v6492_v31 = vld [vmem:[%s1190_s8] ss:$0 sm:$0xff]  ;;  %v3798_v30 = vsel %vm3790_vm10, 1, %v5633_v40  ;;  %vm3846_vm15 = vmand %vm3774_vm12, %vm3837_vm13 }
 0x768   : > { %5411 = vmatmul.mubr.msk.f32.gmra.mrb[38].mxu0 %vm1407_vm8, %v3109_v26  ;;  %vm3847_vm0 = vmand %vm3775_vm14, %vm3837_vm13 }
 0x769   : > { %s6531_s0 = scalar_lea.vmem %s7028_s6, %s4922_s28  ;;  %s1198_s28 = scalar_lea.vmem %s6989_s23, %s7058_s3 }
 0x76a   : > { %v1218_v23 = vld [vmem:[%s6531_s0] sm:$0x1] }
 0x76b   : > { %vm1951_vm11 = vcmp.gt.s32.totalorder %v1218_v23, 0 }
 0x82f   : > { %v5403_v26 = vpop.f32.mrb[32].mxu0 }
 0x830   : > { %v3318_v51 = vadd.f32 %v5403_v26, %v6492_v31  ;;  %v3232_v15 = vpop.f32.mrb[33].mxu0  ;;  %v3751_v26 = vrot.slane %v5068_v25, %v6525_v7 }
 0x831   : > { %v3317_v52 = vadd.f32 %v6492_v31, %v3232_v15  ;;  %v4974_v15 = vadd.s32 4294967295, %v1218_v23 }
 0x832   : > { %v3334_v18 = vmax.f32 %v3318_v51, 0.0  ;;  %v3815_v51 = vrot.slane %v3798_v30, %v6525_v7  ;;  %vm3776_vm1 = vcmp.eq.s32.totalorder %v6514_v57, %v3751_v26  ;;  %vm3777_vm5 = vcmp.eq.s32.totalorder %v6542_v29, %v3751_v26 }
 0x833   : > { %v3333_v32 = vmax.f32 %v3317_v52, 0.0  ;;  %v5406_v19 = vpop.f32.mrb[34].mxu0  ;;  %v1953_v52 = vsel %vm1951_vm11, 1, %v5633_v40 }
 0x834   : > { %3358 = vst.msk [vmem:[#allocation2 + $0xa] sm:$0xff] %vm1377_vm6, %v3334_v18  ;;  %v3320_v20 = vadd.f32 %v5406_v19, %v6492_v31  ;;  %3391 = vrot.lane.b32.xlu1 %v3334_v18, %s7023_s27  ;;  %v3242_v21 = vpop.f32.mrb[35].mxu0  ;;  %vm3838_vm2 = vcmp.eq.s32.totalorder %v3815_v51, 1  ;;  %v1942_v18 = vrot.slane %v4974_v15, %v6525_v7  ;;  %v5076_v19 = vsel %vm3846_vm15, 1.0, %v5630_v0 }
 0x835   : > { %3357 = vst.msk [vmem:[#allocation2 + $0x2] sm:$0xff] %vm1377_vm6, %v3333_v32  ;;  %v3319_v17 = vadd.f32 %v6492_v31, %v3242_v21  ;;  %3389 = vrot.lane.b32.xlu0 %v3333_v32, %s7023_s27  ;;  %v1958_v32 = vrot.slane %v1953_v52, %v6525_v7  ;;  %vm3848_vm9 = vmand %vm3776_vm1, %vm3838_vm2 }
 0x836   : > { %v3336_v34 = vmax.f32 %v3320_v20, 0.0  ;;  %v5077_v20 = vsel %vm3847_vm0, 1.0, %v5630_v0  ;;  %vm3849_vm10 = vmand %vm3777_vm5, %vm3838_vm2  ;;  %vm1947_vm11 = vcmp.eq.s32.totalorder %v6514_v57, %v1942_v18  ;;  %vm1948_vm13 = vcmp.eq.s32.totalorder %v6542_v29, %v1942_v18 }
 0x837   : > { %v3335_v46 = vmax.f32 %v3319_v17, 0.0  ;;  %v5409_v53 = vpop.f32.mrb[36].mxu0  ;;  %vm1963_vm12 = vcmp.eq.s32.totalorder %v1958_v32, 1  ;;  %v5560_v21 = vpack.i.bf16 %v5077_v20, %v5076_v19  ;;  %v5078_v17 = vsel %vm3848_vm9, 1.0, %v5630_v0 }
 0x838   : > { %3360 = vst.msk [vmem:[#allocation2 + $0x22] sm:$0xff] %vm1377_vm6, %v3336_v34  ;;  %v3322_v54 = vadd.f32 %v5409_v53, %v6492_v31  ;;  %3395 = vrot.lane.b32.xlu1 %v3336_v34, %s7023_s27  ;;  %v3252_v55 = vpop.f32.mrb[37].mxu0  ;;  %v5079_v22 = vsel %vm3849_vm10, 1.0, %v5630_v0  ;;  %vm1965_vm14 = vmand %vm1947_vm11, %vm1963_vm12 }
 0x839   : > { %3359 = vst.msk [vmem:[#allocation2 + $0x1a] sm:$0xff] %vm1377_vm6, %v3335_v46  ;;  %v3321_v36 = vadd.f32 %v6492_v31, %v3252_v55  ;;  %3393 = vrot.lane.b32.xlu0 %v3335_v46, %s7023_s27  ;;  %vm1966_vm15 = vmand %vm1948_vm13, %vm1963_vm12  ;;  %v5565_v34 = vpack.i.bf16 %v5079_v22, %v5078_v17  ;;  %v4976_v46 = vsel %vm1965_vm14, 1.0, %v5630_v0  ;;  %v2035_v55 = vld [vmem:[%s6506_s9] sm:$0x1] }
 0x83a   : > { %v3338_v60 = vmax.f32 %v3322_v54, 0.0  ;;  %v4977_v53 = vsel %vm1966_vm15, 1.0, %v5630_v0  ;;  %v5066_v59 = vadd.s32 4294967295, %v2035_v55  ;;  %vm3788_vm0 = vcmp.gt.s32.totalorder %v2035_v55, 0 }
 0x83b   : > { %v3337_v61 = vmax.f32 %v3321_v36, 0.0  ;;  %v5412_v63 = vpop.f32.mrb[38].mxu0  ;;  %v5575_v54 = vpack.i.bf16 %v4977_v53, %v4976_v46  ;;  %v2038_v36 = vld [vmem:[%s6506_s9 + $0x3] sm:$0x1] }
 0x83c   : > { %3362 = vst.msk [vmem:[#allocation2 + $0x3a] sm:$0xff] %vm1377_vm6, %v3338_v60  ;;  %v3324_v38 = vadd.f32 %v5412_v63, %v6492_v31  ;;  %3399 = vrot.lane.b32.xlu1 %v3338_v60, %s7023_s27  ;;  %v3262_v3 = vpop.f32.mrb[39].mxu0  ;;  %v5069_v60 = vadd.s32 4294967295, %v2038_v36  ;;  %vm3791_vm1 = vcmp.gt.s32.totalorder %v2038_v36, 0 }
 0x83d   : > { %3361 = vst.msk [vmem:[#allocation2 + $0x32] sm:$0xff] %vm1377_vm6, %v3337_v61  ;;  %v3323_v41 = vadd.f32 %v6492_v31, %v3262_v3  ;;  %3397 = vrot.lane.b32.xlu0 %v3337_v61, %s7023_s27  ;;  %v3796_v61 = vsel %vm3788_vm0, 1, %v5633_v40  ;;  %v3799_v63 = vsel %vm3791_vm1, 1, %v5633_v40  ;;  %vm7000_vm1 = vmmov 0  }
 0x83e   : > { %v3340_v11 = vmax.f32 %v3324_v38, 0.0  ;;  %v3743_v38 = vrot.slane %v5066_v59, %v6525_v7  ;;  %v3807_v3 = vrot.slane %v3796_v61, %v6525_v7  ;;  %v3819_v8 = vrot.slane %v3799_v63, %v6525_v7 }
 0x83f   : > { %v3339_v43 = vmax.f32 %v3323_v41, 0.0  ;;  %v3755_v41 = vrot.slane %v5069_v60, %v6525_v7 }
 0x840   : > { %3364 = vst.msk [vmem:[#allocation2 + $0x52] sm:$0xff] %vm1377_vm6, %v3340_v11  ;;  %3403 = vrot.lane.b32.xlu1 %v3340_v11, %s7023_s27  ;;  %vm3772_vm2 = vcmp.eq.s32.totalorder %v6514_v57, %v3743_v38  ;;  %vm3773_vm5 = vcmp.eq.s32.totalorder %v6542_v29, %v3743_v38  ;;  %vm3836_vm9 = vcmp.eq.s32.totalorder %v3807_v3, 1  ;;  %vm3839_vm13 = vcmp.eq.s32.totalorder %v3819_v8, 1 }
 0x841   : > { %3363 = vst.msk [vmem:[#allocation2 + $0x4a] sm:$0xff] %vm1377_vm6, %v3339_v43  ;;  %3401 = vrot.lane.b32.xlu0 %v3339_v43, %s7023_s27  ;;  %vm3778_vm10 = vcmp.eq.s32.totalorder %v6514_v57, %v3755_v41  ;;  %vm3844_vm11 = vmand %vm3772_vm2, %vm3836_vm9  ;;  %vm3779_vm12 = vcmp.eq.s32.totalorder %v6542_v29, %v3755_v41 }
 0x842   : > { %vm3845_vm14 = vmand %vm3773_vm5, %vm3836_vm9  ;;  %v5074_v50 = vsel %vm3844_vm11, 1.0, %v5630_v0 }
 0x843   : > { %v5075_v11 = vsel %vm3845_vm14, 1.0, %v5630_v0  ;;  %vm3850_vm15 = vmand %vm3778_vm10, %vm3839_vm13 }
 0x844   : > { %3056 = vrot.lane.b32.xlu1 %v6410_v2, %s7023_s27  ;;  %v5554_v43 = vpack.i.bf16 %v5075_v11, %v5074_v50  ;;  %vm3851_vm0 = vmand %vm3779_vm12, %vm3839_vm13  ;;  %v5080_v49 = vsel %vm3850_vm15, 1.0, %v5630_v0  ;;  %vm4066_vm13 = vcmask 1041409  }
 0x845   : > { %3054 = vrot.lane.b32.xlu0 %v6412_v4, %s7023_s27  ;;  %v5081_v45 = vsel %vm3851_vm0, 1.0, %v5630_v0  ;;  %vm7002_vm0 = vcmask 1042434  }
 0x846   : > { %v5570_v23 = vpack.i.bf16 %v5081_v45, %v5080_v49  ;;  %v5621_v45 = vld [vmem:[%s6149_s4] ss:$0 sm:$0xff]  ;;  %s5108_s4 = sshll.u32 %s7058_s3, 4 }
 0x847   : > { %s1203_s10 = scalar_lea.vmem %s6990_s24, %s5108_s4  ;;  %s1208_s30 = scalar_lea.vmem %s6991_s25, %s5108_s4 }
 0x848   : > { %3060 = vrot.lane.b32.xlu1 %v6452_v56, %s7023_s27 }
 0x849   : > { %3058 = vrot.lane.b32.xlu0 %v6454_v37, %s7023_s27 }
 0x84c   : > { %3064 = vrot.lane.b32.xlu1 %v6466_v47, %s7023_s27 }
 0x84d   : > { %3062 = vrot.lane.b32.xlu0 %v6468_v10, %s7023_s27 }
 0x850   : > { %3068 = vrot.lane.b32.xlu1 %v6474_v12, %s7023_s27 }
 0x851   : > { %3066 = vrot.lane.b32.xlu0 %v6476_v39, %s7023_s27 }
 0x854   : > { %5561 = vperm.xlu1 %5559, %v5560_v21  }
 0x855   : > { %5555 = vperm.xlu0 %5553, %v5554_v43  }
 0x858   : > { %5566 = vperm.xlu1 %5559, %v5565_v34  }
 0x859   : > { %5571 = vperm.xlu0 %5553, %v5570_v23   ;;  %v1919_v23 = vadd.f32 %v5621_v45, %v6136_v42 }
 0x85c   : > { %5576 = vperm.xlu1 %5559, %v5575_v54  }
 0x8a6   : > { %v3392_v24 = vpop.permute.xlu1 %3391 }
 0x8a7   : > { %3438 = vst.msk [vmem:[#allocation2 + $0x8] sm:$0xff] %vm1398_vm7, %v3392_v24  ;;  %v3390_v25 = vpop.permute.xlu0 %3389  ;;  %v1918_v24 = vadd.f32 %v5621_v45, %v6151_v44 }
 0x8a8   : > { %3437 = vst.msk [vmem:[#allocation2] sm:$0xff] %vm1398_vm7, %v3390_v25 }
 0x8aa   : > { %v3396_v30 = vpop.permute.xlu1 %3395 }
 0x8ab   : > { %3440 = vst.msk [vmem:[#allocation2 + $0x20] sm:$0xff] %vm1398_vm7, %v3396_v30  ;;  %v3394_v26 = vpop.permute.xlu0 %3393  ;;  %v1923_v30 = vmax.f32 %v1919_v23, 0.0 }
 0x8ac   : > { %3439 = vst.msk [vmem:[#allocation2 + $0x18] sm:$0xff] %vm1398_vm7, %v3394_v26  ;;  %v1922_v26 = vmax.f32 %v1918_v24, 0.0 }
 0x8ae   : > { %v3400_v51 = vpop.permute.xlu1 %3399  ;;  %v3454_v18 = vld [vmem:[#allocation2 + $0x8] sm:$0xff] }
 0x8af   : > { %3442 = vst.msk [vmem:[#allocation2 + $0x38] sm:$0xff] %vm1398_vm7, %v3400_v51  ;;  %v3398_v15 = vpop.permute.xlu0 %3397  ;;  %v3453_v52 = vld [vmem:[#allocation2] sm:$0xff] }
 0x8b0   : > { %3441 = vst.msk [vmem:[#allocation2 + $0x30] sm:$0xff] %vm1398_vm7, %v3398_v15  ;;  %5433 = vmatprep.mubr.msk.f32.mxu1 %vm1407_vm8, %v3453_v52  ;;  %v1927_v15 = vadd.f32 %v1923_v30, %v5903_v5  ;;  %v1926_v52 = vadd.f32 %v1922_v26, %v5905_v9  ;;  %v2040_v30 = vld [vmem:[%s6506_s9 + $0x5] sm:$0x1] }
 0x8b1   : > { %5434 = vmatmul.mubr.msk.f32.vlgmr.msra.gmra.mrb[36].mxu1 %vm1407_vm8, %v3454_v18  ;;  %vm3793_vm5 = vcmp.gt.s32.totalorder %v2040_v30, 0 }
 0x8b2   : > { %v3404_v32 = vpop.permute.xlu1 %3403  ;;  %v3456_v21 = vld [vmem:[#allocation2 + $0x20] sm:$0xff] }
 0x8b3   : > { %3444 = vst.msk [vmem:[#allocation2 + $0x50] sm:$0xff] %vm1398_vm7, %v3404_v32  ;;  %v3402_v19 = vpop.permute.xlu0 %3401  ;;  %v3455_v20 = vld [vmem:[#allocation2 + $0x18] sm:$0xff]  ;;  %v1931_v32 = vmax.f32 %v1927_v15, 0.0 }
 0x8b4   : > { %3443 = vst.msk [vmem:[#allocation2 + $0x48] sm:$0xff] %vm1398_vm7, %v3402_v19  ;;  %5436 = vmatprep.mubr.msk.f32.mxu1 %vm1407_vm8, %v3455_v20  ;;  %v1930_v19 = vmax.f32 %v1926_v52, 0.0 }
 0x8b5   : > { %5437 = vmatmul.mubr.msk.f32.gmra.mrb[38].mxu1 %vm1407_vm8, %v3456_v21 }
 0x8b6   : > { %v3057_v17 = vpop.permute.xlu1 %3056  ;;  %v3458_v46 = vld [vmem:[#allocation2 + $0x38] sm:$0xff] }
 0x8b7   : > { %3095 = vst.msk [vmem:[#allocation2 + $0x68] sm:$0xff] %vm1398_vm7, %v3057_v17  ;;  %v3055_v22 = vpop.permute.xlu0 %3054  ;;  %v3457_v34 = vld [vmem:[#allocation2 + $0x30] sm:$0xff] }
 0x8b8   : > { %3094 = vst.msk [vmem:[#allocation2 + $0x60] sm:$0xff] %vm1398_vm7, %v3055_v22  ;;  %5439 = vmatprep.mubr.msk.f32.mxu1 %vm1407_vm8, %v3457_v34 }
 0x8b9   : > { %5440 = vmatmul.mubr.msk.f32.gmra.mrb[40].mxu1 %vm1407_vm8, %v3458_v46 }
 0x8ba   : > { %v3061_v53 = vpop.permute.xlu1 %3060  ;;  %v3460_v36 = vld [vmem:[#allocation2 + $0x50] sm:$0xff] }
 0x8bb   : > { %3097 = vst.msk [vmem:[#allocation2 + $0x80] sm:$0xff] %vm1398_vm7, %v3061_v53  ;;  %v3059_v54 = vpop.permute.xlu0 %3058  ;;  %v3459_v55 = vld [vmem:[#allocation2 + $0x48] sm:$0xff] }
 0x8bc   : > { %3096 = vst.msk [vmem:[#allocation2 + $0x78] sm:$0xff] %vm1398_vm7, %v3059_v54  ;;  %5442 = vmatprep.mubr.msk.f32.mxu1 %vm1407_vm8, %v3459_v55 }
 0x8bd   : > { %5443 = vmatmul.mubr.msk.f32.gmra.mrb[42].mxu1 %vm1407_vm8, %v3460_v36  ;;  %v5634_v36 = vmov 0.0|0.0  }
 0x8be   : > { %v3065_v59 = vpop.permute.xlu1 %3064  ;;  %v3111_v63 = vld [vmem:[#allocation2 + $0x68] sm:$0xff]  ;;  %5529 = vmatprep.subr.bf16.mxu0 %v5634_v36 }
 0x8bf   : > { %3099 = vst.msk [vmem:[#allocation2 + $0x98] sm:$0xff] %vm1398_vm7, %v3065_v59  ;;  %v3063_v60 = vpop.permute.xlu0 %3062  ;;  %v3110_v61 = vld [vmem:[#allocation2 + $0x60] sm:$0xff] }
 0x8c0   : > { %3098 = vst.msk [vmem:[#allocation2 + $0x90] sm:$0xff] %vm1398_vm7, %v3063_v60  ;;  %5413 = vmatprep.mubr.msk.f32.mxu0 %vm1407_vm8, %v3110_v61  ;;  %v4085_v59 = vld [vmem:[%s1203_s10] sm:$0xff]  ;;  %v4086_v60 = vld [vmem:[%s1203_s10 + $0x8] sm:$0xff] }
 0x8c1   : > { %3353 = vst.msk [vmem:[#allocation2 + $0x60] sm:$0x3] %vm1374_vm4, %v5630_v0  ;;  %5414 = vmatmul.mubr.msk.f32.gmra.mrb[40].mxu0 %vm1407_vm8, %v3111_v63  ;;  %v6653_v61 = vpack.c.bf16 %v4086_v60, %v4085_v59  ;;  %v6662_v63 = vld [vmem:[%s1198_s28] ss:$0 sm:$0xff] }
 0x8c2   : > { %v3069_v38 = vpop.permute.xlu1 %3068  ;;  %v3113_v8 = vld [vmem:[#allocation2 + $0x80] sm:$0xff] }
 0x8c3   : > { %3101 = vst.msk [vmem:[#allocation2 + $0xb0] sm:$0xff] %vm1398_vm7, %v3069_v38  ;;  %v3067_v3 = vpop.permute.xlu0 %3066  ;;  %v3112_v41 = vld [vmem:[#allocation2 + $0x78] sm:$0xff]  ;;  %5531 = vmatpush3.bf16.msra.mxu0 %v6653_v61 }
 0x8c4   : > { %3100 = vst.msk [vmem:[#allocation2 + $0xa8] sm:$0xff] %vm1398_vm7, %v3067_v3  ;;  %5416 = vmatprep.mubr.msk.f32.mxu0 %vm1407_vm8, %v3112_v41 }
 0x8c5   : > { %3354 = vst.msk [vmem:[#allocation2 + $0x78] sm:$0x3] %vm1374_vm4, %v5630_v0  ;;  %5417 = vmatmul.mubr.msk.f32.gmra.mrb[42].mxu0 %vm1407_vm8, %v3113_v8 }
 0x8c6   : > { %v3115_v11 = vld [vmem:[#allocation2 + $0x98] sm:$0xff] }
 0x8c7   : > { %v3114_v50 = vld [vmem:[#allocation2 + $0x90] sm:$0xff] }
 0x8c8   : > { %5419 = vmatprep.mubr.msk.f32.mxu0 %vm1407_vm8, %v3114_v50  ;;  %3355 = vst.msk [vmem:[#allocation2 + $0x90] sm:$0x3] %vm1374_vm4, %v5630_v0  ;;  %v2039_v50 = vld [vmem:[%s6506_s9 + $0x4] sm:$0x1] }
 0x8c9   : > { %5420 = vmatmul.mubr.msk.f32.gmra.mrb[44].mxu0 %vm1407_vm8, %v3115_v11  ;;  %vm3792_vm2 = vcmp.gt.s32.totalorder %v2039_v50, 0 }
 0x8ca   : > { %v3117_v49 = vld [vmem:[#allocation2 + $0xb0] sm:$0xff] }
 0x8cb   : > { %v3116_v43 = vld [vmem:[#allocation2 + $0xa8] sm:$0xff] }
 0x8cc   : > { %5422 = vmatprep.mubr.msk.f32.mxu0 %vm1407_vm8, %v3116_v43  ;;  %3356 = vst.msk [vmem:[#allocation2 + $0xa8] sm:$0x3] %vm1374_vm4, %v5630_v0  ;;  %vm7001_vm4 = vcmask 122880  }
 0x8cd   : > { %5423 = vmatmul.mubr.msk.f32.gmra.mrb[46].mxu0 %vm1407_vm8, %v3117_v49 }
 0x8ce   : > { %5461 = vmatprep.mubr.msk.f32.mxu0 %vm7000_vm1, %v5630_v0 }
 0x8d3   : > { %v6637_v25 = vpop.permute.xlu1 %5561 }
 0x8d4   : > { %v5556_v38 = vpop.permute.xlu0 %5555  ;;  %v5564_v43 = vunpack.i.h.bf16 %v6637_v25  ;;  %v5563_v49 = vunpack.i.l.bf16 %v6637_v25 }
 0x8d7   : > { %v6639_v51 = vpop.permute.xlu1 %5566 }
 0x8d8   : > { %v5569_v45 = vunpack.i.h.bf16 %v6639_v51  ;;  %v6670_v24 = vpop.permute.xlu0 %5571  ;;  %v5568_v26 = vunpack.i.l.bf16 %v6639_v51 }
 0x8db   : > { %v5577_v18 = vpop.permute.xlu1 %5576 }
 0x8dc   : > { %v5579_v20 = vunpack.i.h.bf16 %v5577_v18  ;;  %v5578_v21 = vunpack.i.l.bf16 %v5577_v18  ;;  %v5070_v18 = vadd.s32 4294967295, %v2039_v50 }
 0x8de   : > { %v1998_v17 = vmul.f32 %v5579_v20, %v1931_v32  ;;  %v1997_v42 = vmul.f32 %v5578_v21, %v1930_v19  ;;  %v5558_v21 = vunpack.i.h.bf16 %v5556_v38 }
 0x8e0   : > { %v2002_v44 = vsel %vm1377_vm6, %v1998_v17, 0.0  ;;  %v2001_v22 = vsel %vm1377_vm6, %v1997_v42, 0.0  ;;  %v5557_v17 = vunpack.i.l.bf16 %v5556_v38 }
 0x8e1   : > { %v2003_v34 = vadd.f32 %v2002_v44, %v2001_v22  ;;  %v5574_v44 = vunpack.i.h.bf16 %v6670_v24 }
 0x8e3   : > { %v2004_v46 = vrot.slane %v2003_v34, 4 }
 0x8e5   : > { %v2005_v53 = vadd.f32 %v2004_v46, %v2003_v34  ;;  %v3800_v46 = vsel %vm3792_vm2, 1, %v5633_v40 }
 0x8e7   : > { %v2006_v54 = vrot.slane %v2005_v53, 2 }
 0x8e9   : > { %v2007_v5 = vadd.f32 %v2006_v54, %v2005_v53  ;;  %v5071_v53 = vadd.s32 4294967295, %v2040_v30 }
 0x8eb   : > { %v2008_v9 = vrot.slane %v2007_v5, 1 }
 0x8ed   : > { %v2009_v55 = vadd.f32 %v2008_v9, %v2007_v5  ;;  %v5573_v9 = vunpack.i.l.bf16 %v6670_v24 }
 0x8ef   : > { %4061 = vst.msk [vmem:[#allocation3] sm:$0x1] %vm7001_vm4, %v2009_v55  ;;  %v6682_v55 = vrot.slane %v5070_v18, %v6525_v7  ;;  %vm4073_vm4 = vcmask 125952  }
 0x8f1   : > { %vm3780_vm9 = vcmp.eq.s32.totalorder %v6514_v57, %v6682_v55  ;;  %vm3781_vm11 = vcmp.eq.s32.totalorder %v6542_v29, %v6682_v55 }
 0x984   : > { %v5435_v3 = vpop.f32.mrb[36].mxu1 }
 0x985   : > { %v3669_v41 = vadd.f32 %v5435_v3, %v6662_v63  ;;  %v3583_v8 = vpop.f32.mrb[37].mxu1  ;;  %v6687_v3 = vsel %vm3793_vm5, 1, %v5633_v40 }
 0x986   : > { %v3668_v11 = vadd.f32 %v6662_v63, %v3583_v8 }
 0x987   : > { %v3685_v23 = vmax.f32 %v3669_v41, 0.0 }
 0x988   : > { %v3684_v15 = vmax.f32 %v3668_v11, 0.0  ;;  %v5438_v52 = vpop.f32.mrb[38].mxu1  ;;  %v3823_v11 = vrot.slane %v3800_v46, %v6525_v7 }
 0x989   : > { %v3701_v32 = vadd.f32 %v3685_v23, %v6338_v6  ;;  %v3671_v19 = vadd.f32 %v5438_v52, %v6662_v63  ;;  %v3593_v20 = vpop.f32.mrb[39].mxu1  ;;  %v2041_v52 = vld [vmem:[%s6506_s9 + $0x6] sm:$0x1] }
 0x98a   : > { %v3700_v25 = vadd.f32 %v3684_v15, %v6340_v48  ;;  %v3670_v42 = vadd.f32 %v6662_v63, %v3593_v20  ;;  %vm6707_vm10 = vcmp.eq.s32.totalorder %v3823_v11, 1  ;;  %vm3794_vm12 = vcmp.gt.s32.totalorder %v2041_v52, 0 }
 0x98b   : > { %v3717_v22 = vmax.f32 %v3701_v32, 0.0  ;;  %v3687_v34 = vmax.f32 %v3671_v19, 0.0  ;;  %vm6757_vm5 = vmand %vm3780_vm9, %vm6707_vm10 }
 0x98c   : > { %v3716_v54 = vmax.f32 %v3700_v25, 0.0  ;;  %v3686_v5 = vmax.f32 %v3670_v42, 0.0  ;;  %v5441_v6 = vpop.f32.mrb[40].mxu1  ;;  %vm6774_vm9 = vmand %vm3781_vm11, %vm6707_vm10 }
 0x98d   : > { %v3703_v48 = vadd.f32 %v3687_v34, %v6356_v28  ;;  %v3973_v59 = vmul.f32 %v5558_v21, %v3717_v22  ;;  %v3673_v60 = vadd.f32 %v5441_v6, %v6662_v63  ;;  %v3603_v38 = vpop.f32.mrb[41].mxu1  ;;  %v6694_v28 = vrot.slane %v5071_v53, %v6525_v7 }
 0x98e   : > { %v3702_v41 = vadd.f32 %v3686_v5, %v6358_v1  ;;  %v3972_v8 = vmul.f32 %v5557_v17, %v3716_v54  ;;  %v3672_v50 = vadd.f32 %v6662_v63, %v3603_v38  ;;  %v3827_v1 = vrot.slane %v6687_v3, %v6525_v7 }
 0x98f   : > { %v3719_v23 = vmax.f32 %v3703_v48, 0.0  ;;  %v3989_v30 = vsel %vm1377_vm6, %v3973_v59, 0.0  ;;  %v3689_v15 = vmax.f32 %v3673_v60, 0.0  ;;  %v5072_v54 = vadd.s32 4294967295, %v2041_v52 }
 0x990   : > { %v3718_v18 = vmax.f32 %v3702_v41, 0.0  ;;  %v3988_v32 = vsel %vm1377_vm6, %v3972_v8, 0.0  ;;  %v3688_v19 = vmax.f32 %v3672_v50, 0.0  ;;  %v5444_v20 = vpop.f32.mrb[42].mxu1  ;;  %vm3782_vm14 = vcmp.eq.s32.totalorder %v6514_v57, %v6694_v28 }
 0x991   : > { %v3975_v21 = vmul.f32 %v5564_v43, %v3719_v23  ;;  %v3990_v17 = vadd.f32 %v3989_v30, %v3988_v32  ;;  %v3705_v25 = vadd.f32 %v3689_v15, %v6374_v33  ;;  %v3675_v42 = vadd.f32 %v5444_v20, %v6662_v63  ;;  %v3613_v22 = vpop.f32.mrb[43].mxu1 }
 0x992   : > { %v3974_v34 = vmul.f32 %v5563_v49, %v3718_v18  ;;  %v3704_v46 = vadd.f32 %v3688_v19, %v6376_v16  ;;  %v3674_v53 = vadd.f32 %v6662_v63, %v3613_v22  ;;  %vm3783_vm15 = vcmp.eq.s32.totalorder %v6542_v29, %v6694_v28 }
 0x993   : > { %v3998_v5 = vsel %vm1377_vm6, %v3975_v21, 0.0  ;;  %v3991_v6 = vrot.slane %v3990_v17, 4  ;;  %v3721_v48 = vmax.f32 %v3705_v25, 0.0  ;;  %v3691_v59 = vmax.f32 %v3675_v42, 0.0 }
 0x994   : > { %v3997_v33 = vsel %vm1377_vm6, %v3974_v34, 0.0  ;;  %v3720_v49 = vmax.f32 %v3704_v46, 0.0  ;;  %v3690_v60 = vmax.f32 %v3674_v53, 0.0  ;;  %v5415_v16 = vpop.f32.mrb[40].mxu0 }
 0x995   : > { %v3999_v38 = vadd.f32 %v3998_v5, %v3997_v33  ;;  %v3992_v41 = vadd.f32 %v3991_v6, %v3990_v17  ;;  %v3977_v8 = vmul.f32 %v5569_v45, %v3721_v48  ;;  %v3707_v50 = vadd.f32 %v3691_v59, %v6386_v27  ;;  %v3272_v11 = vpop.f32.mrb[41].mxu0  ;;  %v2042_v6 = vld [vmem:[%s6506_s9 + $0x7] sm:$0x1] }
 0x996   : > { %v3976_v23 = vmul.f32 %v5568_v26, %v3720_v49  ;;  %v3706_v30 = vadd.f32 %v3690_v60, %v6388_v35  ;;  %v3326_v15 = vadd.f32 %v5415_v16, %v6492_v31  ;;  %v3325_v18 = vadd.f32 %v6492_v31, %v3272_v11 }
 0x997   : > { %v4000_v32 = vrot.slane %v3999_v38, 4  ;;  %v3993_v19 = vrot.slane %v3992_v41, 2  ;;  %v4007_v20 = vsel %vm1377_vm6, %v3977_v8, 0.0  ;;  %v3723_v21 = vmax.f32 %v3707_v50, 0.0 }
 0x998   : > { %v4006_v45 = vsel %vm1377_vm6, %v3976_v23, 0.0  ;;  %v3722_v17 = vmax.f32 %v3706_v30, 0.0  ;;  %v3342_v27 = vmax.f32 %v3326_v15, 0.0  ;;  %v3341_v25 = vmax.f32 %v3325_v18, 0.0  ;;  %v5418_v42 = vpop.f32.mrb[42].mxu0 }
 0x999   : > { %v4001_v35 = vadd.f32 %v4000_v32, %v3999_v38  ;;  %v3994_v51 = vadd.f32 %v3993_v19, %v3992_v41  ;;  %v4008_v26 = vadd.f32 %v4007_v20, %v4006_v45  ;;  %v3979_v22 = vmul.f32 %v5574_v44, %v3723_v21  ;;  %v3282_v34 = vpop.f32.mrb[43].mxu0 }
 0x99a   : > { %v3978_v46 = vmul.f32 %v5573_v9, %v3722_v17  ;;  %3366 = vst.msk [vmem:[#allocation2 + $0x6a] sm:$0xff] %vm1377_vm6, %v3342_v27  ;;  %3365 = vst.msk [vmem:[#allocation2 + $0x62] sm:$0xff] %vm1377_vm6, %v3341_v25  ;;  %v3328_v53 = vadd.f32 %v5418_v42, %v6492_v31  ;;  %3407 = vrot.lane.b32.xlu1 %v3342_v27, %s7023_s27  ;;  %v3327_v5 = vadd.f32 %v6492_v31, %v3282_v34 }
 0x99b   : > { %3405 = vrot.lane.b32.xlu0 %v3341_v25, %s7023_s27  ;;  %v3802_v44 = vsel %vm3794_vm12, 1, %v5633_v40  ;;  %v4002_v48 = vrot.slane %v4001_v35, 2  ;;  %v4009_v59 = vrot.slane %v4008_v26, 4  ;;  %v4016_v24 = vsel %vm1377_vm6, %v3979_v22, 0.0 }
 0x99c   : > { %v6743_v9 = vrot.slane %v5072_v54, %v6525_v7  ;;  %v3995_v33 = vrot.slane %v3994_v51, 1  ;;  %v4015_v49 = vsel %vm1377_vm6, %v3978_v46, 0.0  ;;  %v3344_v60 = vmax.f32 %v3328_v53, 0.0  ;;  %v5421_v38 = vpop.f32.mrb[44].mxu0 }
 0x99d   : > { %v3343_v16 = vmax.f32 %v3327_v5, 0.0  ;;  %v4003_v41 = vadd.f32 %v4002_v48, %v4001_v35  ;;  %v4010_v8 = vadd.f32 %v4009_v59, %v4008_v26  ;;  %v4017_v50 = vadd.f32 %v4016_v24, %v4015_v49  ;;  %v3292_v52 = vpop.f32.mrb[45].mxu0 }
 0x99e   : > { %vm3795_vm2 = vcmp.gt.s32.totalorder %v2042_v6, 0  ;;  %3368 = vst.msk [vmem:[#allocation2 + $0x82] sm:$0xff] %vm1377_vm6, %v3344_v60  ;;  %v3330_v11 = vadd.f32 %v5421_v38, %v6492_v31  ;;  %3411 = vrot.lane.b32.xlu1 %v3344_v60, %s7023_s27  ;;  %v3329_v54 = vadd.f32 %v6492_v31, %v3292_v52  ;;  %vm6764_vm12 = vcmp.eq.s32.totalorder %v3827_v1, 1 }
 0x99f   : > { %3367 = vst.msk [vmem:[#allocation2 + $0x7a] sm:$0xff] %vm1377_vm6, %v3343_v16  ;;  %3409 = vrot.lane.b32.xlu0 %v3343_v16, %s7023_s27  ;;  %v3831_v15 = vrot.slane %v3802_v44, %v6525_v7  ;;  %v4004_v18 = vrot.slane %v4003_v41, 1  ;;  %v4011_v32 = vrot.slane %v4010_v8, 2  ;;  %v4018_v19 = vrot.slane %v4017_v50, 4  ;;  %vm6800_vm11 = vmand %vm3782_vm14, %vm6764_vm12 }
 0x9a0   : > { %v5073_v21 = vadd.s32 4294967295, %v2042_v6  ;;  %v3996_v3 = vadd.f32 %v3995_v33, %v3994_v51  ;;  %v3346_v1 = vmax.f32 %v3330_v11, 0.0  ;;  %v3345_v45 = vmax.f32 %v3329_v54, 0.0  ;;  %v5424_v17 = vpop.f32.mrb[46].mxu0 }
 0x9a1   : > { %v3803_v27 = vsel %vm3795_vm2, 1, %v5633_v40  ;;  %v4005_v25 = vadd.f32 %v4004_v18, %v4003_v41  ;;  %v4012_v42 = vadd.f32 %v4011_v32, %v4010_v8  ;;  %v4019_v35 = vadd.f32 %v4018_v19, %v4017_v50  ;;  %v3302_v26 = vpop.f32.mrb[47].mxu0  ;;  %vm3855_vm2 = vmand %vm3783_vm15, %vm6764_vm12 }
 0x9a2   : > { %v3332_v43 = vadd.f32 %v5424_v17, %v6492_v31  ;;  %3370 = vst.msk [vmem:[#allocation2 + $0x9a] sm:$0xff] %vm1377_vm6, %v3346_v1  ;;  %3369 = vst.msk [vmem:[#allocation2 + $0x92] sm:$0xff] %vm1377_vm6, %v3345_v45  ;;  %3415 = vrot.lane.b32.xlu1 %v3346_v1, %s7023_s27  ;;  %v3331_v55 = vadd.f32 %v6492_v31, %v3302_v26  ;;  %v5082_v51 = vsel %vm6757_vm5, 1.0, %v5630_v0  ;;  %v5083_v22 = vsel %vm6774_vm9, 1.0, %v5630_v0 }
 0x9a3   : > { %3413 = vrot.lane.b32.xlu0 %v3345_v45, %s7023_s27  ;;  %vm3784_vm10 = vcmp.eq.s32.totalorder %v6514_v57, %v6743_v9  ;;  %v4067_v34 = vsel %vm4066_vm13, %v4005_v25, %v3996_v3  ;;  %v4013_v46 = vrot.slane %v4012_v42, 1  ;;  %v4020_v53 = vrot.slane %v4019_v35, 2 }
 0x9a4   : > { %v3348_v5 = vmax.f32 %v3332_v43, 0.0  ;;  %v3347_v44 = vmax.f32 %v3331_v55, 0.0  ;;  %vm6809_vm5 = vcmp.eq.s32.totalorder %v3831_v15, 1  ;;  %v3771_v48 = vrot.slane %v5073_v21, %v6525_v7 }
 0x9a5   : > { %v3835_v59 = vrot.slane %v3803_v27, %v6525_v7  ;;  %v4014_v24 = vadd.f32 %v4013_v46, %v4012_v42  ;;  %v4021_v33 = vadd.f32 %v4020_v53, %v4019_v35  ;;  %vm3785_vm14 = vcmp.eq.s32.totalorder %v6542_v29, %v6743_v9  ;;  %vm3856_vm15 = vmand %vm3784_vm10, %vm6809_vm5 }
 0x9a6   : > { %3372 = vst.msk [vmem:[#allocation2 + $0xb2] sm:$0xff] %vm1377_vm6, %v3348_v5  ;;  %3371 = vst.msk [vmem:[#allocation2 + $0xaa] sm:$0xff] %vm1377_vm6, %v3347_v44  ;;  %3419 = vrot.lane.b32.xlu1 %v3348_v5, %s7023_s27  ;;  %v5580_v28 = vpack.i.bf16 %v5083_v22, %v5082_v51  ;;  %v5084_v16 = vsel %vm6800_vm11, 1.0, %v5630_v0  ;;  %v5085_v38 = vsel %vm3855_vm2, 1.0, %v5630_v0  ;;  %vm4070_vm12 = vcmask 1043459  }
 0x9a7   : > { %3417 = vrot.lane.b32.xlu0 %v3347_v44, %s7023_s27  ;;  %v4069_v49 = vsel %vm7002_vm0, %v4014_v24, %v4067_v34  ;;  %v4022_v60 = vrot.slane %v4021_v33, 1  ;;  %vm3857_vm9 = vmand %vm3785_vm14, %vm6809_vm5  ;;  %vm3786_vm3 = vcmp.eq.s32.totalorder %v6514_v57, %v3771_v48  ;;  %vm3843_vm1 = vcmp.eq.s32.totalorder %v3835_v59, 1  ;;  %v1219_v51 = vld [vmem:[%s6531_s0 + $0x1] sm:$0x1]  ;;  %s6942_s0 = scalar_lea.vmem %s6992_s26, %s5798_s7 }
 0x9a8   : > { %vm3787_vm0 = vcmp.eq.s32.totalorder %v6542_v29, %v3771_v48  ;;  %v5585_v8 = vpack.i.bf16 %v5085_v38, %v5084_v16  ;;  %v5086_v52 = vsel %vm3856_vm15, 1.0, %v5630_v0  ;;  %v5087_v9 = vsel %vm3857_vm9, 1.0, %v5630_v0  ;;  %vm3858_vm10 = vmand %vm3786_vm3, %vm3843_vm1 }
 0x9a9   : > { %v4023_v41 = vadd.f32 %v4022_v60, %v4021_v33  ;;  %vm3859_vm11 = vmand %vm3787_vm0, %vm3843_vm1  ;;  %v5590_v11 = vpack.i.bf16 %v5087_v9, %v5086_v52  ;;  %v5088_v54 = vsel %vm3858_vm10, 1.0, %v5630_v0  ;;  %vm4164_vm3 = vcmask 61440  }
 0x9aa   : > { %5581 = vperm.xlu1 %5559, %v5580_v28   ;;  %v5089_v23 = vsel %vm3859_vm11, 1.0, %v5630_v0  ;;  %v4975_v5 = vadd.s32 4294967295, %v1219_v51  ;;  %vm7041_vm14 = vcmask 1042434   ;;  %vm4215_vm15 = vcmask 39936  }
 0x9ab   : > { %v4071_v50 = vsel %vm4070_vm12, %v4023_v41, %v4069_v49  ;;  %v5595_v30 = vpack.i.bf16 %v5089_v23, %v5088_v54 }
 0x9ac   : > { %4074 = vst.msk [vmem:[#allocation3 + $0x1] sm:$0xf] %vm4073_vm4, %v4071_v50  ;;  %v1946_v44 = vrot.slane %v4975_v5, %v6525_v7 }
 0x9ae   : > { %5586 = vperm.xlu1 %5559, %v5585_v8   ;;  %vm1950_vm0 = vcmp.eq.s32.totalorder %v6542_v29, %v1946_v44 }
 0x9b2   : > { %5591 = vperm.xlu1 %5559, %v5590_v11  }
 0x9b3   : > { %v6841_v15 = vld [vmem:[#allocation3] sm:$0x1f] }
 0x9b4   : > { %5462 = vmatmul.mubr.msk.f32.vlgmr.msra.gmra.mrb[48].mxu0 %vm1377_vm6, %v6841_v15 }
 0x9b6   : > { %5596 = vperm.xlu1 %5559, %v5595_v30  }
 0xa0c   : > { %v3408_v18 = vpop.permute.xlu1 %3407 }
 0xa0d   : > { %v3406_v32 = vpop.permute.xlu0 %3405  ;;  %3446 = vst.msk [vmem:[#allocation2 + $0x68] sm:$0xff] %vm1398_vm7, %v3408_v18 }
 0xa0e   : > { %3445 = vst.msk [vmem:[#allocation2 + $0x60] sm:$0xff] %vm1398_vm7, %v3406_v32 }
 0xa10   : > { %v3412_v19 = vpop.permute.xlu1 %3411 }
 0xa11   : > { %v3410_v20 = vpop.permute.xlu0 %3409  ;;  %3448 = vst.msk [vmem:[#allocation2 + $0x80] sm:$0xff] %vm1398_vm7, %v3412_v19 }
 0xa12   : > { %3447 = vst.msk [vmem:[#allocation2 + $0x78] sm:$0xff] %vm1398_vm7, %v3410_v20 }
 0xa14   : > { %v3416_v21 = vpop.permute.xlu1 %3415  ;;  %v3462_v45 = vld [vmem:[#allocation2 + $0x68] sm:$0xff] }
 0xa15   : > { %v3414_v3 = vpop.permute.xlu0 %3413  ;;  %v3461_v1 = vld [vmem:[#allocation2 + $0x60] sm:$0xff]  ;;  %3450 = vst.msk [vmem:[#allocation2 + $0x98] sm:$0xff] %vm1398_vm7, %v3416_v21 }
 0xa16   : > { %3449 = vst.msk [vmem:[#allocation2 + $0x90] sm:$0xff] %vm1398_vm7, %v3414_v3  ;;  %5445 = vmatprep.mubr.msk.f32.mxu1 %vm1407_vm8, %v3461_v1 }
 0xa17   : > { %5446 = vmatmul.mubr.msk.f32.gmra.mrb[44].mxu1 %vm1407_vm8, %v3462_v45 }
 0xa18   : > { %v3420_v17 = vpop.permute.xlu1 %3419  ;;  %v3464_v42 = vld [vmem:[#allocation2 + $0x80] sm:$0xff] }
 0xa19   : > { %v3418_v27 = vpop.permute.xlu0 %3417  ;;  %v3463_v25 = vld [vmem:[#allocation2 + $0x78] sm:$0xff]  ;;  %3452 = vst.msk [vmem:[#allocation2 + $0xb0] sm:$0xff] %vm1398_vm7, %v3420_v17 }
 0xa1a   : > { %3451 = vst.msk [vmem:[#allocation2 + $0xa8] sm:$0xff] %vm1398_vm7, %v3418_v27  ;;  %5448 = vmatprep.mubr.msk.f32.mxu1 %vm1407_vm8, %v3463_v25  ;;  %vm1952_vm7 = vcmp.gt.s32.totalorder %v1219_v51, 0 }
 0xa1b   : > { %5449 = vmatmul.mubr.msk.f32.gmra.mrb[46].mxu1 %vm1407_vm8, %v3464_v42  ;;  %v1954_v31 = vsel %vm1952_vm7, 1, %v5633_v40 }
 0xa1c   : > { %v3466_v43 = vld [vmem:[#allocation2 + $0x98] sm:$0xff]  ;;  %v1962_v6 = vrot.slane %v1954_v31, %v6525_v7 }
 0xa1d   : > { %v3465_v35 = vld [vmem:[#allocation2 + $0x90] sm:$0xff] }
 0xa1e   : > { %5451 = vmatprep.mubr.msk.f32.mxu1 %vm1407_vm8, %v3465_v35  ;;  %vm1964_vm1 = vcmp.eq.s32.totalorder %v1962_v6, 1 }
 0xa1f   : > { %5452 = vmatmul.mubr.msk.f32.gmra.mrb[48].mxu1 %vm1407_vm8, %v3466_v43  ;;  %vm1968_vm5 = vmand %vm1950_vm0, %vm1964_vm1 }
 0xa20   : > { %v3468_v55 = vld [vmem:[#allocation2 + $0xb0] sm:$0xff]  ;;  %v4979_v59 = vsel %vm1968_vm5, 1.0, %v5630_v0 }
 0xa21   : > { %v3467_v26 = vld [vmem:[#allocation2 + $0xa8] sm:$0xff] }
 0xa22   : > { %5454 = vmatprep.mubr.msk.f32.mxu1 %vm1407_vm8, %v3467_v26 }
 0xa23   : > { %5455 = vmatmul.mubr.msk.f32.gmra.mrb[50].mxu1 %vm1407_vm8, %v3468_v55  ;;  %vm1949_vm8 = vcmp.eq.s32.totalorder %v6514_v57, %v1946_v44 }
 0xa24   : > { %vm1967_vm2 = vmand %vm1949_vm8, %vm1964_vm1 }
 0xa25   : > { %v4978_v48 = vsel %vm1967_vm2, 1.0, %v5630_v0 }
 0xa26   : > { %v5600_v24 = vpack.i.bf16 %v4979_v59, %v4978_v48 }
 0xa29   : > { %v5582_v33 = vpop.permute.xlu1 %5581 }
 0xa2a   : > { %v5584_v9 = vunpack.i.h.bf16 %v5582_v33  ;;  %v5583_v23 = vunpack.i.l.bf16 %v5582_v33 }
 0xa2d   : > { %v5587_v60 = vpop.permute.xlu1 %5586 }
 0xa2e   : > { %v5589_v17 = vunpack.i.h.bf16 %v5587_v60  ;;  %v5588_v35 = vunpack.i.l.bf16 %v5587_v60 }
 0xa31   : > { %v5592_v19 = vpop.permute.xlu1 %5591 }
 0xa32   : > { %v5594_v5 = vunpack.i.h.bf16 %v5592_v19 }
 0xa35   : > { %v5597_v48 = vpop.permute.xlu1 %5596 }
 0xa87   : > { %v4159_v22 = vpop.f32.mrb[48].mxu0 }
 0xa88   : > { %v6862_v34 = vmul.f32 0.999995, %v4159_v22  ;;  %v5463_v46 = vpop.f32.mrb[49].mxu0 }
 0xa8a   : > { %v4165_v53 = vsel %vm4164_vm3, %v6862_v34, -inf }
 0xa8b   : > { %4166 = vmax.xlane.f32.xlu0 %v4165_v53 }
 0xaa1   : > { %5601 = vperm.xlu0 %5553, %v5600_v24  }
 0xaea   : > { %v5447_v28 = vpop.f32.mrb[44].mxu1 }
 0xaeb   : > { %v3677_v40 = vadd.f32 %v5447_v28, %v6662_v63  ;;  %v3623_v49 = vpop.f32.mrb[45].mxu1 }
 0xaec   : > { %v3676_v7 = vadd.f32 %v6662_v63, %v3623_v49 }
 0xaed   : > { %v3693_v57 = vmax.f32 %v3677_v40, 0.0  ;;  %v5593_v40 = vunpack.i.l.bf16 %v5592_v19 }
 0xaee   : > { %v3692_v16 = vmax.f32 %v3676_v7, 0.0  ;;  %v5450_v38 = vpop.f32.mrb[46].mxu1 }
 0xaef   : > { %v3709_v29 = vadd.f32 %v3693_v57, %v6410_v2  ;;  %v3679_v41 = vadd.f32 %v5450_v38, %v6662_v63  ;;  %v3633_v8 = vpop.f32.mrb[47].mxu1 }
 0xaf0   : > { %v3708_v50 = vadd.f32 %v3692_v16, %v6412_v4  ;;  %v3678_v52 = vadd.f32 %v6662_v63, %v3633_v8 }
 0xaf1   : > { %v3725_v11 = vmax.f32 %v3709_v29, 0.0  ;;  %v3695_v54 = vmax.f32 %v3679_v41, 0.0  ;;  %v5599_v29 = vunpack.i.h.bf16 %v5597_v48 }
 0xaf2   : > { %v3724_v30 = vmax.f32 %v3708_v50, 0.0  ;;  %v3694_v18 = vmax.f32 %v3678_v52, 0.0  ;;  %v5453_v32 = vpop.f32.mrb[48].mxu1 }
 0xaf3   : > { %v3981_v20 = vmul.f32 %v5584_v9, %v3725_v11  ;;  %v3711_v21 = vadd.f32 %v3695_v54, %v6452_v56  ;;  %v3681_v2 = vadd.f32 %v5453_v32, %v6662_v63  ;;  %v3643_v3 = vpop.f32.mrb[49].mxu1  ;;  %v5598_v9 = vunpack.i.l.bf16 %v5597_v48 }
 0xaf4   : > { %v3980_v1 = vmul.f32 %v5583_v23, %v3724_v30  ;;  %v3710_v45 = vadd.f32 %v3694_v18, %v6454_v37  ;;  %v3680_v4 = vadd.f32 %v6662_v63, %v3643_v3 }
 0xaf5   : > { %v4025_v27 = vsel %vm1377_vm6, %v3981_v20, 0.0  ;;  %v3727_v25 = vmax.f32 %v3711_v21, 0.0  ;;  %v3697_v42 = vmax.f32 %v3681_v2, 0.0 }
 0xaf6   : > { %v4024_v43 = vsel %vm1377_vm6, %v3980_v1, 0.0  ;;  %v3726_v26 = vmax.f32 %v3710_v45, 0.0  ;;  %v3696_v55 = vmax.f32 %v3680_v4, 0.0  ;;  %v5456_v51 = vpop.f32.mrb[50].mxu1 }
 0xaf7   : > { %v4026_v56 = vadd.f32 %v4025_v27, %v4024_v43  ;;  %v3983_v22 = vmul.f32 %v5589_v17, %v3727_v25  ;;  %v3713_v46 = vadd.f32 %v3697_v42, %v6466_v47  ;;  %v3683_v53 = vadd.f32 %v5456_v51, %v6662_v63  ;;  %v3653_v37 = vpop.f32.mrb[51].mxu1 }
 0xaf8   : > { %v3982_v31 = vmul.f32 %v5588_v35, %v3726_v26  ;;  %v3712_v44 = vadd.f32 %v3696_v55, %v6468_v10  ;;  %v3682_v6 = vadd.f32 %v6662_v63, %v3653_v37 }
 0xaf9   : > { %v4027_v59 = vrot.slane %v4026_v56, 4  ;;  %v4034_v24 = vsel %vm1377_vm6, %v3983_v22, 0.0  ;;  %v3729_v33 = vmax.f32 %v3713_v46, 0.0  ;;  %v3699_v28 = vmax.f32 %v3683_v53, 0.0 }
 0xafa   : > { %v4033_v49 = vsel %vm1377_vm6, %v3982_v31, 0.0  ;;  %v3728_v7 = vmax.f32 %v3712_v44, 0.0  ;;  %v3698_v47 = vmax.f32 %v3682_v6, 0.0  ;;  %v1925_v44 = vmax.f32 %v6158_v58, 0.0 }
 0xafb   : > { %v4028_v60 = vadd.f32 %v4027_v59, %v4026_v56  ;;  %v4035_v57 = vadd.f32 %v4034_v24, %v4033_v49  ;;  %v3985_v16 = vmul.f32 %v5594_v5, %v3729_v33  ;;  %v3715_v38 = vadd.f32 %v3699_v28, %v6474_v12 }
 0xafc   : > { %v3984_v10 = vmul.f32 %v5593_v40, %v3728_v7  ;;  %v3714_v63 = vadd.f32 %v3698_v47, %v6476_v39  ;;  %v1924_v6 = vmax.f32 %v6165_v62, 0.0  ;;  %v1929_v24 = vadd.f32 %v1925_v44, %v5915_v13 }
 0xafd   : > { %v4029_v41 = vrot.slane %v4028_v60, 2  ;;  %v4036_v8 = vrot.slane %v4035_v57, 4  ;;  %v4043_v50 = vsel %vm1377_vm6, %v3985_v16, 0.0  ;;  %v3731_v52 = vmax.f32 %v3715_v38, 0.0 }
 0xafe   : > { %v4042_v11 = vsel %vm1377_vm6, %v3984_v10, 0.0  ;;  %v3730_v54 = vmax.f32 %v3714_v63, 0.0  ;;  %v1928_v33 = vadd.f32 %v1924_v6, %v5917_v14  ;;  %v1933_v40 = vmax.f32 %v1929_v24, 0.0 }
 0xaff   : > { %v4030_v23 = vadd.f32 %v4029_v41, %v4028_v60  ;;  %v4037_v30 = vadd.f32 %v4036_v8, %v4035_v57  ;;  %v4044_v18 = vadd.f32 %v4043_v50, %v4042_v11  ;;  %v3987_v32 = vmul.f32 %v5599_v29, %v3731_v52 }
 0xb00   : > { %v3986_v19 = vmul.f32 %v5598_v9, %v3730_v54  ;;  %v1932_v49 = vmax.f32 %v1928_v33, 0.0 }
 0xb01   : > { %v4038_v20 = vrot.slane %v4037_v30, 2  ;;  %v4045_v12 = vrot.slane %v4044_v18, 4  ;;  %v4052_v21 = vsel %vm1377_vm6, %v3987_v32, 0.0  ;;  %v4031_v2 = vrot.slane %v4030_v23, 1 }
 0xb02   : > { %v4051_v39 = vsel %vm1377_vm6, %v3986_v19, 0.0 }
 0xb03   : > { %v4039_v3 = vadd.f32 %v4038_v20, %v4037_v30  ;;  %v4046_v1 = vadd.f32 %v4045_v12, %v4044_v18  ;;  %v4053_v45 = vadd.f32 %v4052_v21, %v4051_v39  ;;  %v4032_v25 = vadd.f32 %v4031_v2, %v4030_v23  ;;  %v6928_v20 = vld [vmem:[%s1208_s30] sm:$0xff] }
 0xb05   : > { %v4040_v4 = vrot.slane %v4039_v3, 1  ;;  %v4047_v17 = vrot.slane %v4046_v1, 2  ;;  %v4054_v27 = vrot.slane %v4053_v45, 4 }
 0xb07   : > { %v4041_v42 = vadd.f32 %v4040_v4, %v4039_v3  ;;  %v4048_v35 = vadd.f32 %v4047_v17, %v4046_v1  ;;  %v4055_v43 = vadd.f32 %v4054_v27, %v4053_v45 }
 0xb09   : > { %v4080_v26 = vsel %vm4066_vm13, %v4041_v42, %v4032_v25  ;;  %v4049_v55 = vrot.slane %v4048_v35, 1  ;;  %v4056_v51 = vrot.slane %v4055_v43, 2  ;;  %vm4222_vm13 = vcmask 1044480  }
 0xb0b   : > { %v4050_v56 = vadd.f32 %v4049_v55, %v4048_v35  ;;  %v4057_v22 = vadd.f32 %v4056_v51, %v4055_v43 }
 0xb0d   : > { %v4081_v46 = vsel %vm7041_vm14, %v4050_v56, %v4080_v26  ;;  %v4058_v53 = vrot.slane %v4057_v22, 1 }
 0xb0f   : > { %v4059_v37 = vadd.f32 %v4058_v53, %v4057_v22 }
 0xb11   : > { %v4082_v5 = vsel %vm4070_vm12, %v4059_v37, %v4081_v46  ;;  %vm7043_vm12 = vmmov 0  }
 0xb12   : > { %4084 = vst.msk [vmem:[#allocation3 + $0x6] sm:$0xf] %vm4073_vm4, %v4082_v5  ;;  %vm7042_vm4 = vcmask 122880  }
 0xb18   : > { %v4167_v31 = vpop.xlane.xlu0 %4166 }
 0xb19   : > { %v4168_v48 = vsub.f32 %v6862_v34, %v4167_v31 }
 0xb1b   : > { %v4169_v59 = vmul.f32 1.442695, %v4168_v48 }
 0xb1d   : > { %5605 = vpow2.f32 %v4169_v59 }
 0xb20   : > { %v5602_v28 = vpop.permute.xlu0 %5601 }
 0xb21   : > { %v5604_v7 = vunpack.i.h.bf16 %v5602_v28  ;;  %v5603_v47 = vunpack.i.l.bf16 %v5602_v28 }
 0xb23   : > { %v2000_v60 = vmul.f32 %v5604_v7, %v1933_v40  ;;  %v1999_v57 = vmul.f32 %v5603_v47, %v1932_v49 }
 0xb25   : > { %v2011_v16 = vsel %vm1377_vm6, %v2000_v60, 0.0  ;;  %v2010_v58 = vsel %vm1377_vm6, %v1999_v57, 0.0 }
 0xb26   : > { %v2012_v62 = vadd.f32 %v2011_v16, %v2010_v58 }
 0xb27   : > { %v5606_v38 = vpop.eup %5605 }
 0xb28   : > { %v2013_v34 = vrot.slane %v2012_v62, 4  ;;  %v4171_v29 = vsel %vm4164_vm3, %v5606_v38, 0.0 }
 0xb29   : > { %4172 = vadd.xlane.f32.xlu1 %v4171_v29 }
 0xb2a   : > { %v2014_v13 = vadd.f32 %v2013_v34, %v2012_v62 }
 0xb2c   : > { %v2015_v14 = vrot.slane %v2014_v13, 2 }
 0xb2e   : > { %v2016_v10 = vadd.f32 %v2015_v14, %v2014_v13 }
 0xb30   : > { %v2017_v63 = vrot.slane %v2016_v10, 1 }
 0xb32   : > { %v2018_v41 = vadd.f32 %v2017_v63, %v2016_v10 }
 0xb34   : > { %4075 = vst.msk [vmem:[#allocation3 + $0x5] sm:$0x1] %vm7042_vm4, %v2018_v41 }
 0xb5c   : > { %4183 = vxpose.xlu1.b32.start.end [1/1] (short) (narrow) %v6841_v15, 16  ;;  %v4339_v15 = vld [vmem:[#allocation3 + $0x5] sm:$0x1f] }
 0xbb6   : > { %v4173_v8 = vpop.xlane.xlu1 %4172 }
 0xbb7   : > { %5607 = vrcp.f32 %v4173_v8 }
 0xbc1   : > { %v5608_v50 = vpop.eup %5607 }
 0xbc2   : > { %v4175_v52 = vmul.f32 %v5608_v50, %v5606_v38 }
 0xbc4   : > { %5464 = vmatprep.subr.msk.mxu0 %vm4222_vm13, %v4175_v52  ;;  %v4176_v54 = vsel %vm4164_vm3, %v4175_v52, 0.0 }
 0xbc5   : > { %5465 = vmatpush3.msk.msra.mxu0 %vm4222_vm13, %v4175_v52  ;;  %v4177_v23 = vrot.slane %v4176_v54, 4 }
 0xbc6   : > { %5532 = vmatprep.subr.bf16.mxu0 %v5634_v36 }
 0xbc7   : > { %v4178_v36 = vadd.f32 %v4177_v23, %v4176_v54 }
 0xbc9   : > { %v4179_v30 = vrot.slane %v4178_v36, 2 }
 0xbcb   : > { %v4180_v18 = vadd.f32 %v4179_v30, %v4178_v36 }
 0xbcd   : > { %v4181_v32 = vrot.slane %v4180_v18, 1 }
 0xbcf   : > { %v4182_v19 = vadd.f32 %v4181_v32, %v4180_v18 }
 0xbd1   : > { %v4301_v21 = vmul.f32 %v4182_v19, %v6928_v20 }
 0xbdc   : > { %v4199_v9 = vpop.trf.xlu1 }
 0xbdd   : > { %5466 = vmatprep.mubr.msk.f32.mxu0 %vm4215_vm15, %v4199_v9 }
 0xbe0   : > { %v4200_v11 = vpop.trf.xlu1 }
 0xbe1   : > { %5467 = vmatmul.mubr.msk.f32.vlgmr.msra.gmra.mrb[50].mxu0 %vm4215_vm15, %v4200_v11 }
 0xbe2   : > { %5534 = vmatpush3.bf16.msra.mxu0 %v6653_v61  ;;  %5473 = vmatprep.mubr.msk.f32.mxu0 %vm7043_vm12, %v5630_v0  ;;  %v6926_v61 = vld [vmem:[%s1208_s30 + $0x8] sm:$0xff] }
 0xbe3   : > { %v4302_v0 = vmul.f32 %v4182_v19, %v6926_v61 }
 0xbe5   : > { %5474 = vmatmul.mubr.msk.f32.vlgmr.msra.gmra.mrb[52].mxu0 %vm1377_vm6, %v4339_v15  ;;  %vm7044_vm6 = vcmask 64512  }
 0xbe6   : > { %vm7045_vm9 = vmmov %vm7044_vm6 }
 0xbe7   : > { %vm7046_vm10 = vmmov %vm7044_vm6 }
 0xbe8   : > { %vm7047_vm11 = vmmov %vm7044_vm6 }
 0xbe9   : > { %vm7048_vm7 = vmmov %vm7044_vm6 }
 0xbea   : > { %vm7049_vm8 = vmmov %vm7044_vm6 }
 0xbeb   : > { %vm7050_vm1 = vmmov %vm7044_vm6 }
 0xbec   : > { %vm7051_vm0 = vmmov %vm7050_vm1 }
 0xbed   : > { %vm7053_vm2 = vmmov %vm7051_vm0 }
 0xbee   : > { %vm7054_vm5 = vmmov %vm7051_vm0 }
 0xbef   : > { %vm7055_vm14 = vmmov %vm7051_vm0 }
 0xcb4   : > { %v5468_v12 = vpop.f32.mrb[50].mxu0 }
 0xcb5   : > { %v4304_v39 = vsub.f32 %v5468_v12, %v4302_v0  ;;  %v4292_v2 = vpop.f32.mrb[51].mxu0 }
 0xcb6   : > { %v4303_v3 = vsub.f32 %v4292_v2, %v4301_v21 }
 0xcb7   : > { %v4306_v1 = vmul.f32 %v4304_v39, %v4304_v39 }
 0xcb8   : > { %v4305_v45 = vmul.f32 %v4303_v3, %v4303_v3  ;;  %v4409_v4 = vpop.f32.mrb[52].mxu0 }
 0xcb9   : > { %v4308_v17 = vsel %vm7044_vm6, %v4306_v1, 0.0  ;;  %v4413_v27 = vmul.f32 0.999995, %v4409_v4  ;;  %v5475_v25 = vpop.f32.mrb[53].mxu0 }
 0xcba   : > { %v4307_v42 = vsel %vm7045_vm9, %v4305_v45, 0.0 }
 0xcbb   : > { %v4309_v35 = vadd.f32 %v4308_v17, %v4307_v42  ;;  %v4414_v43 = vsel %vm4164_vm3, %v4413_v27, -inf }
 0xcbc   : > { %4415 = vmax.xlane.f32.xlu0 %v4414_v43 }
 0xcbd   : > { %v4310_v26 = vrot.slane %v4309_v35, 4 }
 0xcbf   : > { %v4311_v55 = vadd.f32 %v4310_v26, %v4309_v35 }
 0xcc1   : > { %v4312_v51 = vrot.slane %v4311_v55, 2 }
 0xcc3   : > { %v4313_v56 = vadd.f32 %v4312_v51, %v4311_v55 }
 0xcc5   : > { %v4314_v22 = vrot.slane %v4313_v56, 1 }
 0xcc7   : > { %v4315_v46 = vadd.f32 %v4314_v22, %v4313_v56 }
 0xcc9   : > { %v4316_v53 = vmax.f32 %v4315_v46, 1e-24 }
 0xccb   : > { %5609 = vrsqrt.f32 %v4316_v53 }
 0xcd5   : > { %v5610_v37 = vpop.eup %5609 }
 0xcd6   : > { %v4318_v5 = vmul.f32 %v5610_v37, %v4303_v3  ;;  %v4319_v31 = vmul.f32 %v5610_v37, %v4304_v39 }
 0xcd8   : > { %v4320_v44 = vmul.f32 %v4318_v5, %v4318_v5  ;;  %v4321_v6 = vmul.f32 %v4319_v31, %v4319_v31 }
 0xcda   : > { %v4322_v48 = vsel %vm7046_vm10, %v4320_v44, 0.0  ;;  %v4323_v59 = vsel %vm7047_vm11, %v4321_v6, 0.0 }
 0xcdb   : > { %v4324_v24 = vadd.f32 %v4323_v59, %v4322_v48 }
 0xcdd   : > { %4325 = vadd.xlane.f32.xlu1 %v4324_v24 }
 0xd49   : > { %v4416_v33 = vpop.xlane.xlu0 %4415 }
 0xd4a   : > { %v4417_v28 = vsub.f32 %v4413_v27, %v4416_v33 }
 0xd4c   : > { %v4418_v40 = vmul.f32 1.442695, %v4417_v28 }
 0xd4e   : > { %5611 = vpow2.f32 %v4418_v40 }
 0xd58   : > { %v5612_v49 = vpop.eup %5611 }
 0xd59   : > { %v4420_v7 = vsel %vm4164_vm3, %v5612_v49, 0.0 }
 0xd5a   : > { %4421 = vadd.xlane.f32.xlu0 %v4420_v7 }
 0xd6a   : > { %v4326_v47 = vpop.xlane.xlu1 %4325 }
 0xd6b   : > { %v4327_v60 = vrot.slane %v4326_v47, 4 }
 0xd6d   : > { %v4328_v57 = vadd.f32 %v4327_v60, %v4326_v47 }
 0xd6f   : > { %v4329_v16 = vrot.slane %v4328_v57, 2 }
 0xd71   : > { %v4330_v58 = vadd.f32 %v4329_v16, %v4328_v57 }
 0xd73   : > { %v4331_v62 = vrot.slane %v4330_v58, 1 }
 0xd75   : > { %v4332_v38 = vadd.f32 %v4331_v62, %v4330_v58 }
 0xd77   : > { %5535 = vpush %v4332_v38 }
 0xd87   : > { %4432 = vxpose.xlu0.b32.start.end [1/1] (short) (narrow) %v4339_v15, 16 }
 0xda8   : > { %s5536_s3 = spop %5535 }
 0xda9   : > { %v4334_v34 = vstv %s5536_s3 }
 0xdaa   : > { %v4335_v29 = vmax.f32 %v4334_v34, 1e-24 }
 0xdac   : > { %5613 = vrsqrt.f32 %v4335_v29 }
 0xdb6   : > { %v5614_v13 = vpop.eup %5613 }
 0xdb7   : > { %v4337_v14 = vmul.f32 %v5614_v13, %v4318_v5  ;;  %v4338_v10 = vmul.f32 %v5614_v13, %v4319_v31 }
 0xdb9   : > { %4586 = vst.msk [vmem:[%s6942_s0] sm:$0xff] %vm7048_vm7, %v4337_v14 }
 0xdba   : > { %4587 = vst.msk [vmem:[%s6942_s0 + $0x8] sm:$0xff] %vm7049_vm8, %v4338_v10 }
 0xde7   : > { %v4422_v63 = vpop.xlane.xlu0 %4421 }
 0xde8   : > { %5615 = vrcp.f32 %v4422_v63 }
 0xdf2   : > { %v5616_v41 = vpop.eup %5615 }
 0xdf3   : > { %v4424_v8 = vmul.f32 %v5616_v41, %v5612_v49 }
 0xdf5   : > { %5476 = vmatprep.subr.msk.mxu0 %vm4222_vm13, %v4424_v8  ;;  %v4425_v9 = vsel %vm4164_vm3, %v4424_v8, 0.0  ;;  %vm7052_vm3 = vmmov %vm7051_vm0 }
 0xdf6   : > { %5477 = vmatpush3.msk.msra.mxu0 %vm4222_vm13, %v4424_v8  ;;  %v4426_v11 = vrot.slane %v4425_v9, 4 }
 0xdf8   : > { %v4427_v15 = vadd.f32 %v4426_v11, %v4425_v9 }
 0xdfa   : > { %v4428_v54 = vrot.slane %v4427_v15, 2 }
 0xdfc   : > { %v4429_v23 = vadd.f32 %v4428_v54, %v4427_v15 }
 0xdfe   : > { %v4430_v36 = vrot.slane %v4429_v23, 1 }
 0xe00   : > { %v4431_v30 = vadd.f32 %v4430_v36, %v4429_v23 }
 0xe02   : > { %v4549_v18 = vmul.f32 %v4431_v30, %v6926_v61  ;;  %v4548_v19 = vmul.f32 %v4431_v30, %v6928_v20 }
 0xe07   : > { %v4448_v50 = vpop.trf.xlu0 }
 0xe08   : > { %5478 = vmatprep.mubr.msk.f32.mxu0 %vm4215_vm15, %v4448_v50 }
 0xe0b   : > { %v4449_v52 = vpop.trf.xlu0 }
 0xe0c   : > { %5479 = vmatmul.mubr.msk.f32.vlgmr.msra.gmra.mrb[54].mxu0 %vm4215_vm15, %v4449_v52 }
 0xedf   : > { %v5480_v32 = vpop.f32.mrb[54].mxu0 }
 0xee0   : > { %v4551_v0 = vsub.f32 %v5480_v32, %v4549_v18  ;;  %v4539_v12 = vpop.f32.mrb[55].mxu0 }
 0xee1   : > { %v4550_v21 = vsub.f32 %v4539_v12, %v4548_v19 }
 0xee2   : > { %v4553_v39 = vmul.f32 %v4551_v0, %v4551_v0 }
 0xee3   : > { %v4552_v2 = vmul.f32 %v4550_v21, %v4550_v21 }
 0xee4   : > { %v4555_v3 = vsel %vm7050_vm1, %v4553_v39, 0.0 }
 0xee5   : > { %v4554_v1 = vsel %vm7051_vm0, %v4552_v2, 0.0 }
 0xee6   : > { %v4556_v45 = vadd.f32 %v4555_v3, %v4554_v1 }
 0xee8   : > { %v4557_v4 = vrot.slane %v4556_v45, 4 }
 0xeea   : > { %v4558_v17 = vadd.f32 %v4557_v4, %v4556_v45 }
 0xeec   : > { %v4559_v27 = vrot.slane %v4558_v17, 2 }
 0xeee   : > { %v4560_v25 = vadd.f32 %v4559_v27, %v4558_v17 }
 0xef0   : > { %v4561_v42 = vrot.slane %v4560_v25, 1 }
 0xef2   : > { %v4562_v35 = vadd.f32 %v4561_v42, %v4560_v25 }
 0xef4   : > { %v4563_v61 = vmax.f32 %v4562_v35, 1e-24 }
 0xef6   : > { %5617 = vrsqrt.f32 %v4563_v61 }
 0xf00   : > { %v5618_v43 = vpop.eup %5617 }
 0xf01   : > { %v4565_v20 = vmul.f32 %v5618_v43, %v4550_v21  ;;  %v4566_v26 = vmul.f32 %v5618_v43, %v4551_v0 }
 0xf03   : > { %v4567_v55 = vmul.f32 %v4565_v20, %v4565_v20  ;;  %v4568_v51 = vmul.f32 %v4566_v26, %v4566_v26 }
 0xf05   : > { %v4569_v56 = vsel %vm7052_vm3, %v4567_v55, 0.0  ;;  %v4570_v22 = vsel %vm7053_vm2, %v4568_v51, 0.0 }
 0xf06   : > { %v4571_v46 = vadd.f32 %v4570_v22, %v4569_v56 }
 0xf08   : > { %4572 = vadd.xlane.f32.xlu0 %v4571_v46 }
 0xf95   : > { %v4573_v53 = vpop.xlane.xlu0 %4572 }
 0xf96   : > { %v4574_v37 = vrot.slane %v4573_v53, 4 }
 0xf98   : > { %v4575_v5 = vadd.f32 %v4574_v37, %v4573_v53 }
 0xf9a   : > { %v4576_v31 = vrot.slane %v4575_v5, 2 }
 0xf9c   : > { %v4577_v44 = vadd.f32 %v4576_v31, %v4575_v5 }
 0xf9e   : > { %v4578_v6 = vrot.slane %v4577_v44, 1 }
 0xfa0   : > { %v4579_v48 = vadd.f32 %v4578_v6, %v4577_v44 }
 0xfa2   : > { %5537 = vpush %v4579_v48 }
 0xfd3   : > { %s5538_s7 = spop %5537 }
 0xfd4   : > { %v4581_v59 = vstv %s5538_s7 }
 0xfd5   : > { %v4582_v24 = vmax.f32 %v4581_v59, 1e-24 }
 0xfd7   : > { %5619 = vrsqrt.f32 %v4582_v24 }
 0xfe1   : > { %v5620_v33 = vpop.eup %5619 }
 0xfe2   : > { %v4584_v28 = vmul.f32 %v5620_v33, %v4565_v20  ;;  %v4585_v40 = vmul.f32 %v5620_v33, %v4566_v26 }
 0xfe4   : > { %4588 = vst.msk [vmem:[%s6942_s0 + $0x10] sm:$0xff] %vm7054_vm5, %v4584_v28 }
 0xfe5   : > { %4589 = vst.msk [vmem:[%s6942_s0 + $0x18] sm:$0xff] %vm7055_vm14, %v4585_v40 }
 0xfe6 PF: > { %s7056_s4 = sld [smem:[#allocation4_spill]] }
 0xfec   : > { %s36_s27 = sadd.s32 1, %s7056_s4  }
 0xfed   : > { %p33_p4 = scmp.ge.s32.totalorder %s36_s27, 4  }
 0xfef   :  { %35 = sbr.rel (!%p33_p4) target bundleno = 12 (0xc), region = 229 }

</bundles_post_ra>
